<compile_context>
chip_gen: v7x
topology: tpu7x:2x2x1
jax: 0.10.0
libtpu: 0.0.40
codegen_flags: <defaults>
</compile_context>

<pallas_src>
import jax
import jax.numpy as jnp
from jax.experimental import pallas as pl
from jax.experimental.pallas import tpu as pltpu

# ----------------------------- config (small) -------------------------------
INP_VOCAB = 20
TARG_VOCAB = 10
EMB_DIM = 32
PRENET = [32, 16]          # prenet_sizes
GRU_UNITS = 32             # cbhg_gru_units
K_FILTERS = 4              # cbhg_filters (bank kernel sizes 1..K)
PROJECTIONS = [16, 16]     # cbhg_projections (last == prenet[-1] -> pre_highway skipped)
POST_UNITS = [32, 32]      # post_cbhg_layers_units
B, T = 2, 8

PB = 8                     # batch rows padded to one full sublane tile per time step
TBP = T * PB               # 64 time-major rows inside the kernel
D = PRENET[-1]             # CBHG channel width (16)
VOCAB_PAD = 32             # vocab rows padded for the one-hot embedding matmul
OUT_PAD = 128              # lane-dense final projection width (sliced to TARG_VOCAB outside)
BANK_OFFSETS = (-2, -1, 0, 1)   # union of time taps for conv kernel sizes 1..4
WCOLS = 256                # lane width of both parameter slabs

VMEM_SPEC = pl.BlockSpec(memory_space=pltpu.MemorySpace.VMEM)


# ------------------------- static slab layouts -------------------------------
def _w_layout():
    shapes = [
        ("emb",   VOCAB_PAD, EMB_DIM),
        ("pre0",  EMB_DIM, PRENET[0]),
        ("pre1",  PRENET[0], PRENET[1]),
        ("bank",  len(BANK_OFFSETS) * D, K_FILTERS * D),
        ("proj1", 3 * K_FILTERS * D, PROJECTIONS[0]),
        ("proj2", 3 * PROJECTIONS[0], PROJECTIONS[1]),
        ("hw",    4 * D, 2 * D),
        ("gru_x", 2 * D, 6 * GRU_UNITS),
        ("gru_h", 2 * GRU_UNITS, 6 * GRU_UNITS),
        ("l1_x",  4 * GRU_UNITS, 8 * POST_UNITS[0]),
        ("l1_h",  2 * POST_UNITS[0], 8 * POST_UNITS[0]),
        ("l2_x",  4 * POST_UNITS[0], 8 * POST_UNITS[1]),
        ("l2_h",  2 * POST_UNITS[1], 8 * POST_UNITS[1]),
        ("out",   2 * POST_UNITS[1], OUT_PAD),
    ]
    layout, off = {}, 0
    for name, nr, nc in shapes:
        assert nr % 16 == 0 and off % 16 == 0       # keep bf16 sublane-tile alignment
        layout[name] = (off, nr, nc)
        off += nr
    return layout, off


def _b_layout():
    shapes = [
        ("pre0_b", PRENET[0]), ("pre1_b", PRENET[1]),
        ("bank_scale", K_FILTERS * D), ("bank_shift", K_FILTERS * D),
        ("proj1_scale", PROJECTIONS[0]), ("proj1_shift", PROJECTIONS[0]),
        ("proj2_scale", PROJECTIONS[1]), ("proj2_shift", PROJECTIONS[1]),
        ("hw_b0", 2 * D), ("hw_b1", 2 * D), ("hw_b2", 2 * D), ("hw_b3", 2 * D),
        ("gru_xb", 6 * GRU_UNITS), ("gru_hb", 6 * GRU_UNITS),
        ("l1_b", 8 * POST_UNITS[0]), ("l2_b", 8 * POST_UNITS[1]),
        ("out_b", OUT_PAD),
    ]
    return {name: (i, nc) for i, (name, nc) in enumerate(shapes)}, len(shapes)


_WL, WROWS = _w_layout()
_BL, BROWS = _b_layout()


# ----------------------------- the fused kernel -------------------------------
def _cbhg_fused_kernel(ids_ref, w_ref, b_ref, o_ref, io_ref, gxg_ref, gxl_ref):
    f32, bf16 = jnp.float32, jnp.bfloat16

    def W(name):                           # bf16 weight block (static slice)
        r0, nr, nc = _WL[name]
        return w_ref[r0:r0 + nr, :nc]

    def Bias(name):                        # (1, nc) f32 bias/scale row
        r, nc = _BL[name]
        return b_ref[r:r + 1, :nc]

    def mm(a, b):                          # MXU matmul: bf16 operands, f32 accumulate
        return jnp.dot(a, b, preferred_element_type=f32)

    def sig(x):                            # exact logistic sigmoid, single EUP tanh
        return 0.5 * jnp.tanh(0.5 * x) + 0.5

    def tshift(v, off):                    # a[t] = v[t + off], zeros outside [0, T)
        if off == 0:
            return v
        n = abs(off) * PB
        z = jnp.zeros((n, v.shape[1]), v.dtype)
        if off > 0:
            return jnp.concatenate([v[n:], z], axis=0)
        return jnp.concatenate([z, v[:-n]], axis=0)

    def tflip(v):                          # reverse the T time blocks (8-row aligned)
        return jnp.concatenate(
            [v[(T - 1 - t) * PB:(T - t) * PB] for t in range(T)], axis=0)

    # ---- embedding: fused one-hot gather on the MXU ----
    ids = ids_ref[...]                                          # (TBP, 1) int32
    iota = jax.lax.broadcasted_iota(jnp.int32, (TBP, VOCAB_PAD), 1)
    onehot = jnp.where(iota == ids, 1.0, 0.0).astype(bf16)
    x = mm(onehot, W("emb"))                                    # (TBP, EMB_DIM)

    # ---- prenet: (Linear -> ReLU) x2; dropout == identity at inference ----
    x = jnp.maximum(mm(x.astype(bf16), W("pre0")) + Bias("pre0_b"), 0.0)
    x = jnp.maximum(mm(x.astype(bf16), W("pre1")) + Bias("pre1_b"), 0.0)
    cbhg_in = x                                                 # (TBP, D) f32

    # ---- conv1d bank (k=1..4 folded into 4 taps, ONE matmul) -> ReLU -> BN ----
    bank_in = jnp.concatenate(
        [tshift(cbhg_in, -2), tshift(cbhg_in, -1), cbhg_in, tshift(cbhg_in, 1)],
        axis=1).astype(bf16)                                    # (TBP, 4D)
    y = jnp.maximum(mm(bank_in, W("bank")), 0.0)
    y = y * Bias("bank_scale") + Bias("bank_shift")             # (TBP, K*D)

    # ---- MaxPool1d(kernel=2, stride=1, padding=1)[:T]: y[t] = max(y[t-1], y[t]) ----
    prev = jnp.concatenate([jnp.full((PB, y.shape[1]), -1e30, f32), y[:-PB]], axis=0)
    y = jnp.maximum(y, prev)

    # ---- conv1d projections (k=3, ONE matmul each) + folded BN ----
    def conv3(v, wname, sname, shname, relu):
        taps = jnp.concatenate([tshift(v, -1), v, tshift(v, 1)], axis=1).astype(bf16)
        out = mm(taps, W(wname))
        if relu:
            out = jnp.maximum(out, 0.0)
        return out * Bias(sname) + Bias(shname)

    y = conv3(y, "proj1", "proj1_scale", "proj1_shift", True)
    y = conv3(y, "proj2", "proj2_scale", "proj2_shift", False)

    # ---- residual (pre_highway skipped: projections[-1] == D) + 4 highways ----
    y = y + cbhg_in
    hw_w = W("hw")                                              # (4D, 2D) bf16
    for i in range(4):
        hg = mm(y.astype(bf16), hw_w[i * D:(i + 1) * D, :]) + Bias("hw_b%d" % i)
        hv = jnp.maximum(hg[:, :D], 0.0)
        tg = sig(hg[:, D:])
        y = hv * tg + y * (1.0 - tg)

    # ---- bidirectional GRU: fwd & bwd lanes fused into one recurrence ----
    # combined gate lanes: [r_f r_b | z_f z_b | n_f n_b], each block H wide.
    H = GRU_UNITS
    gxg_ref[...] = (mm(jnp.concatenate([y, tflip(y)], axis=1).astype(bf16), W("gru_x"))
                    + Bias("gru_xb"))                           # (TBP, 6H)
    whg = W("gru_h")                                            # (2H, 6H) block-diag
    bhg = Bias("gru_hb")
    h = jnp.zeros((PB, 2 * H), f32)
    for s in range(T):                                          # static unroll (T=8)
        tb = T - 1 - s
        xg = gxg_ref[s * PB:(s + 1) * PB, :]
        hh = mm(h.astype(bf16), whg) + bhg                      # one hidden dot / step
        sg = sig(xg[:, :4 * H] + hh[:, :4 * H])                 # one sigmoid: r|z, both dirs
        rg, zg = sg[:, :2 * H], sg[:, 2 * H:]
        ng = jnp.tanh(xg[:, 4 * H:] + rg * hh[:, 4 * H:])
        h = (1.0 - zg) * ng + zg * h
        io_ref[s * PB:(s + 1) * PB, :H] = h[:, :H]              # fwd output @ t = s
        io_ref[tb * PB:(tb + 1) * PB, H:] = h[:, H:]            # bwd output @ t = T-1-s

    # ---- post-CBHG: [biLSTM, BN] x 2 (each BN folded into the next matmul) ----
    # combined gate lanes: [i_f i_b | f_f f_b | o_f o_b | g_f g_b], each H wide.
    def bilstm(xw, bw, hw, h0, c0, Hl):
        xin = io_ref[...]                                       # previous layer output
        gxl_ref[...] = (mm(jnp.concatenate([xin, tflip(xin)], axis=1).astype(bf16), W(xw))
                        + Bias(bw))                             # b_ih + b_hh folded in
        wh = W(hw)                                              # (2H, 8H) block-diag
        h, c = h0, c0
        for s in range(T):                                      # static unroll (T=8)
            tb = T - 1 - s
            g = gxl_ref[s * PB:(s + 1) * PB, :] + mm(h.astype(bf16), wh)
            sg = sig(g[:, :6 * Hl])                             # i|f|o, both dirs, one push
            ig, fg, og = sg[:, :2 * Hl], sg[:, 2 * Hl:4 * Hl], sg[:, 4 * Hl:]
            c = fg * c + ig * jnp.tanh(g[:, 6 * Hl:])
            h = og * jnp.tanh(c)
            io_ref[s * PB:(s + 1) * PB, :Hl] = h[:, :Hl]
            io_ref[tb * PB:(tb + 1) * PB, Hl:] = h[:, Hl:]
        return h, c

    H1, H2 = POST_UNITS
    z0 = jnp.zeros((PB, 2 * H1), jnp.float32)
    h1, c1 = bilstm("l1_x", "l1_b", "l1_h", z0, z0, H1)
    # reference forward chains the first LSTM's final (hn, cn) into the second (`if i > 0:`)
    bilstm("l2_x", "l2_b", "l2_h", h1, c1, H2)

    # ---- final projection (BN2 folded in); lane-dense 128-wide store ----
    o_ref[...] = mm(io_ref[...].astype(bf16), W("out")) + Bias("out_b")


# ----------------------------- parameters ------------------------------------
class KeyGen:
    def __init__(self, seed=0):
        self.key = jax.random.PRNGKey(seed)

    def __call__(self):
        self.key, k = jax.random.split(self.key)
        return k


def _init(key, shape, scale=0.1):
    return scale * jax.random.normal(key, shape, dtype=jnp.float32)


def bn_params(kg, c):
    return {"gamma": 1.0 + 0.05 * jax.random.normal(kg(), (c,), dtype=jnp.float32),
            "beta": 0.05 * jax.random.normal(kg(), (c,), dtype=jnp.float32),
            "mean": 0.05 * jax.random.normal(kg(), (c,), dtype=jnp.float32),
            "var": 1.0 + 0.1 * jnp.abs(jax.random.normal(kg(), (c,), dtype=jnp.float32))}


def rnn_params(kg, d, h, gates):
    return {"w_ih": _init(kg(), (gates * h, d)),
            "w_hh": _init(kg(), (gates * h, h)),
            "b_ih": _init(kg(), (gates * h,), 0.01),
            "b_hh": _init(kg(), (gates * h,), 0.01)}


def build_params(kg):
    p = {}
    p["embedding"] = _init(kg(), (INP_VOCAB, EMB_DIM), 1.0)
    in_sizes = [EMB_DIM] + PRENET[:-1]
    p["prenet"] = [{"w": _init(kg(), (i, o)), "b": _init(kg(), (o,), 0.01)}
                   for i, o in zip(in_sizes, PRENET)]
    in_dim = PRENET[-1]
    p["bank"] = [{"w": _init(kg(), (in_dim, in_dim, k)), "bn": bn_params(kg, in_dim)}
                 for k in range(1, K_FILTERS + 1)]
    proj_in = [K_FILTERS * in_dim] + PROJECTIONS[:-1]
    p["proj"] = [{"w": _init(kg(), (co, ci, 3)), "bn": bn_params(kg, co)}
                 for ci, co in zip(proj_in, PROJECTIONS)]
    p["highway"] = [{"wh": _init(kg(), (in_dim, in_dim)),
                     "bh": jnp.zeros((in_dim,), jnp.float32),        # Highway H bias = 0
                     "wt": _init(kg(), (in_dim, in_dim)),
                     "bt": -1.0 * jnp.ones((in_dim,), jnp.float32)}  # Highway T bias = -1
                    for _ in range(4)]
    p["gru"] = {"fwd": rnn_params(kg, in_dim, GRU_UNITS, 3),
                "bwd": rnn_params(kg, in_dim, GRU_UNITS, 3)}
    post_units = [GRU_UNITS] + POST_UNITS
    p["post"] = []
    for i in range(1, len(post_units)):
        lstm = {"fwd": rnn_params(kg, post_units[i - 1] * 2, post_units[i], 4),
                "bwd": rnn_params(kg, post_units[i - 1] * 2, post_units[i], 4)}
        p["post"].append(("lstm", lstm, post_units[i]))
        p["post"].append(("bn", bn_params(kg, post_units[i] * 2), post_units[i] * 2))
    p["out_proj"] = {"w": _init(kg(), (POST_UNITS[-1] * 2, TARG_VOCAB)),
                     "b": _init(kg(), (TARG_VOCAB,), 0.01)}
    return p


def bn_scale_shift(bn, eps=1e-5):
    scale = bn["gamma"] / jnp.sqrt(bn["var"] + eps)
    shift = bn["beta"] - bn["mean"] * scale
    return scale, shift


def prepare_fused(p):
    """Fold / reorder / pack every parameter into two kernel slabs.

    One bf16 matmul-weight slab and one f32 bias/scale slab (3 kernel inputs
    total instead of ~46).  Computed once at setup, not per forward call.
    """
    f32 = jnp.float32
    wslab = jnp.zeros((WROWS, WCOLS), f32)
    bslab = jnp.zeros((BROWS, WCOLS), f32)

    def put_w(name, mat):
        nonlocal wslab
        r0, nr, nc = _WL[name]
        assert mat.shape == (nr, nc), (name, mat.shape, (nr, nc))
        wslab = wslab.at[r0:r0 + nr, :nc].set(mat)

    def put_b(name, vec):
        nonlocal bslab
        r, nc = _BL[name]
        assert vec.shape == (nc,), (name, vec.shape, nc)
        bslab = bslab.at[r, :nc].set(vec)

    # embedding (vocab-padded for the one-hot matmul)
    put_w("emb", jnp.zeros((VOCAB_PAD, EMB_DIM), f32).at[:INP_VOCAB].set(p["embedding"]))

    # prenet
    put_w("pre0", p["prenet"][0]["w"]); put_b("pre0_b", p["prenet"][0]["b"])
    put_w("pre1", p["prenet"][1]["w"]); put_b("pre1_b", p["prenet"][1]["b"])

    # conv bank: kernels 1..K embedded into the shared 4-tap window, taps stacked on rows
    bank_w = jnp.zeros((len(BANK_OFFSETS) * D, K_FILTERS * D), f32)
    scales, shifts = [], []
    for bidx, bp in enumerate(p["bank"]):
        k = bidx + 1
        w = bp["w"]                                    # (cout, cin, k) PyTorch layout
        for i in range(k):
            tap = BANK_OFFSETS.index(i - k // 2)
            bank_w = bank_w.at[tap * D:(tap + 1) * D,
                               bidx * D:(bidx + 1) * D].set(jnp.transpose(w[:, :, i]))
        sc, sh = bn_scale_shift(bp["bn"])
        scales.append(sc); shifts.append(sh)
    put_w("bank", bank_w)
    put_b("bank_scale", jnp.concatenate(scales))
    put_b("bank_shift", jnp.concatenate(shifts))

    # conv projections (k=3): taps stacked along rows in (-1, 0, +1) order
    for name, pr in (("proj1", p["proj"][0]), ("proj2", p["proj"][1])):
        w = pr["w"]                                    # (cout, cin, 3)
        put_w(name, jnp.concatenate([jnp.transpose(w[:, :, i]) for i in range(3)], axis=0))
        sc, sh = bn_scale_shift(pr["bn"])
        put_b(name + "_scale", sc); put_b(name + "_shift", sh)

    # highway: [H | T] weights stacked along rows per layer -> one matmul per layer
    put_w("hw", jnp.concatenate(
        [jnp.concatenate([hw["wh"], hw["wt"]], axis=1) for hw in p["highway"]], axis=0))
    for i, hw in enumerate(p["highway"]):
        put_b("hw_b%d" % i, jnp.concatenate([hw["bh"], hw["bt"]]))

    # bidirectional GRU -> fused fwd/bwd lane layout [r_f r_b | z_f z_b | n_f n_b]
    Hg = GRU_UNITS
    wx = jnp.zeros((2 * D, 6 * Hg), f32)
    wh = jnp.zeros((2 * Hg, 6 * Hg), f32)
    bx = jnp.zeros((6 * Hg,), f32)
    bh = jnp.zeros((6 * Hg,), f32)
    for g in range(3):                                 # PyTorch gate order r, z, n
        for d_idx, gp in ((0, p["gru"]["fwd"]), (1, p["gru"]["bwd"])):
            cs = slice(g * 2 * Hg + d_idx * Hg, g * 2 * Hg + (d_idx + 1) * Hg)
            wx = wx.at[d_idx * D:(d_idx + 1) * D, cs].set(gp["w_ih"][g * Hg:(g + 1) * Hg].T)
            wh = wh.at[d_idx * Hg:(d_idx + 1) * Hg, cs].set(gp["w_hh"][g * Hg:(g + 1) * Hg].T)
            bx = bx.at[cs].set(gp["b_ih"][g * Hg:(g + 1) * Hg])
            bh = bh.at[cs].set(gp["b_hh"][g * Hg:(g + 1) * Hg])
    put_w("gru_x", wx); put_w("gru_h", wh)
    put_b("gru_xb", bx); put_b("gru_hb", bh)

    # post bi-LSTM stack -> fused layout [i_f i_b | f_f f_b | o_f o_b | g_f g_b];
    # b_ih + b_hh folded into the gate-precompute bias (all LSTM biases are additive).
    def lstm_combined(lf, lb, Din, Hl):
        wxl = jnp.zeros((2 * Din, 8 * Hl), f32)
        whl = jnp.zeros((2 * Hl, 8 * Hl), f32)
        bb = jnp.zeros((8 * Hl,), f32)
        for tp, sg_idx in enumerate((0, 1, 3, 2)):     # target [i,f,o,g] <- src [i,f,g,o]
            for d_idx, gp in ((0, lf), (1, lb)):
                cs = slice(tp * 2 * Hl + d_idx * Hl, tp * 2 * Hl + (d_idx + 1) * Hl)
                wxl = wxl.at[d_idx * Din:(d_idx + 1) * Din, cs].set(
                    gp["w_ih"][sg_idx * Hl:(sg_idx + 1) * Hl].T)
                whl = whl.at[d_idx * Hl:(d_idx + 1) * Hl, cs].set(
                    gp["w_hh"][sg_idx * Hl:(sg_idx + 1) * Hl].T)
                bb = bb.at[cs].set(gp["b_ih"][sg_idx * Hl:(sg_idx + 1) * Hl]
                                   + gp["b_hh"][sg_idx * Hl:(sg_idx + 1) * Hl])
        return wxl, whl, bb

    lstms = [e for e in p["post"] if e[0] == "lstm"]
    bns = [e for e in p["post"] if e[0] == "bn"]
    H1, H2 = POST_UNITS
    wx1, wh1, b1 = lstm_combined(lstms[0][1]["fwd"], lstms[0][1]["bwd"], 2 * GRU_UNITS, H1)
    wx2, wh2, b2 = lstm_combined(lstms[1][1]["fwd"], lstms[1][1]["bwd"], 2 * H1, H2)

    # fold BN1 (after LSTM1) into LSTM2's input weights, BN2 into the projection
    sc1, sh1 = bn_scale_shift(bns[0][1])               # (2*H1,) channels = [fwd | bwd]
    b2 = b2 + jnp.concatenate([sh1, sh1]) @ wx2        # uses the raw weights
    wx2 = wx2 * jnp.concatenate([sc1, sc1])[:, None]
    sc2, sh2 = bn_scale_shift(bns[1][1])               # (2*H2,)
    wout = jnp.zeros((2 * H2, OUT_PAD), f32).at[:, :TARG_VOCAB].set(p["out_proj"]["w"])
    bout = jnp.zeros((OUT_PAD,), f32).at[:TARG_VOCAB].set(p["out_proj"]["b"])
    bout = bout + sh2 @ wout
    wout = wout * sc2[:, None]

    put_w("l1_x", wx1); put_w("l1_h", wh1); put_b("l1_b", b1)
    put_w("l2_x", wx2); put_w("l2_h", wh2); put_b("l2_b", b2)
    put_w("out", wout); put_b("out_b", bout)

    return {"wslab": wslab.astype(jnp.bfloat16), "bslab": bslab}


# ----------------------------- forward ----------------------------------------
@jax.jit
def cbhg_model_forward(fused, src):
    # Only a (TBP,1) int32 id column is prepared in XLA; embedding gather and the
    # rest of the network are fused in the single Pallas kernel.
    ids = (jnp.zeros((T, PB), jnp.int32)
           .at[:, :B].set(jnp.transpose(src).astype(jnp.int32))
           .reshape(TBP, 1))
    out = pl.pallas_call(
        _cbhg_fused_kernel,
        out_shape=jax.ShapeDtypeStruct((TBP, OUT_PAD), jnp.float32),
        in_specs=[VMEM_SPEC, VMEM_SPEC, VMEM_SPEC],
        out_specs=VMEM_SPEC,
        scratch_shapes=[
            pltpu.VMEM((TBP, 2 * GRU_UNITS), jnp.float32),       # per-step RNN outputs
            pltpu.VMEM((TBP, 6 * GRU_UNITS), jnp.float32),       # GRU gate precompute
            pltpu.VMEM((TBP, 8 * POST_UNITS[0]), jnp.float32),   # LSTM gate precompute
        ],
        cost_estimate=pl.CostEstimate(
            flops=18_000_000, transcendentals=60_000, bytes_accessed=600_000),
    )(ids, fused["wslab"], fused["bslab"])

    preds = out.reshape(T, PB, OUT_PAD)[:, :B, :TARG_VOCAB]
    return {"diacritics": jnp.transpose(preds, (1, 0, 2))}       # (B, T, V)


if __name__ == "__main__":
    kg = KeyGen(0)
    params = build_params(kg)
    fused = prepare_fused(params)
    src = jax.random.randint(jax.random.PRNGKey(0), (B, T), 0, INP_VOCAB)
    out = cbhg_model_forward(fused, src)
    d = jax.block_until_ready(out["diacritics"])
    assert d.shape == (B, T, TARG_VOCAB)
    assert d.dtype == jnp.float32
    assert bool(jnp.all(jnp.isfinite(d)))
    print("KERNEL_OK")
</pallas_src>

<mosaic_0001>
module attributes {stable_mosaic.version = 11 : i64} {
  func.func @_cbhg_fused_kernel(%arg0: memref<64x1xi32, #tpu.memory_space<vmem>>, %arg1: memref<1008x256xbf16, #tpu.memory_space<vmem>>, %arg2: memref<17x256xf32, #tpu.memory_space<vmem>>, %arg3: memref<64x128xf32, #tpu.memory_space<vmem>>, %arg4: memref<64x64xf32, #tpu.memory_space<vmem>>, %arg5: memref<64x192xf32, #tpu.memory_space<vmem>>, %arg6: memref<64x256xf32, #tpu.memory_space<vmem>>) attributes {dimension_semantics = [], scalar_prefetch = 0 : i64, scratch_operands = 3 : i64, tpu.core_type = #tpu.core_type<tc>} {
    %c0 = arith.constant 0 : index
    %c0_0 = arith.constant 0 : index
    %0 = vector.load %arg0[%c0, %c0_0] : memref<64x1xi32, #tpu.memory_space<vmem>>, vector<64x1xi32>
    %1 = tpu.iota {dimensions = array<i32: 1>} : vector<64x32xi32>
    %2 = vector.broadcast %0 : vector<64x1xi32> to vector<64x32xi32>
    %3 = arith.cmpi eq, %1, %2 : vector<64x32xi32>
    %cst = arith.constant 1.000000e+00 : f32
    %cst_1 = arith.constant 0.000000e+00 : f32
    %4 = vector.broadcast %cst : f32 to vector<64x32xf32>
    %5 = vector.broadcast %cst_1 : f32 to vector<64x32xf32>
    %6 = arith.select %3, %4, %5 : vector<64x32xi1>, vector<64x32xf32>
    %7 = arith.truncf %6 : vector<64x32xf32> to vector<64x32xbf16>
    %c0_2 = arith.constant 0 : index
    %c0_3 = arith.constant 0 : index
    %8 = vector.load %arg1[%c0_2, %c0_3] : memref<1008x256xbf16, #tpu.memory_space<vmem>>, vector<32x32xbf16>
    %cst_4 = arith.constant dense<0.000000e+00> : vector<64x32xf32>
    %9 = tpu.matmul %7, %8, %cst_4 {dimension_numbers = #tpu.dot_dimension_numbers<[1], [0], [0], [1], [0, 0, 1, 1], [], []>} : vector<64x32xbf16>, vector<32x32xbf16>, vector<64x32xf32> -> vector<64x32xf32>
    %10 = arith.truncf %9 : vector<64x32xf32> to vector<64x32xbf16>
    %c32 = arith.constant 32 : index
    %c0_5 = arith.constant 0 : index
    %11 = vector.load %arg1[%c32, %c0_5] : memref<1008x256xbf16, #tpu.memory_space<vmem>>, vector<32x32xbf16>
    %cst_6 = arith.constant dense<0.000000e+00> : vector<64x32xf32>
    %12 = tpu.matmul %10, %11, %cst_6 {dimension_numbers = #tpu.dot_dimension_numbers<[1], [0], [0], [1], [0, 0, 1, 1], [], []>} : vector<64x32xbf16>, vector<32x32xbf16>, vector<64x32xf32> -> vector<64x32xf32>
    %c0_7 = arith.constant 0 : index
    %c0_8 = arith.constant 0 : index
    %13 = vector.load %arg2[%c0_7, %c0_8] : memref<17x256xf32, #tpu.memory_space<vmem>>, vector<1x32xf32>
    %14 = vector.broadcast %13 : vector<1x32xf32> to vector<64x32xf32>
    %15 = arith.addf %12, %14 : vector<64x32xf32>
    %cst_9 = arith.constant 0.000000e+00 : f32
    %16 = vector.broadcast %cst_9 : f32 to vector<64x32xf32>
    %17 = arith.maximumf %15, %16 : vector<64x32xf32>
    %18 = arith.truncf %17 : vector<64x32xf32> to vector<64x32xbf16>
    %c64 = arith.constant 64 : index
    %c0_10 = arith.constant 0 : index
    %19 = vector.load %arg1[%c64, %c0_10] : memref<1008x256xbf16, #tpu.memory_space<vmem>>, vector<32x16xbf16>
    %cst_11 = arith.constant dense<0.000000e+00> : vector<64x16xf32>
    %20 = tpu.matmul %18, %19, %cst_11 {dimension_numbers = #tpu.dot_dimension_numbers<[1], [0], [0], [1], [0, 0, 1, 1], [], []>} : vector<64x32xbf16>, vector<32x16xbf16>, vector<64x16xf32> -> vector<64x16xf32>
    %c1 = arith.constant 1 : index
    %c0_12 = arith.constant 0 : index
    %21 = vector.load %arg2[%c1, %c0_12] : memref<17x256xf32, #tpu.memory_space<vmem>>, vector<1x16xf32>
    %22 = vector.broadcast %21 : vector<1x16xf32> to vector<64x16xf32>
    %23 = arith.addf %20, %22 : vector<64x16xf32>
    %cst_13 = arith.constant 0.000000e+00 : f32
    %24 = vector.broadcast %cst_13 : f32 to vector<64x16xf32>
    %25 = arith.maximumf %23, %24 : vector<64x16xf32>
    %cst_14 = arith.constant 0.000000e+00 : f32
    %26 = vector.broadcast %cst_14 : f32 to vector<16x16xf32>
    %27 = vector.extract_strided_slice %25 {offsets = [0, 0], sizes = [48, 16], strides = [1, 1]} : vector<64x16xf32> to vector<48x16xf32>
    %28 = tpu.concatenate %26, %27 in 0 : vector<16x16xf32>, vector<48x16xf32> -> vector<64x16xf32>
    %cst_15 = arith.constant 0.000000e+00 : f32
    %29 = vector.broadcast %cst_15 : f32 to vector<8x16xf32>
    %30 = vector.extract_strided_slice %25 {offsets = [0, 0], sizes = [56, 16], strides = [1, 1]} : vector<64x16xf32> to vector<56x16xf32>
    %31 = tpu.concatenate %29, %30 in 0 : vector<8x16xf32>, vector<56x16xf32> -> vector<64x16xf32>
    %cst_16 = arith.constant 0.000000e+00 : f32
    %32 = vector.broadcast %cst_16 : f32 to vector<8x16xf32>
    %33 = vector.extract_strided_slice %25 {offsets = [8, 0], sizes = [56, 16], strides = [1, 1]} : vector<64x16xf32> to vector<56x16xf32>
    %34 = tpu.concatenate %33, %32 in 0 : vector<56x16xf32>, vector<8x16xf32> -> vector<64x16xf32>
    %35 = tpu.concatenate %28, %31, %25, %34 in 1 : vector<64x16xf32>, vector<64x16xf32>, vector<64x16xf32>, vector<64x16xf32> -> vector<64x64xf32>
    %36 = arith.truncf %35 : vector<64x64xf32> to vector<64x64xbf16>
    %c96 = arith.constant 96 : index
    %c0_17 = arith.constant 0 : index
    %37 = vector.load %arg1[%c96, %c0_17] : memref<1008x256xbf16, #tpu.memory_space<vmem>>, vector<64x64xbf16>
    %cst_18 = arith.constant dense<0.000000e+00> : vector<64x64xf32>
    %38 = tpu.matmul %36, %37, %cst_18 {dimension_numbers = #tpu.dot_dimension_numbers<[1], [0], [0], [1], [0, 0, 1, 1], [], []>} : vector<64x64xbf16>, vector<64x64xbf16>, vector<64x64xf32> -> vector<64x64xf32>
    %cst_19 = arith.constant 0.000000e+00 : f32
    %39 = vector.broadcast %cst_19 : f32 to vector<64x64xf32>
    %40 = arith.maximumf %38, %39 : vector<64x64xf32>
    %c2 = arith.constant 2 : index
    %c0_20 = arith.constant 0 : index
    %41 = vector.load %arg2[%c2, %c0_20] : memref<17x256xf32, #tpu.memory_space<vmem>>, vector<1x64xf32>
    %42 = vector.broadcast %41 : vector<1x64xf32> to vector<64x64xf32>
    %43 = arith.mulf %40, %42 : vector<64x64xf32>
    %c3 = arith.constant 3 : index
    %c0_21 = arith.constant 0 : index
    %44 = vector.load %arg2[%c3, %c0_21] : memref<17x256xf32, #tpu.memory_space<vmem>>, vector<1x64xf32>
    %45 = vector.broadcast %44 : vector<1x64xf32> to vector<64x64xf32>
    %46 = arith.addf %43, %45 : vector<64x64xf32>
    %cst_22 = arith.constant -1.000000e+30 : f32
    %47 = vector.broadcast %cst_22 : f32 to vector<8x64xf32>
    %48 = vector.extract_strided_slice %46 {offsets = [0, 0], sizes = [56, 64], strides = [1, 1]} : vector<64x64xf32> to vector<56x64xf32>
    %49 = tpu.concatenate %47, %48 in 0 : vector<8x64xf32>, vector<56x64xf32> -> vector<64x64xf32>
    %50 = arith.maximumf %46, %49 : vector<64x64xf32>
    %cst_23 = arith.constant 0.000000e+00 : f32
    %51 = vector.broadcast %cst_23 : f32 to vector<8x64xf32>
    %52 = vector.extract_strided_slice %50 {offsets = [0, 0], sizes = [56, 64], strides = [1, 1]} : vector<64x64xf32> to vector<56x64xf32>
    %53 = tpu.concatenate %51, %52 in 0 : vector<8x64xf32>, vector<56x64xf32> -> vector<64x64xf32>
    %cst_24 = arith.constant 0.000000e+00 : f32
    %54 = vector.broadcast %cst_24 : f32 to vector<8x64xf32>
    %55 = vector.extract_strided_slice %50 {offsets = [8, 0], sizes = [56, 64], strides = [1, 1]} : vector<64x64xf32> to vector<56x64xf32>
    %56 = tpu.concatenate %55, %54 in 0 : vector<56x64xf32>, vector<8x64xf32> -> vector<64x64xf32>
    %57 = tpu.concatenate %53, %50, %56 in 1 : vector<64x64xf32>, vector<64x64xf32>, vector<64x64xf32> -> vector<64x192xf32>
    %58 = arith.truncf %57 : vector<64x192xf32> to vector<64x192xbf16>
    %c160 = arith.constant 160 : index
    %c0_25 = arith.constant 0 : index
    %59 = vector.load %arg1[%c160, %c0_25] : memref<1008x256xbf16, #tpu.memory_space<vmem>>, vector<192x16xbf16>
    %cst_26 = arith.constant dense<0.000000e+00> : vector<64x16xf32>
    %60 = tpu.matmul %58, %59, %cst_26 {dimension_numbers = #tpu.dot_dimension_numbers<[1], [0], [0], [1], [0, 0, 1, 1], [], []>} : vector<64x192xbf16>, vector<192x16xbf16>, vector<64x16xf32> -> vector<64x16xf32>
    %cst_27 = arith.constant 0.000000e+00 : f32
    %61 = vector.broadcast %cst_27 : f32 to vector<64x16xf32>
    %62 = arith.maximumf %60, %61 : vector<64x16xf32>
    %c4 = arith.constant 4 : index
    %c0_28 = arith.constant 0 : index
    %63 = vector.load %arg2[%c4, %c0_28] : memref<17x256xf32, #tpu.memory_space<vmem>>, vector<1x16xf32>
    %64 = vector.broadcast %63 : vector<1x16xf32> to vector<64x16xf32>
    %65 = arith.mulf %62, %64 : vector<64x16xf32>
    %c5 = arith.constant 5 : index
    %c0_29 = arith.constant 0 : index
    %66 = vector.load %arg2[%c5, %c0_29] : memref<17x256xf32, #tpu.memory_space<vmem>>, vector<1x16xf32>
    %67 = vector.broadcast %66 : vector<1x16xf32> to vector<64x16xf32>
    %68 = arith.addf %65, %67 : vector<64x16xf32>
    %cst_30 = arith.constant 0.000000e+00 : f32
    %69 = vector.broadcast %cst_30 : f32 to vector<8x16xf32>
    %70 = vector.extract_strided_slice %68 {offsets = [0, 0], sizes = [56, 16], strides = [1, 1]} : vector<64x16xf32> to vector<56x16xf32>
    %71 = tpu.concatenate %69, %70 in 0 : vector<8x16xf32>, vector<56x16xf32> -> vector<64x16xf32>
    %cst_31 = arith.constant 0.000000e+00 : f32
    %72 = vector.broadcast %cst_31 : f32 to vector<8x16xf32>
    %73 = vector.extract_strided_slice %68 {offsets = [8, 0], sizes = [56, 16], strides = [1, 1]} : vector<64x16xf32> to vector<56x16xf32>
    %74 = tpu.concatenate %73, %72 in 0 : vector<56x16xf32>, vector<8x16xf32> -> vector<64x16xf32>
    %75 = tpu.concatenate %71, %68, %74 in 1 : vector<64x16xf32>, vector<64x16xf32>, vector<64x16xf32> -> vector<64x48xf32>
    %76 = arith.truncf %75 : vector<64x48xf32> to vector<64x48xbf16>
    %c352 = arith.constant 352 : index
    %c0_32 = arith.constant 0 : index
    %77 = vector.load %arg1[%c352, %c0_32] : memref<1008x256xbf16, #tpu.memory_space<vmem>>, vector<48x16xbf16>
    %cst_33 = arith.constant dense<0.000000e+00> : vector<64x16xf32>
    %78 = tpu.matmul %76, %77, %cst_33 {dimension_numbers = #tpu.dot_dimension_numbers<[1], [0], [0], [1], [0, 0, 1, 1], [], []>} : vector<64x48xbf16>, vector<48x16xbf16>, vector<64x16xf32> -> vector<64x16xf32>
    %c6 = arith.constant 6 : index
    %c0_34 = arith.constant 0 : index
    %79 = vector.load %arg2[%c6, %c0_34] : memref<17x256xf32, #tpu.memory_space<vmem>>, vector<1x16xf32>
    %80 = vector.broadcast %79 : vector<1x16xf32> to vector<64x16xf32>
    %81 = arith.mulf %78, %80 : vector<64x16xf32>
    %c7 = arith.constant 7 : index
    %c0_35 = arith.constant 0 : index
    %82 = vector.load %arg2[%c7, %c0_35] : memref<17x256xf32, #tpu.memory_space<vmem>>, vector<1x16xf32>
    %83 = vector.broadcast %82 : vector<1x16xf32> to vector<64x16xf32>
    %84 = arith.addf %81, %83 : vector<64x16xf32>
    %85 = arith.addf %84, %25 : vector<64x16xf32>
    %c400 = arith.constant 400 : index
    %c0_36 = arith.constant 0 : index
    %86 = vector.load %arg1[%c400, %c0_36] : memref<1008x256xbf16, #tpu.memory_space<vmem>>, vector<64x32xbf16>
    %87 = arith.truncf %85 : vector<64x16xf32> to vector<64x16xbf16>
    %88 = vector.extract_strided_slice %86 {offsets = [0, 0], sizes = [16, 32], strides = [1, 1]} : vector<64x32xbf16> to vector<16x32xbf16>
    %cst_37 = arith.constant dense<0.000000e+00> : vector<64x32xf32>
    %89 = tpu.matmul %87, %88, %cst_37 {dimension_numbers = #tpu.dot_dimension_numbers<[1], [0], [0], [1], [0, 0, 1, 1], [], []>} : vector<64x16xbf16>, vector<16x32xbf16>, vector<64x32xf32> -> vector<64x32xf32>
    %c8 = arith.constant 8 : index
    %c0_38 = arith.constant 0 : index
    %90 = vector.load %arg2[%c8, %c0_38] : memref<17x256xf32, #tpu.memory_space<vmem>>, vector<1x32xf32>
    %91 = vector.broadcast %90 : vector<1x32xf32> to vector<64x32xf32>
    %92 = arith.addf %89, %91 : vector<64x32xf32>
    %93 = vector.extract_strided_slice %92 {offsets = [0, 0], sizes = [64, 16], strides = [1, 1]} : vector<64x32xf32> to vector<64x16xf32>
    %cst_39 = arith.constant 0.000000e+00 : f32
    %94 = vector.broadcast %cst_39 : f32 to vector<64x16xf32>
    %95 = arith.maximumf %93, %94 : vector<64x16xf32>
    %96 = vector.extract_strided_slice %92 {offsets = [0, 16], sizes = [64, 16], strides = [1, 1]} : vector<64x32xf32> to vector<64x16xf32>
    %cst_40 = arith.constant 5.000000e-01 : f32
    %97 = vector.broadcast %cst_40 : f32 to vector<64x16xf32>
    %98 = arith.mulf %97, %96 : vector<64x16xf32>
    %99 = math.tanh %98 : vector<64x16xf32>
    %cst_41 = arith.constant 5.000000e-01 : f32
    %100 = vector.broadcast %cst_41 : f32 to vector<64x16xf32>
    %101 = arith.mulf %100, %99 : vector<64x16xf32>
    %cst_42 = arith.constant 5.000000e-01 : f32
    %102 = vector.broadcast %cst_42 : f32 to vector<64x16xf32>
    %103 = arith.addf %101, %102 : vector<64x16xf32>
    %104 = arith.mulf %95, %103 : vector<64x16xf32>
    %cst_43 = arith.constant 1.000000e+00 : f32
    %105 = vector.broadcast %cst_43 : f32 to vector<64x16xf32>
    %106 = arith.subf %105, %103 : vector<64x16xf32>
    %107 = arith.mulf %85, %106 : vector<64x16xf32>
    %108 = arith.addf %104, %107 : vector<64x16xf32>
    %109 = arith.truncf %108 : vector<64x16xf32> to vector<64x16xbf16>
    %110 = vector.extract_strided_slice %86 {offsets = [16, 0], sizes = [16, 32], strides = [1, 1]} : vector<64x32xbf16> to vector<16x32xbf16>
    %cst_44 = arith.constant dense<0.000000e+00> : vector<64x32xf32>
    %111 = tpu.matmul %109, %110, %cst_44 {dimension_numbers = #tpu.dot_dimension_numbers<[1], [0], [0], [1], [0, 0, 1, 1], [], []>} : vector<64x16xbf16>, vector<16x32xbf16>, vector<64x32xf32> -> vector<64x32xf32>
    %c9 = arith.constant 9 : index
    %c0_45 = arith.constant 0 : index
    %112 = vector.load %arg2[%c9, %c0_45] : memref<17x256xf32, #tpu.memory_space<vmem>>, vector<1x32xf32>
    %113 = vector.broadcast %112 : vector<1x32xf32> to vector<64x32xf32>
    %114 = arith.addf %111, %113 : vector<64x32xf32>
    %115 = vector.extract_strided_slice %114 {offsets = [0, 0], sizes = [64, 16], strides = [1, 1]} : vector<64x32xf32> to vector<64x16xf32>
    %cst_46 = arith.constant 0.000000e+00 : f32
    %116 = vector.broadcast %cst_46 : f32 to vector<64x16xf32>
    %117 = arith.maximumf %115, %116 : vector<64x16xf32>
    %118 = vector.extract_strided_slice %114 {offsets = [0, 16], sizes = [64, 16], strides = [1, 1]} : vector<64x32xf32> to vector<64x16xf32>
    %cst_47 = arith.constant 5.000000e-01 : f32
    %119 = vector.broadcast %cst_47 : f32 to vector<64x16xf32>
    %120 = arith.mulf %119, %118 : vector<64x16xf32>
    %121 = math.tanh %120 : vector<64x16xf32>
    %cst_48 = arith.constant 5.000000e-01 : f32
    %122 = vector.broadcast %cst_48 : f32 to vector<64x16xf32>
    %123 = arith.mulf %122, %121 : vector<64x16xf32>
    %cst_49 = arith.constant 5.000000e-01 : f32
    %124 = vector.broadcast %cst_49 : f32 to vector<64x16xf32>
    %125 = arith.addf %123, %124 : vector<64x16xf32>
    %126 = arith.mulf %117, %125 : vector<64x16xf32>
    %cst_50 = arith.constant 1.000000e+00 : f32
    %127 = vector.broadcast %cst_50 : f32 to vector<64x16xf32>
    %128 = arith.subf %127, %125 : vector<64x16xf32>
    %129 = arith.mulf %108, %128 : vector<64x16xf32>
    %130 = arith.addf %126, %129 : vector<64x16xf32>
    %131 = arith.truncf %130 : vector<64x16xf32> to vector<64x16xbf16>
    %132 = vector.extract_strided_slice %86 {offsets = [32, 0], sizes = [16, 32], strides = [1, 1]} : vector<64x32xbf16> to vector<16x32xbf16>
    %cst_51 = arith.constant dense<0.000000e+00> : vector<64x32xf32>
    %133 = tpu.matmul %131, %132, %cst_51 {dimension_numbers = #tpu.dot_dimension_numbers<[1], [0], [0], [1], [0, 0, 1, 1], [], []>} : vector<64x16xbf16>, vector<16x32xbf16>, vector<64x32xf32> -> vector<64x32xf32>
    %c10 = arith.constant 10 : index
    %c0_52 = arith.constant 0 : index
    %134 = vector.load %arg2[%c10, %c0_52] : memref<17x256xf32, #tpu.memory_space<vmem>>, vector<1x32xf32>
    %135 = vector.broadcast %134 : vector<1x32xf32> to vector<64x32xf32>
    %136 = arith.addf %133, %135 : vector<64x32xf32>
    %137 = vector.extract_strided_slice %136 {offsets = [0, 0], sizes = [64, 16], strides = [1, 1]} : vector<64x32xf32> to vector<64x16xf32>
    %cst_53 = arith.constant 0.000000e+00 : f32
    %138 = vector.broadcast %cst_53 : f32 to vector<64x16xf32>
    %139 = arith.maximumf %137, %138 : vector<64x16xf32>
    %140 = vector.extract_strided_slice %136 {offsets = [0, 16], sizes = [64, 16], strides = [1, 1]} : vector<64x32xf32> to vector<64x16xf32>
    %cst_54 = arith.constant 5.000000e-01 : f32
    %141 = vector.broadcast %cst_54 : f32 to vector<64x16xf32>
    %142 = arith.mulf %141, %140 : vector<64x16xf32>
    %143 = math.tanh %142 : vector<64x16xf32>
    %cst_55 = arith.constant 5.000000e-01 : f32
    %144 = vector.broadcast %cst_55 : f32 to vector<64x16xf32>
    %145 = arith.mulf %144, %143 : vector<64x16xf32>
    %cst_56 = arith.constant 5.000000e-01 : f32
    %146 = vector.broadcast %cst_56 : f32 to vector<64x16xf32>
    %147 = arith.addf %145, %146 : vector<64x16xf32>
    %148 = arith.mulf %139, %147 : vector<64x16xf32>
    %cst_57 = arith.constant 1.000000e+00 : f32
    %149 = vector.broadcast %cst_57 : f32 to vector<64x16xf32>
    %150 = arith.subf %149, %147 : vector<64x16xf32>
    %151 = arith.mulf %130, %150 : vector<64x16xf32>
    %152 = arith.addf %148, %151 : vector<64x16xf32>
    %153 = arith.truncf %152 : vector<64x16xf32> to vector<64x16xbf16>
    %154 = vector.extract_strided_slice %86 {offsets = [48, 0], sizes = [16, 32], strides = [1, 1]} : vector<64x32xbf16> to vector<16x32xbf16>
    %cst_58 = arith.constant dense<0.000000e+00> : vector<64x32xf32>
    %155 = tpu.matmul %153, %154, %cst_58 {dimension_numbers = #tpu.dot_dimension_numbers<[1], [0], [0], [1], [0, 0, 1, 1], [], []>} : vector<64x16xbf16>, vector<16x32xbf16>, vector<64x32xf32> -> vector<64x32xf32>
    %c11 = arith.constant 11 : index
    %c0_59 = arith.constant 0 : index
    %156 = vector.load %arg2[%c11, %c0_59] : memref<17x256xf32, #tpu.memory_space<vmem>>, vector<1x32xf32>
    %157 = vector.broadcast %156 : vector<1x32xf32> to vector<64x32xf32>
    %158 = arith.addf %155, %157 : vector<64x32xf32>
    %159 = vector.extract_strided_slice %158 {offsets = [0, 0], sizes = [64, 16], strides = [1, 1]} : vector<64x32xf32> to vector<64x16xf32>
    %cst_60 = arith.constant 0.000000e+00 : f32
    %160 = vector.broadcast %cst_60 : f32 to vector<64x16xf32>
    %161 = arith.maximumf %159, %160 : vector<64x16xf32>
    %162 = vector.extract_strided_slice %158 {offsets = [0, 16], sizes = [64, 16], strides = [1, 1]} : vector<64x32xf32> to vector<64x16xf32>
    %cst_61 = arith.constant 5.000000e-01 : f32
    %163 = vector.broadcast %cst_61 : f32 to vector<64x16xf32>
    %164 = arith.mulf %163, %162 : vector<64x16xf32>
    %165 = math.tanh %164 : vector<64x16xf32>
    %cst_62 = arith.constant 5.000000e-01 : f32
    %166 = vector.broadcast %cst_62 : f32 to vector<64x16xf32>
    %167 = arith.mulf %166, %165 : vector<64x16xf32>
    %cst_63 = arith.constant 5.000000e-01 : f32
    %168 = vector.broadcast %cst_63 : f32 to vector<64x16xf32>
    %169 = arith.addf %167, %168 : vector<64x16xf32>
    %170 = arith.mulf %161, %169 : vector<64x16xf32>
    %cst_64 = arith.constant 1.000000e+00 : f32
    %171 = vector.broadcast %cst_64 : f32 to vector<64x16xf32>
    %172 = arith.subf %171, %169 : vector<64x16xf32>
    %173 = arith.mulf %152, %172 : vector<64x16xf32>
    %174 = arith.addf %170, %173 : vector<64x16xf32>
    %175 = vector.extract_strided_slice %174 {offsets = [56, 0], sizes = [8, 16], strides = [1, 1]} : vector<64x16xf32> to vector<8x16xf32>
    %176 = vector.extract_strided_slice %174 {offsets = [48, 0], sizes = [8, 16], strides = [1, 1]} : vector<64x16xf32> to vector<8x16xf32>
    %177 = vector.extract_strided_slice %174 {offsets = [40, 0], sizes = [8, 16], strides = [1, 1]} : vector<64x16xf32> to vector<8x16xf32>
    %178 = vector.extract_strided_slice %174 {offsets = [32, 0], sizes = [8, 16], strides = [1, 1]} : vector<64x16xf32> to vector<8x16xf32>
    %179 = vector.extract_strided_slice %174 {offsets = [24, 0], sizes = [8, 16], strides = [1, 1]} : vector<64x16xf32> to vector<8x16xf32>
    %180 = vector.extract_strided_slice %174 {offsets = [16, 0], sizes = [8, 16], strides = [1, 1]} : vector<64x16xf32> to vector<8x16xf32>
    %181 = vector.extract_strided_slice %174 {offsets = [8, 0], sizes = [8, 16], strides = [1, 1]} : vector<64x16xf32> to vector<8x16xf32>
    %182 = vector.extract_strided_slice %174 {offsets = [0, 0], sizes = [8, 16], strides = [1, 1]} : vector<64x16xf32> to vector<8x16xf32>
    %183 = tpu.concatenate %175, %176, %177, %178, %179, %180, %181, %182 in 0 : vector<8x16xf32>, vector<8x16xf32>, vector<8x16xf32>, vector<8x16xf32>, vector<8x16xf32>, vector<8x16xf32>, vector<8x16xf32>, vector<8x16xf32> -> vector<64x16xf32>
    %184 = tpu.concatenate %174, %183 in 1 : vector<64x16xf32>, vector<64x16xf32> -> vector<64x32xf32>
    %185 = arith.truncf %184 : vector<64x32xf32> to vector<64x32xbf16>
    %c464 = arith.constant 464 : index
    %c0_65 = arith.constant 0 : index
    %186 = vector.load %arg1[%c464, %c0_65] : memref<1008x256xbf16, #tpu.memory_space<vmem>>, vector<32x192xbf16>
    %cst_66 = arith.constant dense<0.000000e+00> : vector<64x192xf32>
    %187 = tpu.matmul %185, %186, %cst_66 {dimension_numbers = #tpu.dot_dimension_numbers<[1], [0], [0], [1], [0, 0, 1, 1], [], []>} : vector<64x32xbf16>, vector<32x192xbf16>, vector<64x192xf32> -> vector<64x192xf32>
    %c12 = arith.constant 12 : index
    %c0_67 = arith.constant 0 : index
    %188 = vector.load %arg2[%c12, %c0_67] : memref<17x256xf32, #tpu.memory_space<vmem>>, vector<1x192xf32>
    %189 = vector.broadcast %188 : vector<1x192xf32> to vector<64x192xf32>
    %190 = arith.addf %187, %189 : vector<64x192xf32>
    %c0_68 = arith.constant 0 : index
    %c0_69 = arith.constant 0 : index
    %191 = vector.load %arg5[%c0_68, %c0_69] : memref<64x192xf32, #tpu.memory_space<vmem>>, vector<64x192xf32>
    tpu.vector_store %arg5[%c0_68, %c0_69], %190 {strides = array<i32>} : memref<64x192xf32, #tpu.memory_space<vmem>>, vector<64x192xf32>,
    %c496 = arith.constant 496 : index
    %c0_70 = arith.constant 0 : index
    %192 = vector.load %arg1[%c496, %c0_70] : memref<1008x256xbf16, #tpu.memory_space<vmem>>, vector<64x192xbf16>
    %c13 = arith.constant 13 : index
    %c0_71 = arith.constant 0 : index
    %193 = vector.load %arg2[%c13, %c0_71] : memref<17x256xf32, #tpu.memory_space<vmem>>, vector<1x192xf32>
    %cst_72 = arith.constant 0.000000e+00 : f32
    %194 = vector.broadcast %cst_72 : f32 to vector<8x64xf32>
    %c0_73 = arith.constant 0 : index
    %c0_74 = arith.constant 0 : index
    %195 = vector.load %arg5[%c0_73, %c0_74] : memref<64x192xf32, #tpu.memory_space<vmem>>, vector<8x192xf32>
    %196 = arith.truncf %194 : vector<8x64xf32> to vector<8x64xbf16>
    %cst_75 = arith.constant dense<0.000000e+00> : vector<8x192xf32>
    %197 = tpu.matmul %196, %192, %cst_75 {dimension_numbers = #tpu.dot_dimension_numbers<[1], [0], [0], [1], [0, 0, 1, 1], [], []>} : vector<8x64xbf16>, vector<64x192xbf16>, vector<8x192xf32> -> vector<8x192xf32>
    %198 = vector.broadcast %193 : vector<1x192xf32> to vector<8x192xf32>
    %199 = arith.addf %197, %198 : vector<8x192xf32>
    %200 = vector.extract_strided_slice %195 {offsets = [0, 0], sizes = [8, 128], strides = [1, 1]} : vector<8x192xf32> to vector<8x128xf32>
    %201 = vector.extract_strided_slice %199 {offsets = [0, 0], sizes = [8, 128], strides = [1, 1]} : vector<8x192xf32> to vector<8x128xf32>
    %202 = arith.addf %200, %201 : vector<8x128xf32>
    %cst_76 = arith.constant 5.000000e-01 : f32
    %203 = vector.broadcast %cst_76 : f32 to vector<8x128xf32>
    %204 = arith.mulf %203, %202 : vector<8x128xf32>
    %205 = math.tanh %204 : vector<8x128xf32>
    %cst_77 = arith.constant 5.000000e-01 : f32
    %206 = vector.broadcast %cst_77 : f32 to vector<8x128xf32>
    %207 = arith.mulf %206, %205 : vector<8x128xf32>
    %cst_78 = arith.constant 5.000000e-01 : f32
    %208 = vector.broadcast %cst_78 : f32 to vector<8x128xf32>
    %209 = arith.addf %207, %208 : vector<8x128xf32>
    %210 = vector.extract_strided_slice %209 {offsets = [0, 0], sizes = [8, 64], strides = [1, 1]} : vector<8x128xf32> to vector<8x64xf32>
    %211 = vector.extract_strided_slice %209 {offsets = [0, 64], sizes = [8, 64], strides = [1, 1]} : vector<8x128xf32> to vector<8x64xf32>
    %212 = vector.extract_strided_slice %195 {offsets = [0, 128], sizes = [8, 64], strides = [1, 1]} : vector<8x192xf32> to vector<8x64xf32>
    %213 = vector.extract_strided_slice %199 {offsets = [0, 128], sizes = [8, 64], strides = [1, 1]} : vector<8x192xf32> to vector<8x64xf32>
    %214 = arith.mulf %210, %213 : vector<8x64xf32>
    %215 = arith.addf %212, %214 : vector<8x64xf32>
    %216 = math.tanh %215 : vector<8x64xf32>
    %cst_79 = arith.constant 1.000000e+00 : f32
    %217 = vector.broadcast %cst_79 : f32 to vector<8x64xf32>
    %218 = arith.subf %217, %211 : vector<8x64xf32>
    %219 = arith.mulf %218, %216 : vector<8x64xf32>
    %220 = arith.mulf %211, %194 : vector<8x64xf32>
    %221 = arith.addf %219, %220 : vector<8x64xf32>
    %222 = vector.extract_strided_slice %221 {offsets = [0, 0], sizes = [8, 32], strides = [1, 1]} : vector<8x64xf32> to vector<8x32xf32>
    %c0_80 = arith.constant 0 : index
    %c0_81 = arith.constant 0 : index
    %223 = vector.load %arg4[%c0_80, %c0_81] : memref<64x64xf32, #tpu.memory_space<vmem>>, vector<8x32xf32>
    tpu.vector_store %arg4[%c0_80, %c0_81], %222 {strides = array<i32>} : memref<64x64xf32, #tpu.memory_space<vmem>>, vector<8x32xf32>,
    %224 = vector.extract_strided_slice %221 {offsets = [0, 32], sizes = [8, 32], strides = [1, 1]} : vector<8x64xf32> to vector<8x32xf32>
    %c56 = arith.constant 56 : index
    %c32_82 = arith.constant 32 : index
    %225 = vector.load %arg4[%c56, %c32_82] : memref<64x64xf32, #tpu.memory_space<vmem>>, vector<8x32xf32>
    tpu.vector_store %arg4[%c56, %c32_82], %224 {strides = array<i32>} : memref<64x64xf32, #tpu.memory_space<vmem>>, vector<8x32xf32>,
    %c8_83 = arith.constant 8 : index
    %c0_84 = arith.constant 0 : index
    %226 = vector.load %arg5[%c8_83, %c0_84] : memref<64x192xf32, #tpu.memory_space<vmem>>, vector<8x192xf32>
    %227 = arith.truncf %221 : vector<8x64xf32> to vector<8x64xbf16>
    %cst_85 = arith.constant dense<0.000000e+00> : vector<8x192xf32>
    %228 = tpu.matmul %227, %192, %cst_85 {dimension_numbers = #tpu.dot_dimension_numbers<[1], [0], [0], [1], [0, 0, 1, 1], [], []>} : vector<8x64xbf16>, vector<64x192xbf16>, vector<8x192xf32> -> vector<8x192xf32>
    %229 = vector.broadcast %193 : vector<1x192xf32> to vector<8x192xf32>
    %230 = arith.addf %228, %229 : vector<8x192xf32>
    %231 = vector.extract_strided_slice %226 {offsets = [0, 0], sizes = [8, 128], strides = [1, 1]} : vector<8x192xf32> to vector<8x128xf32>
    %232 = vector.extract_strided_slice %230 {offsets = [0, 0], sizes = [8, 128], strides = [1, 1]} : vector<8x192xf32> to vector<8x128xf32>
    %233 = arith.addf %231, %232 : vector<8x128xf32>
    %cst_86 = arith.constant 5.000000e-01 : f32
    %234 = vector.broadcast %cst_86 : f32 to vector<8x128xf32>
    %235 = arith.mulf %234, %233 : vector<8x128xf32>
    %236 = math.tanh %235 : vector<8x128xf32>
    %cst_87 = arith.constant 5.000000e-01 : f32
    %237 = vector.broadcast %cst_87 : f32 to vector<8x128xf32>
    %238 = arith.mulf %237, %236 : vector<8x128xf32>
    %cst_88 = arith.constant 5.000000e-01 : f32
    %239 = vector.broadcast %cst_88 : f32 to vector<8x128xf32>
    %240 = arith.addf %238, %239 : vector<8x128xf32>
    %241 = vector.extract_strided_slice %240 {offsets = [0, 0], sizes = [8, 64], strides = [1, 1]} : vector<8x128xf32> to vector<8x64xf32>
    %242 = vector.extract_strided_slice %240 {offsets = [0, 64], sizes = [8, 64], strides = [1, 1]} : vector<8x128xf32> to vector<8x64xf32>
    %243 = vector.extract_strided_slice %226 {offsets = [0, 128], sizes = [8, 64], strides = [1, 1]} : vector<8x192xf32> to vector<8x64xf32>
    %244 = vector.extract_strided_slice %230 {offsets = [0, 128], sizes = [8, 64], strides = [1, 1]} : vector<8x192xf32> to vector<8x64xf32>
    %245 = arith.mulf %241, %244 : vector<8x64xf32>
    %246 = arith.addf %243, %245 : vector<8x64xf32>
    %247 = math.tanh %246 : vector<8x64xf32>
    %cst_89 = arith.constant 1.000000e+00 : f32
    %248 = vector.broadcast %cst_89 : f32 to vector<8x64xf32>
    %249 = arith.subf %248, %242 : vector<8x64xf32>
    %250 = arith.mulf %249, %247 : vector<8x64xf32>
    %251 = arith.mulf %242, %221 : vector<8x64xf32>
    %252 = arith.addf %250, %251 : vector<8x64xf32>
    %253 = vector.extract_strided_slice %252 {offsets = [0, 0], sizes = [8, 32], strides = [1, 1]} : vector<8x64xf32> to vector<8x32xf32>
    %c8_90 = arith.constant 8 : index
    %c0_91 = arith.constant 0 : index
    %254 = vector.load %arg4[%c8_90, %c0_91] : memref<64x64xf32, #tpu.memory_space<vmem>>, vector<8x32xf32>
    tpu.vector_store %arg4[%c8_90, %c0_91], %253 {strides = array<i32>} : memref<64x64xf32, #tpu.memory_space<vmem>>, vector<8x32xf32>,
    %255 = vector.extract_strided_slice %252 {offsets = [0, 32], sizes = [8, 32], strides = [1, 1]} : vector<8x64xf32> to vector<8x32xf32>
    %c48 = arith.constant 48 : index
    %c32_92 = arith.constant 32 : index
    %256 = vector.load %arg4[%c48, %c32_92] : memref<64x64xf32, #tpu.memory_space<vmem>>, vector<8x32xf32>
    tpu.vector_store %arg4[%c48, %c32_92], %255 {strides = array<i32>} : memref<64x64xf32, #tpu.memory_space<vmem>>, vector<8x32xf32>,
    %c16 = arith.constant 16 : index
    %c0_93 = arith.constant 0 : index
    %257 = vector.load %arg5[%c16, %c0_93] : memref<64x192xf32, #tpu.memory_space<vmem>>, vector<8x192xf32>
    %258 = arith.truncf %252 : vector<8x64xf32> to vector<8x64xbf16>
    %cst_94 = arith.constant dense<0.000000e+00> : vector<8x192xf32>
    %259 = tpu.matmul %258, %192, %cst_94 {dimension_numbers = #tpu.dot_dimension_numbers<[1], [0], [0], [1], [0, 0, 1, 1], [], []>} : vector<8x64xbf16>, vector<64x192xbf16>, vector<8x192xf32> -> vector<8x192xf32>
    %260 = vector.broadcast %193 : vector<1x192xf32> to vector<8x192xf32>
    %261 = arith.addf %259, %260 : vector<8x192xf32>
    %262 = vector.extract_strided_slice %257 {offsets = [0, 0], sizes = [8, 128], strides = [1, 1]} : vector<8x192xf32> to vector<8x128xf32>
    %263 = vector.extract_strided_slice %261 {offsets = [0, 0], sizes = [8, 128], strides = [1, 1]} : vector<8x192xf32> to vector<8x128xf32>
    %264 = arith.addf %262, %263 : vector<8x128xf32>
    %cst_95 = arith.constant 5.000000e-01 : f32
    %265 = vector.broadcast %cst_95 : f32 to vector<8x128xf32>
    %266 = arith.mulf %265, %264 : vector<8x128xf32>
    %267 = math.tanh %266 : vector<8x128xf32>
    %cst_96 = arith.constant 5.000000e-01 : f32
    %268 = vector.broadcast %cst_96 : f32 to vector<8x128xf32>
    %269 = arith.mulf %268, %267 : vector<8x128xf32>
    %cst_97 = arith.constant 5.000000e-01 : f32
    %270 = vector.broadcast %cst_97 : f32 to vector<8x128xf32>
    %271 = arith.addf %269, %270 : vector<8x128xf32>
    %272 = vector.extract_strided_slice %271 {offsets = [0, 0], sizes = [8, 64], strides = [1, 1]} : vector<8x128xf32> to vector<8x64xf32>
    %273 = vector.extract_strided_slice %271 {offsets = [0, 64], sizes = [8, 64], strides = [1, 1]} : vector<8x128xf32> to vector<8x64xf32>
    %274 = vector.extract_strided_slice %257 {offsets = [0, 128], sizes = [8, 64], strides = [1, 1]} : vector<8x192xf32> to vector<8x64xf32>
    %275 = vector.extract_strided_slice %261 {offsets = [0, 128], sizes = [8, 64], strides = [1, 1]} : vector<8x192xf32> to vector<8x64xf32>
    %276 = arith.mulf %272, %275 : vector<8x64xf32>
    %277 = arith.addf %274, %276 : vector<8x64xf32>
    %278 = math.tanh %277 : vector<8x64xf32>
    %cst_98 = arith.constant 1.000000e+00 : f32
    %279 = vector.broadcast %cst_98 : f32 to vector<8x64xf32>
    %280 = arith.subf %279, %273 : vector<8x64xf32>
    %281 = arith.mulf %280, %278 : vector<8x64xf32>
    %282 = arith.mulf %273, %252 : vector<8x64xf32>
    %283 = arith.addf %281, %282 : vector<8x64xf32>
    %284 = vector.extract_strided_slice %283 {offsets = [0, 0], sizes = [8, 32], strides = [1, 1]} : vector<8x64xf32> to vector<8x32xf32>
    %c16_99 = arith.constant 16 : index
    %c0_100 = arith.constant 0 : index
    %285 = vector.load %arg4[%c16_99, %c0_100] : memref<64x64xf32, #tpu.memory_space<vmem>>, vector<8x32xf32>
    tpu.vector_store %arg4[%c16_99, %c0_100], %284 {strides = array<i32>} : memref<64x64xf32, #tpu.memory_space<vmem>>, vector<8x32xf32>,
    %286 = vector.extract_strided_slice %283 {offsets = [0, 32], sizes = [8, 32], strides = [1, 1]} : vector<8x64xf32> to vector<8x32xf32>
    %c40 = arith.constant 40 : index
    %c32_101 = arith.constant 32 : index
    %287 = vector.load %arg4[%c40, %c32_101] : memref<64x64xf32, #tpu.memory_space<vmem>>, vector<8x32xf32>
    tpu.vector_store %arg4[%c40, %c32_101], %286 {strides = array<i32>} : memref<64x64xf32, #tpu.memory_space<vmem>>, vector<8x32xf32>,
    %c24 = arith.constant 24 : index
    %c0_102 = arith.constant 0 : index
    %288 = vector.load %arg5[%c24, %c0_102] : memref<64x192xf32, #tpu.memory_space<vmem>>, vector<8x192xf32>
    %289 = arith.truncf %283 : vector<8x64xf32> to vector<8x64xbf16>
    %cst_103 = arith.constant dense<0.000000e+00> : vector<8x192xf32>
    %290 = tpu.matmul %289, %192, %cst_103 {dimension_numbers = #tpu.dot_dimension_numbers<[1], [0], [0], [1], [0, 0, 1, 1], [], []>} : vector<8x64xbf16>, vector<64x192xbf16>, vector<8x192xf32> -> vector<8x192xf32>
    %291 = vector.broadcast %193 : vector<1x192xf32> to vector<8x192xf32>
    %292 = arith.addf %290, %291 : vector<8x192xf32>
    %293 = vector.extract_strided_slice %288 {offsets = [0, 0], sizes = [8, 128], strides = [1, 1]} : vector<8x192xf32> to vector<8x128xf32>
    %294 = vector.extract_strided_slice %292 {offsets = [0, 0], sizes = [8, 128], strides = [1, 1]} : vector<8x192xf32> to vector<8x128xf32>
    %295 = arith.addf %293, %294 : vector<8x128xf32>
    %cst_104 = arith.constant 5.000000e-01 : f32
    %296 = vector.broadcast %cst_104 : f32 to vector<8x128xf32>
    %297 = arith.mulf %296, %295 : vector<8x128xf32>
    %298 = math.tanh %297 : vector<8x128xf32>
    %cst_105 = arith.constant 5.000000e-01 : f32
    %299 = vector.broadcast %cst_105 : f32 to vector<8x128xf32>
    %300 = arith.mulf %299, %298 : vector<8x128xf32>
    %cst_106 = arith.constant 5.000000e-01 : f32
    %301 = vector.broadcast %cst_106 : f32 to vector<8x128xf32>
    %302 = arith.addf %300, %301 : vector<8x128xf32>
    %303 = vector.extract_strided_slice %302 {offsets = [0, 0], sizes = [8, 64], strides = [1, 1]} : vector<8x128xf32> to vector<8x64xf32>
    %304 = vector.extract_strided_slice %302 {offsets = [0, 64], sizes = [8, 64], strides = [1, 1]} : vector<8x128xf32> to vector<8x64xf32>
    %305 = vector.extract_strided_slice %288 {offsets = [0, 128], sizes = [8, 64], strides = [1, 1]} : vector<8x192xf32> to vector<8x64xf32>
    %306 = vector.extract_strided_slice %292 {offsets = [0, 128], sizes = [8, 64], strides = [1, 1]} : vector<8x192xf32> to vector<8x64xf32>
    %307 = arith.mulf %303, %306 : vector<8x64xf32>
    %308 = arith.addf %305, %307 : vector<8x64xf32>
    %309 = math.tanh %308 : vector<8x64xf32>
    %cst_107 = arith.constant 1.000000e+00 : f32
    %310 = vector.broadcast %cst_107 : f32 to vector<8x64xf32>
    %311 = arith.subf %310, %304 : vector<8x64xf32>
    %312 = arith.mulf %311, %309 : vector<8x64xf32>
    %313 = arith.mulf %304, %283 : vector<8x64xf32>
    %314 = arith.addf %312, %313 : vector<8x64xf32>
    %315 = vector.extract_strided_slice %314 {offsets = [0, 0], sizes = [8, 32], strides = [1, 1]} : vector<8x64xf32> to vector<8x32xf32>
    %c24_108 = arith.constant 24 : index
    %c0_109 = arith.constant 0 : index
    %316 = vector.load %arg4[%c24_108, %c0_109] : memref<64x64xf32, #tpu.memory_space<vmem>>, vector<8x32xf32>
    tpu.vector_store %arg4[%c24_108, %c0_109], %315 {strides = array<i32>} : memref<64x64xf32, #tpu.memory_space<vmem>>, vector<8x32xf32>,
    %317 = vector.extract_strided_slice %314 {offsets = [0, 32], sizes = [8, 32], strides = [1, 1]} : vector<8x64xf32> to vector<8x32xf32>
    %c32_110 = arith.constant 32 : index
    %c32_111 = arith.constant 32 : index
    %318 = vector.load %arg4[%c32_110, %c32_111] : memref<64x64xf32, #tpu.memory_space<vmem>>, vector<8x32xf32>
    tpu.vector_store %arg4[%c32_110, %c32_111], %317 {strides = array<i32>} : memref<64x64xf32, #tpu.memory_space<vmem>>, vector<8x32xf32>,
    %c32_112 = arith.constant 32 : index
    %c0_113 = arith.constant 0 : index
    %319 = vector.load %arg5[%c32_112, %c0_113] : memref<64x192xf32, #tpu.memory_space<vmem>>, vector<8x192xf32>
    %320 = arith.truncf %314 : vector<8x64xf32> to vector<8x64xbf16>
    %cst_114 = arith.constant dense<0.000000e+00> : vector<8x192xf32>
    %321 = tpu.matmul %320, %192, %cst_114 {dimension_numbers = #tpu.dot_dimension_numbers<[1], [0], [0], [1], [0, 0, 1, 1], [], []>} : vector<8x64xbf16>, vector<64x192xbf16>, vector<8x192xf32> -> vector<8x192xf32>
    %322 = vector.broadcast %193 : vector<1x192xf32> to vector<8x192xf32>
    %323 = arith.addf %321, %322 : vector<8x192xf32>
    %324 = vector.extract_strided_slice %319 {offsets = [0, 0], sizes = [8, 128], strides = [1, 1]} : vector<8x192xf32> to vector<8x128xf32>
    %325 = vector.extract_strided_slice %323 {offsets = [0, 0], sizes = [8, 128], strides = [1, 1]} : vector<8x192xf32> to vector<8x128xf32>
    %326 = arith.addf %324, %325 : vector<8x128xf32>
    %cst_115 = arith.constant 5.000000e-01 : f32
    %327 = vector.broadcast %cst_115 : f32 to vector<8x128xf32>
    %328 = arith.mulf %327, %326 : vector<8x128xf32>
    %329 = math.tanh %328 : vector<8x128xf32>
    %cst_116 = arith.constant 5.000000e-01 : f32
    %330 = vector.broadcast %cst_116 : f32 to vector<8x128xf32>
    %331 = arith.mulf %330, %329 : vector<8x128xf32>
    %cst_117 = arith.constant 5.000000e-01 : f32
    %332 = vector.broadcast %cst_117 : f32 to vector<8x128xf32>
    %333 = arith.addf %331, %332 : vector<8x128xf32>
    %334 = vector.extract_strided_slice %333 {offsets = [0, 0], sizes = [8, 64], strides = [1, 1]} : vector<8x128xf32> to vector<8x64xf32>
    %335 = vector.extract_strided_slice %333 {offsets = [0, 64], sizes = [8, 64], strides = [1, 1]} : vector<8x128xf32> to vector<8x64xf32>
    %336 = vector.extract_strided_slice %319 {offsets = [0, 128], sizes = [8, 64], strides = [1, 1]} : vector<8x192xf32> to vector<8x64xf32>
    %337 = vector.extract_strided_slice %323 {offsets = [0, 128], sizes = [8, 64], strides = [1, 1]} : vector<8x192xf32> to vector<8x64xf32>
    %338 = arith.mulf %334, %337 : vector<8x64xf32>
    %339 = arith.addf %336, %338 : vector<8x64xf32>
    %340 = math.tanh %339 : vector<8x64xf32>
    %cst_118 = arith.constant 1.000000e+00 : f32
    %341 = vector.broadcast %cst_118 : f32 to vector<8x64xf32>
    %342 = arith.subf %341, %335 : vector<8x64xf32>
    %343 = arith.mulf %342, %340 : vector<8x64xf32>
    %344 = arith.mulf %335, %314 : vector<8x64xf32>
    %345 = arith.addf %343, %344 : vector<8x64xf32>
    %346 = vector.extract_strided_slice %345 {offsets = [0, 0], sizes = [8, 32], strides = [1, 1]} : vector<8x64xf32> to vector<8x32xf32>
    %c32_119 = arith.constant 32 : index
    %c0_120 = arith.constant 0 : index
    %347 = vector.load %arg4[%c32_119, %c0_120] : memref<64x64xf32, #tpu.memory_space<vmem>>, vector<8x32xf32>
    tpu.vector_store %arg4[%c32_119, %c0_120], %346 {strides = array<i32>} : memref<64x64xf32, #tpu.memory_space<vmem>>, vector<8x32xf32>,
    %348 = vector.extract_strided_slice %345 {offsets = [0, 32], sizes = [8, 32], strides = [1, 1]} : vector<8x64xf32> to vector<8x32xf32>
    %c24_121 = arith.constant 24 : index
    %c32_122 = arith.constant 32 : index
    %349 = vector.load %arg4[%c24_121, %c32_122] : memref<64x64xf32, #tpu.memory_space<vmem>>, vector<8x32xf32>
    tpu.vector_store %arg4[%c24_121, %c32_122], %348 {strides = array<i32>} : memref<64x64xf32, #tpu.memory_space<vmem>>, vector<8x32xf32>,
    %c40_123 = arith.constant 40 : index
    %c0_124 = arith.constant 0 : index
    %350 = vector.load %arg5[%c40_123, %c0_124] : memref<64x192xf32, #tpu.memory_space<vmem>>, vector<8x192xf32>
    %351 = arith.truncf %345 : vector<8x64xf32> to vector<8x64xbf16>
    %cst_125 = arith.constant dense<0.000000e+00> : vector<8x192xf32>
    %352 = tpu.matmul %351, %192, %cst_125 {dimension_numbers = #tpu.dot_dimension_numbers<[1], [0], [0], [1], [0, 0, 1, 1], [], []>} : vector<8x64xbf16>, vector<64x192xbf16>, vector<8x192xf32> -> vector<8x192xf32>
    %353 = vector.broadcast %193 : vector<1x192xf32> to vector<8x192xf32>
    %354 = arith.addf %352, %353 : vector<8x192xf32>
    %355 = vector.extract_strided_slice %350 {offsets = [0, 0], sizes = [8, 128], strides = [1, 1]} : vector<8x192xf32> to vector<8x128xf32>
    %356 = vector.extract_strided_slice %354 {offsets = [0, 0], sizes = [8, 128], strides = [1, 1]} : vector<8x192xf32> to vector<8x128xf32>
    %357 = arith.addf %355, %356 : vector<8x128xf32>
    %cst_126 = arith.constant 5.000000e-01 : f32
    %358 = vector.broadcast %cst_126 : f32 to vector<8x128xf32>
    %359 = arith.mulf %358, %357 : vector<8x128xf32>
    %360 = math.tanh %359 : vector<8x128xf32>
    %cst_127 = arith.constant 5.000000e-01 : f32
    %361 = vector.broadcast %cst_127 : f32 to vector<8x128xf32>
    %362 = arith.mulf %361, %360 : vector<8x128xf32>
    %cst_128 = arith.constant 5.000000e-01 : f32
    %363 = vector.broadcast %cst_128 : f32 to vector<8x128xf32>
    %364 = arith.addf %362, %363 : vector<8x128xf32>
    %365 = vector.extract_strided_slice %364 {offsets = [0, 0], sizes = [8, 64], strides = [1, 1]} : vector<8x128xf32> to vector<8x64xf32>
    %366 = vector.extract_strided_slice %364 {offsets = [0, 64], sizes = [8, 64], strides = [1, 1]} : vector<8x128xf32> to vector<8x64xf32>
    %367 = vector.extract_strided_slice %350 {offsets = [0, 128], sizes = [8, 64], strides = [1, 1]} : vector<8x192xf32> to vector<8x64xf32>
    %368 = vector.extract_strided_slice %354 {offsets = [0, 128], sizes = [8, 64], strides = [1, 1]} : vector<8x192xf32> to vector<8x64xf32>
    %369 = arith.mulf %365, %368 : vector<8x64xf32>
    %370 = arith.addf %367, %369 : vector<8x64xf32>
    %371 = math.tanh %370 : vector<8x64xf32>
    %cst_129 = arith.constant 1.000000e+00 : f32
    %372 = vector.broadcast %cst_129 : f32 to vector<8x64xf32>
    %373 = arith.subf %372, %366 : vector<8x64xf32>
    %374 = arith.mulf %373, %371 : vector<8x64xf32>
    %375 = arith.mulf %366, %345 : vector<8x64xf32>
    %376 = arith.addf %374, %375 : vector<8x64xf32>
    %377 = vector.extract_strided_slice %376 {offsets = [0, 0], sizes = [8, 32], strides = [1, 1]} : vector<8x64xf32> to vector<8x32xf32>
    %c40_130 = arith.constant 40 : index
    %c0_131 = arith.constant 0 : index
    %378 = vector.load %arg4[%c40_130, %c0_131] : memref<64x64xf32, #tpu.memory_space<vmem>>, vector<8x32xf32>
    tpu.vector_store %arg4[%c40_130, %c0_131], %377 {strides = array<i32>} : memref<64x64xf32, #tpu.memory_space<vmem>>, vector<8x32xf32>,
    %379 = vector.extract_strided_slice %376 {offsets = [0, 32], sizes = [8, 32], strides = [1, 1]} : vector<8x64xf32> to vector<8x32xf32>
    %c16_132 = arith.constant 16 : index
    %c32_133 = arith.constant 32 : index
    %380 = vector.load %arg4[%c16_132, %c32_133] : memref<64x64xf32, #tpu.memory_space<vmem>>, vector<8x32xf32>
    tpu.vector_store %arg4[%c16_132, %c32_133], %379 {strides = array<i32>} : memref<64x64xf32, #tpu.memory_space<vmem>>, vector<8x32xf32>,
    %c48_134 = arith.constant 48 : index
    %c0_135 = arith.constant 0 : index
    %381 = vector.load %arg5[%c48_134, %c0_135] : memref<64x192xf32, #tpu.memory_space<vmem>>, vector<8x192xf32>
    %382 = arith.truncf %376 : vector<8x64xf32> to vector<8x64xbf16>
    %cst_136 = arith.constant dense<0.000000e+00> : vector<8x192xf32>
    %383 = tpu.matmul %382, %192, %cst_136 {dimension_numbers = #tpu.dot_dimension_numbers<[1], [0], [0], [1], [0, 0, 1, 1], [], []>} : vector<8x64xbf16>, vector<64x192xbf16>, vector<8x192xf32> -> vector<8x192xf32>
    %384 = vector.broadcast %193 : vector<1x192xf32> to vector<8x192xf32>
    %385 = arith.addf %383, %384 : vector<8x192xf32>
    %386 = vector.extract_strided_slice %381 {offsets = [0, 0], sizes = [8, 128], strides = [1, 1]} : vector<8x192xf32> to vector<8x128xf32>
    %387 = vector.extract_strided_slice %385 {offsets = [0, 0], sizes = [8, 128], strides = [1, 1]} : vector<8x192xf32> to vector<8x128xf32>
    %388 = arith.addf %386, %387 : vector<8x128xf32>
    %cst_137 = arith.constant 5.000000e-01 : f32
    %389 = vector.broadcast %cst_137 : f32 to vector<8x128xf32>
    %390 = arith.mulf %389, %388 : vector<8x128xf32>
    %391 = math.tanh %390 : vector<8x128xf32>
    %cst_138 = arith.constant 5.000000e-01 : f32
    %392 = vector.broadcast %cst_138 : f32 to vector<8x128xf32>
    %393 = arith.mulf %392, %391 : vector<8x128xf32>
    %cst_139 = arith.constant 5.000000e-01 : f32
    %394 = vector.broadcast %cst_139 : f32 to vector<8x128xf32>
    %395 = arith.addf %393, %394 : vector<8x128xf32>
    %396 = vector.extract_strided_slice %395 {offsets = [0, 0], sizes = [8, 64], strides = [1, 1]} : vector<8x128xf32> to vector<8x64xf32>
    %397 = vector.extract_strided_slice %395 {offsets = [0, 64], sizes = [8, 64], strides = [1, 1]} : vector<8x128xf32> to vector<8x64xf32>
    %398 = vector.extract_strided_slice %381 {offsets = [0, 128], sizes = [8, 64], strides = [1, 1]} : vector<8x192xf32> to vector<8x64xf32>
    %399 = vector.extract_strided_slice %385 {offsets = [0, 128], sizes = [8, 64], strides = [1, 1]} : vector<8x192xf32> to vector<8x64xf32>
    %400 = arith.mulf %396, %399 : vector<8x64xf32>
    %401 = arith.addf %398, %400 : vector<8x64xf32>
    %402 = math.tanh %401 : vector<8x64xf32>
    %cst_140 = arith.constant 1.000000e+00 : f32
    %403 = vector.broadcast %cst_140 : f32 to vector<8x64xf32>
    %404 = arith.subf %403, %397 : vector<8x64xf32>
    %405 = arith.mulf %404, %402 : vector<8x64xf32>
    %406 = arith.mulf %397, %376 : vector<8x64xf32>
    %407 = arith.addf %405, %406 : vector<8x64xf32>
    %408 = vector.extract_strided_slice %407 {offsets = [0, 0], sizes = [8, 32], strides = [1, 1]} : vector<8x64xf32> to vector<8x32xf32>
    %c48_141 = arith.constant 48 : index
    %c0_142 = arith.constant 0 : index
    %409 = vector.load %arg4[%c48_141, %c0_142] : memref<64x64xf32, #tpu.memory_space<vmem>>, vector<8x32xf32>
    tpu.vector_store %arg4[%c48_141, %c0_142], %408 {strides = array<i32>} : memref<64x64xf32, #tpu.memory_space<vmem>>, vector<8x32xf32>,
    %410 = vector.extract_strided_slice %407 {offsets = [0, 32], sizes = [8, 32], strides = [1, 1]} : vector<8x64xf32> to vector<8x32xf32>
    %c8_143 = arith.constant 8 : index
    %c32_144 = arith.constant 32 : index
    %411 = vector.load %arg4[%c8_143, %c32_144] : memref<64x64xf32, #tpu.memory_space<vmem>>, vector<8x32xf32>
    tpu.vector_store %arg4[%c8_143, %c32_144], %410 {strides = array<i32>} : memref<64x64xf32, #tpu.memory_space<vmem>>, vector<8x32xf32>,
    %c56_145 = arith.constant 56 : index
    %c0_146 = arith.constant 0 : index
    %412 = vector.load %arg5[%c56_145, %c0_146] : memref<64x192xf32, #tpu.memory_space<vmem>>, vector<8x192xf32>
    %413 = arith.truncf %407 : vector<8x64xf32> to vector<8x64xbf16>
    %cst_147 = arith.constant dense<0.000000e+00> : vector<8x192xf32>
    %414 = tpu.matmul %413, %192, %cst_147 {dimension_numbers = #tpu.dot_dimension_numbers<[1], [0], [0], [1], [0, 0, 1, 1], [], []>} : vector<8x64xbf16>, vector<64x192xbf16>, vector<8x192xf32> -> vector<8x192xf32>
    %415 = vector.broadcast %193 : vector<1x192xf32> to vector<8x192xf32>
    %416 = arith.addf %414, %415 : vector<8x192xf32>
    %417 = vector.extract_strided_slice %412 {offsets = [0, 0], sizes = [8, 128], strides = [1, 1]} : vector<8x192xf32> to vector<8x128xf32>
    %418 = vector.extract_strided_slice %416 {offsets = [0, 0], sizes = [8, 128], strides = [1, 1]} : vector<8x192xf32> to vector<8x128xf32>
    %419 = arith.addf %417, %418 : vector<8x128xf32>
    %cst_148 = arith.constant 5.000000e-01 : f32
    %420 = vector.broadcast %cst_148 : f32 to vector<8x128xf32>
    %421 = arith.mulf %420, %419 : vector<8x128xf32>
    %422 = math.tanh %421 : vector<8x128xf32>
    %cst_149 = arith.constant 5.000000e-01 : f32
    %423 = vector.broadcast %cst_149 : f32 to vector<8x128xf32>
    %424 = arith.mulf %423, %422 : vector<8x128xf32>
    %cst_150 = arith.constant 5.000000e-01 : f32
    %425 = vector.broadcast %cst_150 : f32 to vector<8x128xf32>
    %426 = arith.addf %424, %425 : vector<8x128xf32>
    %427 = vector.extract_strided_slice %426 {offsets = [0, 0], sizes = [8, 64], strides = [1, 1]} : vector<8x128xf32> to vector<8x64xf32>
    %428 = vector.extract_strided_slice %426 {offsets = [0, 64], sizes = [8, 64], strides = [1, 1]} : vector<8x128xf32> to vector<8x64xf32>
    %429 = vector.extract_strided_slice %412 {offsets = [0, 128], sizes = [8, 64], strides = [1, 1]} : vector<8x192xf32> to vector<8x64xf32>
    %430 = vector.extract_strided_slice %416 {offsets = [0, 128], sizes = [8, 64], strides = [1, 1]} : vector<8x192xf32> to vector<8x64xf32>
    %431 = arith.mulf %427, %430 : vector<8x64xf32>
    %432 = arith.addf %429, %431 : vector<8x64xf32>
    %433 = math.tanh %432 : vector<8x64xf32>
    %cst_151 = arith.constant 1.000000e+00 : f32
    %434 = vector.broadcast %cst_151 : f32 to vector<8x64xf32>
    %435 = arith.subf %434, %428 : vector<8x64xf32>
    %436 = arith.mulf %435, %433 : vector<8x64xf32>
    %437 = arith.mulf %428, %407 : vector<8x64xf32>
    %438 = arith.addf %436, %437 : vector<8x64xf32>
    %439 = vector.extract_strided_slice %438 {offsets = [0, 0], sizes = [8, 32], strides = [1, 1]} : vector<8x64xf32> to vector<8x32xf32>
    %c56_152 = arith.constant 56 : index
    %c0_153 = arith.constant 0 : index
    %440 = vector.load %arg4[%c56_152, %c0_153] : memref<64x64xf32, #tpu.memory_space<vmem>>, vector<8x32xf32>
    tpu.vector_store %arg4[%c56_152, %c0_153], %439 {strides = array<i32>} : memref<64x64xf32, #tpu.memory_space<vmem>>, vector<8x32xf32>,
    %441 = vector.extract_strided_slice %438 {offsets = [0, 32], sizes = [8, 32], strides = [1, 1]} : vector<8x64xf32> to vector<8x32xf32>
    %c0_154 = arith.constant 0 : index
    %c32_155 = arith.constant 32 : index
    %442 = vector.load %arg4[%c0_154, %c32_155] : memref<64x64xf32, #tpu.memory_space<vmem>>, vector<8x32xf32>
    tpu.vector_store %arg4[%c0_154, %c32_155], %441 {strides = array<i32>} : memref<64x64xf32, #tpu.memory_space<vmem>>, vector<8x32xf32>,
    %cst_156 = arith.constant 0.000000e+00 : f32
    %443 = vector.broadcast %cst_156 : f32 to vector<8x64xf32>
    %c0_157 = arith.constant 0 : index
    %c0_158 = arith.constant 0 : index
    %444 = vector.load %arg4[%c0_157, %c0_158] : memref<64x64xf32, #tpu.memory_space<vmem>>, vector<64x64xf32>
    %445 = vector.extract_strided_slice %444 {offsets = [56, 0], sizes = [8, 64], strides = [1, 1]} : vector<64x64xf32> to vector<8x64xf32>
    %446 = vector.extract_strided_slice %444 {offsets = [48, 0], sizes = [8, 64], strides = [1, 1]} : vector<64x64xf32> to vector<8x64xf32>
    %447 = vector.extract_strided_slice %444 {offsets = [40, 0], sizes = [8, 64], strides = [1, 1]} : vector<64x64xf32> to vector<8x64xf32>
    %448 = vector.extract_strided_slice %444 {offsets = [32, 0], sizes = [8, 64], strides = [1, 1]} : vector<64x64xf32> to vector<8x64xf32>
    %449 = vector.extract_strided_slice %444 {offsets = [24, 0], sizes = [8, 64], strides = [1, 1]} : vector<64x64xf32> to vector<8x64xf32>
    %450 = vector.extract_strided_slice %444 {offsets = [16, 0], sizes = [8, 64], strides = [1, 1]} : vector<64x64xf32> to vector<8x64xf32>
    %451 = vector.extract_strided_slice %444 {offsets = [8, 0], sizes = [8, 64], strides = [1, 1]} : vector<64x64xf32> to vector<8x64xf32>
    %452 = vector.extract_strided_slice %444 {offsets = [0, 0], sizes = [8, 64], strides = [1, 1]} : vector<64x64xf32> to vector<8x64xf32>
    %453 = tpu.concatenate %445, %446, %447, %448, %449, %450, %451, %452 in 0 : vector<8x64xf32>, vector<8x64xf32>, vector<8x64xf32>, vector<8x64xf32>, vector<8x64xf32>, vector<8x64xf32>, vector<8x64xf32>, vector<8x64xf32> -> vector<64x64xf32>
    %454 = tpu.concatenate %444, %453 in 1 : vector<64x64xf32>, vector<64x64xf32> -> vector<64x128xf32>
    %455 = arith.truncf %454 : vector<64x128xf32> to vector<64x128xbf16>
    %c560 = arith.constant 560 : index
    %c0_159 = arith.constant 0 : index
    %456 = vector.load %arg1[%c560, %c0_159] : memref<1008x256xbf16, #tpu.memory_space<vmem>>, vector<128x256xbf16>
    %cst_160 = arith.constant dense<0.000000e+00> : vector<64x256xf32>
    %457 = tpu.matmul %455, %456, %cst_160 {dimension_numbers = #tpu.dot_dimension_numbers<[1], [0], [0], [1], [0, 0, 1, 1], [], []>} : vector<64x128xbf16>, vector<128x256xbf16>, vector<64x256xf32> -> vector<64x256xf32>
    %c14 = arith.constant 14 : index
    %c0_161 = arith.constant 0 : index
    %458 = vector.load %arg2[%c14, %c0_161] : memref<17x256xf32, #tpu.memory_space<vmem>>, vector<1x256xf32>
    %459 = vector.broadcast %458 : vector<1x256xf32> to vector<64x256xf32>
    %460 = arith.addf %457, %459 : vector<64x256xf32>
    %c0_162 = arith.constant 0 : index
    %c0_163 = arith.constant 0 : index
    %461 = vector.load %arg6[%c0_162, %c0_163] : memref<64x256xf32, #tpu.memory_space<vmem>>, vector<64x256xf32>
    tpu.vector_store %arg6[%c0_162, %c0_163], %460 {strides = array<i32>} : memref<64x256xf32, #tpu.memory_space<vmem>>, vector<64x256xf32>,
    %c688 = arith.constant 688 : index
    %c0_164 = arith.constant 0 : index
    %462 = vector.load %arg1[%c688, %c0_164] : memref<1008x256xbf16, #tpu.memory_space<vmem>>, vector<64x256xbf16>
    %c0_165 = arith.constant 0 : index
    %c0_166 = arith.constant 0 : index
    %463 = vector.load %arg6[%c0_165, %c0_166] : memref<64x256xf32, #tpu.memory_space<vmem>>, vector<8x256xf32>
    %464 = arith.truncf %443 : vector<8x64xf32> to vector<8x64xbf16>
    %cst_167 = arith.constant dense<0.000000e+00> : vector<8x256xf32>
    %465 = tpu.matmul %464, %462, %cst_167 {dimension_numbers = #tpu.dot_dimension_numbers<[1], [0], [0], [1], [0, 0, 1, 1], [], []>} : vector<8x64xbf16>, vector<64x256xbf16>, vector<8x256xf32> -> vector<8x256xf32>
    %466 = arith.addf %463, %465 : vector<8x256xf32>
    %467 = vector.extract_strided_slice %466 {offsets = [0, 0], sizes = [8, 192], strides = [1, 1]} : vector<8x256xf32> to vector<8x192xf32>
    %cst_168 = arith.constant 5.000000e-01 : f32
    %468 = vector.broadcast %cst_168 : f32 to vector<8x192xf32>
    %469 = arith.mulf %468, %467 : vector<8x192xf32>
    %470 = math.tanh %469 : vector<8x192xf32>
    %cst_169 = arith.constant 5.000000e-01 : f32
    %471 = vector.broadcast %cst_169 : f32 to vector<8x192xf32>
    %472 = arith.mulf %471, %470 : vector<8x192xf32>
    %cst_170 = arith.constant 5.000000e-01 : f32
    %473 = vector.broadcast %cst_170 : f32 to vector<8x192xf32>
    %474 = arith.addf %472, %473 : vector<8x192xf32>
    %475 = vector.extract_strided_slice %474 {offsets = [0, 0], sizes = [8, 64], strides = [1, 1]} : vector<8x192xf32> to vector<8x64xf32>
    %476 = vector.extract_strided_slice %474 {offsets = [0, 64], sizes = [8, 64], strides = [1, 1]} : vector<8x192xf32> to vector<8x64xf32>
    %477 = vector.extract_strided_slice %474 {offsets = [0, 128], sizes = [8, 64], strides = [1, 1]} : vector<8x192xf32> to vector<8x64xf32>
    %478 = arith.mulf %476, %443 : vector<8x64xf32>
    %479 = vector.extract_strided_slice %466 {offsets = [0, 192], sizes = [8, 64], strides = [1, 1]} : vector<8x256xf32> to vector<8x64xf32>
    %480 = math.tanh %479 : vector<8x64xf32>
    %481 = arith.mulf %475, %480 : vector<8x64xf32>
    %482 = arith.addf %478, %481 : vector<8x64xf32>
    %483 = math.tanh %482 : vector<8x64xf32>
    %484 = arith.mulf %477, %483 : vector<8x64xf32>
    %485 = vector.extract_strided_slice %484 {offsets = [0, 0], sizes = [8, 32], strides = [1, 1]} : vector<8x64xf32> to vector<8x32xf32>
    %c0_171 = arith.constant 0 : index
    %c0_172 = arith.constant 0 : index
    %486 = vector.load %arg4[%c0_171, %c0_172] : memref<64x64xf32, #tpu.memory_space<vmem>>, vector<8x32xf32>
    tpu.vector_store %arg4[%c0_171, %c0_172], %485 {strides = array<i32>} : memref<64x64xf32, #tpu.memory_space<vmem>>, vector<8x32xf32>,
    %487 = vector.extract_strided_slice %484 {offsets = [0, 32], sizes = [8, 32], strides = [1, 1]} : vector<8x64xf32> to vector<8x32xf32>
    %c56_173 = arith.constant 56 : index
    %c32_174 = arith.constant 32 : index
    %488 = vector.load %arg4[%c56_173, %c32_174] : memref<64x64xf32, #tpu.memory_space<vmem>>, vector<8x32xf32>
    tpu.vector_store %arg4[%c56_173, %c32_174], %487 {strides = array<i32>} : memref<64x64xf32, #tpu.memory_space<vmem>>, vector<8x32xf32>,
    %c8_175 = arith.constant 8 : index
    %c0_176 = arith.constant 0 : index
    %489 = vector.load %arg6[%c8_175, %c0_176] : memref<64x256xf32, #tpu.memory_space<vmem>>, vector<8x256xf32>
    %490 = arith.truncf %484 : vector<8x64xf32> to vector<8x64xbf16>
    %cst_177 = arith.constant dense<0.000000e+00> : vector<8x256xf32>
    %491 = tpu.matmul %490, %462, %cst_177 {dimension_numbers = #tpu.dot_dimension_numbers<[1], [0], [0], [1], [0, 0, 1, 1], [], []>} : vector<8x64xbf16>, vector<64x256xbf16>, vector<8x256xf32> -> vector<8x256xf32>
    %492 = arith.addf %489, %491 : vector<8x256xf32>
    %493 = vector.extract_strided_slice %492 {offsets = [0, 0], sizes = [8, 192], strides = [1, 1]} : vector<8x256xf32> to vector<8x192xf32>
    %cst_178 = arith.constant 5.000000e-01 : f32
    %494 = vector.broadcast %cst_178 : f32 to vector<8x192xf32>
    %495 = arith.mulf %494, %493 : vector<8x192xf32>
    %496 = math.tanh %495 : vector<8x192xf32>
    %cst_179 = arith.constant 5.000000e-01 : f32
    %497 = vector.broadcast %cst_179 : f32 to vector<8x192xf32>
    %498 = arith.mulf %497, %496 : vector<8x192xf32>
    %cst_180 = arith.constant 5.000000e-01 : f32
    %499 = vector.broadcast %cst_180 : f32 to vector<8x192xf32>
    %500 = arith.addf %498, %499 : vector<8x192xf32>
    %501 = vector.extract_strided_slice %500 {offsets = [0, 0], sizes = [8, 64], strides = [1, 1]} : vector<8x192xf32> to vector<8x64xf32>
    %502 = vector.extract_strided_slice %500 {offsets = [0, 64], sizes = [8, 64], strides = [1, 1]} : vector<8x192xf32> to vector<8x64xf32>
    %503 = vector.extract_strided_slice %500 {offsets = [0, 128], sizes = [8, 64], strides = [1, 1]} : vector<8x192xf32> to vector<8x64xf32>
    %504 = arith.mulf %502, %482 : vector<8x64xf32>
    %505 = vector.extract_strided_slice %492 {offsets = [0, 192], sizes = [8, 64], strides = [1, 1]} : vector<8x256xf32> to vector<8x64xf32>
    %506 = math.tanh %505 : vector<8x64xf32>
    %507 = arith.mulf %501, %506 : vector<8x64xf32>
    %508 = arith.addf %504, %507 : vector<8x64xf32>
    %509 = math.tanh %508 : vector<8x64xf32>
    %510 = arith.mulf %503, %509 : vector<8x64xf32>
    %511 = vector.extract_strided_slice %510 {offsets = [0, 0], sizes = [8, 32], strides = [1, 1]} : vector<8x64xf32> to vector<8x32xf32>
    %c8_181 = arith.constant 8 : index
    %c0_182 = arith.constant 0 : index
    %512 = vector.load %arg4[%c8_181, %c0_182] : memref<64x64xf32, #tpu.memory_space<vmem>>, vector<8x32xf32>
    tpu.vector_store %arg4[%c8_181, %c0_182], %511 {strides = array<i32>} : memref<64x64xf32, #tpu.memory_space<vmem>>, vector<8x32xf32>,
    %513 = vector.extract_strided_slice %510 {offsets = [0, 32], sizes = [8, 32], strides = [1, 1]} : vector<8x64xf32> to vector<8x32xf32>
    %c48_183 = arith.constant 48 : index
    %c32_184 = arith.constant 32 : index
    %514 = vector.load %arg4[%c48_183, %c32_184] : memref<64x64xf32, #tpu.memory_space<vmem>>, vector<8x32xf32>
    tpu.vector_store %arg4[%c48_183, %c32_184], %513 {strides = array<i32>} : memref<64x64xf32, #tpu.memory_space<vmem>>, vector<8x32xf32>,
    %c16_185 = arith.constant 16 : index
    %c0_186 = arith.constant 0 : index
    %515 = vector.load %arg6[%c16_185, %c0_186] : memref<64x256xf32, #tpu.memory_space<vmem>>, vector<8x256xf32>
    %516 = arith.truncf %510 : vector<8x64xf32> to vector<8x64xbf16>
    %cst_187 = arith.constant dense<0.000000e+00> : vector<8x256xf32>
    %517 = tpu.matmul %516, %462, %cst_187 {dimension_numbers = #tpu.dot_dimension_numbers<[1], [0], [0], [1], [0, 0, 1, 1], [], []>} : vector<8x64xbf16>, vector<64x256xbf16>, vector<8x256xf32> -> vector<8x256xf32>
    %518 = arith.addf %515, %517 : vector<8x256xf32>
    %519 = vector.extract_strided_slice %518 {offsets = [0, 0], sizes = [8, 192], strides = [1, 1]} : vector<8x256xf32> to vector<8x192xf32>
    %cst_188 = arith.constant 5.000000e-01 : f32
    %520 = vector.broadcast %cst_188 : f32 to vector<8x192xf32>
    %521 = arith.mulf %520, %519 : vector<8x192xf32>
    %522 = math.tanh %521 : vector<8x192xf32>
    %cst_189 = arith.constant 5.000000e-01 : f32
    %523 = vector.broadcast %cst_189 : f32 to vector<8x192xf32>
    %524 = arith.mulf %523, %522 : vector<8x192xf32>
    %cst_190 = arith.constant 5.000000e-01 : f32
    %525 = vector.broadcast %cst_190 : f32 to vector<8x192xf32>
    %526 = arith.addf %524, %525 : vector<8x192xf32>
    %527 = vector.extract_strided_slice %526 {offsets = [0, 0], sizes = [8, 64], strides = [1, 1]} : vector<8x192xf32> to vector<8x64xf32>
    %528 = vector.extract_strided_slice %526 {offsets = [0, 64], sizes = [8, 64], strides = [1, 1]} : vector<8x192xf32> to vector<8x64xf32>
    %529 = vector.extract_strided_slice %526 {offsets = [0, 128], sizes = [8, 64], strides = [1, 1]} : vector<8x192xf32> to vector<8x64xf32>
    %530 = arith.mulf %528, %508 : vector<8x64xf32>
    %531 = vector.extract_strided_slice %518 {offsets = [0, 192], sizes = [8, 64], strides = [1, 1]} : vector<8x256xf32> to vector<8x64xf32>
    %532 = math.tanh %531 : vector<8x64xf32>
    %533 = arith.mulf %527, %532 : vector<8x64xf32>
    %534 = arith.addf %530, %533 : vector<8x64xf32>
    %535 = math.tanh %534 : vector<8x64xf32>
    %536 = arith.mulf %529, %535 : vector<8x64xf32>
    %537 = vector.extract_strided_slice %536 {offsets = [0, 0], sizes = [8, 32], strides = [1, 1]} : vector<8x64xf32> to vector<8x32xf32>
    %c16_191 = arith.constant 16 : index
    %c0_192 = arith.constant 0 : index
    %538 = vector.load %arg4[%c16_191, %c0_192] : memref<64x64xf32, #tpu.memory_space<vmem>>, vector<8x32xf32>
    tpu.vector_store %arg4[%c16_191, %c0_192], %537 {strides = array<i32>} : memref<64x64xf32, #tpu.memory_space<vmem>>, vector<8x32xf32>,
    %539 = vector.extract_strided_slice %536 {offsets = [0, 32], sizes = [8, 32], strides = [1, 1]} : vector<8x64xf32> to vector<8x32xf32>
    %c40_193 = arith.constant 40 : index
    %c32_194 = arith.constant 32 : index
    %540 = vector.load %arg4[%c40_193, %c32_194] : memref<64x64xf32, #tpu.memory_space<vmem>>, vector<8x32xf32>
    tpu.vector_store %arg4[%c40_193, %c32_194], %539 {strides = array<i32>} : memref<64x64xf32, #tpu.memory_space<vmem>>, vector<8x32xf32>,
    %c24_195 = arith.constant 24 : index
    %c0_196 = arith.constant 0 : index
    %541 = vector.load %arg6[%c24_195, %c0_196] : memref<64x256xf32, #tpu.memory_space<vmem>>, vector<8x256xf32>
    %542 = arith.truncf %536 : vector<8x64xf32> to vector<8x64xbf16>
    %cst_197 = arith.constant dense<0.000000e+00> : vector<8x256xf32>
    %543 = tpu.matmul %542, %462, %cst_197 {dimension_numbers = #tpu.dot_dimension_numbers<[1], [0], [0], [1], [0, 0, 1, 1], [], []>} : vector<8x64xbf16>, vector<64x256xbf16>, vector<8x256xf32> -> vector<8x256xf32>
    %544 = arith.addf %541, %543 : vector<8x256xf32>
    %545 = vector.extract_strided_slice %544 {offsets = [0, 0], sizes = [8, 192], strides = [1, 1]} : vector<8x256xf32> to vector<8x192xf32>
    %cst_198 = arith.constant 5.000000e-01 : f32
    %546 = vector.broadcast %cst_198 : f32 to vector<8x192xf32>
    %547 = arith.mulf %546, %545 : vector<8x192xf32>
    %548 = math.tanh %547 : vector<8x192xf32>
    %cst_199 = arith.constant 5.000000e-01 : f32
    %549 = vector.broadcast %cst_199 : f32 to vector<8x192xf32>
    %550 = arith.mulf %549, %548 : vector<8x192xf32>
    %cst_200 = arith.constant 5.000000e-01 : f32
    %551 = vector.broadcast %cst_200 : f32 to vector<8x192xf32>
    %552 = arith.addf %550, %551 : vector<8x192xf32>
    %553 = vector.extract_strided_slice %552 {offsets = [0, 0], sizes = [8, 64], strides = [1, 1]} : vector<8x192xf32> to vector<8x64xf32>
    %554 = vector.extract_strided_slice %552 {offsets = [0, 64], sizes = [8, 64], strides = [1, 1]} : vector<8x192xf32> to vector<8x64xf32>
    %555 = vector.extract_strided_slice %552 {offsets = [0, 128], sizes = [8, 64], strides = [1, 1]} : vector<8x192xf32> to vector<8x64xf32>
    %556 = arith.mulf %554, %534 : vector<8x64xf32>
    %557 = vector.extract_strided_slice %544 {offsets = [0, 192], sizes = [8, 64], strides = [1, 1]} : vector<8x256xf32> to vector<8x64xf32>
    %558 = math.tanh %557 : vector<8x64xf32>
    %559 = arith.mulf %553, %558 : vector<8x64xf32>
    %560 = arith.addf %556, %559 : vector<8x64xf32>
    %561 = math.tanh %560 : vector<8x64xf32>
    %562 = arith.mulf %555, %561 : vector<8x64xf32>
    %563 = vector.extract_strided_slice %562 {offsets = [0, 0], sizes = [8, 32], strides = [1, 1]} : vector<8x64xf32> to vector<8x32xf32>
    %c24_201 = arith.constant 24 : index
    %c0_202 = arith.constant 0 : index
    %564 = vector.load %arg4[%c24_201, %c0_202] : memref<64x64xf32, #tpu.memory_space<vmem>>, vector<8x32xf32>
    tpu.vector_store %arg4[%c24_201, %c0_202], %563 {strides = array<i32>} : memref<64x64xf32, #tpu.memory_space<vmem>>, vector<8x32xf32>,
    %565 = vector.extract_strided_slice %562 {offsets = [0, 32], sizes = [8, 32], strides = [1, 1]} : vector<8x64xf32> to vector<8x32xf32>
    %c32_203 = arith.constant 32 : index
    %c32_204 = arith.constant 32 : index
    %566 = vector.load %arg4[%c32_203, %c32_204] : memref<64x64xf32, #tpu.memory_space<vmem>>, vector<8x32xf32>
    tpu.vector_store %arg4[%c32_203, %c32_204], %565 {strides = array<i32>} : memref<64x64xf32, #tpu.memory_space<vmem>>, vector<8x32xf32>,
    %c32_205 = arith.constant 32 : index
    %c0_206 = arith.constant 0 : index
    %567 = vector.load %arg6[%c32_205, %c0_206] : memref<64x256xf32, #tpu.memory_space<vmem>>, vector<8x256xf32>
    %568 = arith.truncf %562 : vector<8x64xf32> to vector<8x64xbf16>
    %cst_207 = arith.constant dense<0.000000e+00> : vector<8x256xf32>
    %569 = tpu.matmul %568, %462, %cst_207 {dimension_numbers = #tpu.dot_dimension_numbers<[1], [0], [0], [1], [0, 0, 1, 1], [], []>} : vector<8x64xbf16>, vector<64x256xbf16>, vector<8x256xf32> -> vector<8x256xf32>
    %570 = arith.addf %567, %569 : vector<8x256xf32>
    %571 = vector.extract_strided_slice %570 {offsets = [0, 0], sizes = [8, 192], strides = [1, 1]} : vector<8x256xf32> to vector<8x192xf32>
    %cst_208 = arith.constant 5.000000e-01 : f32
    %572 = vector.broadcast %cst_208 : f32 to vector<8x192xf32>
    %573 = arith.mulf %572, %571 : vector<8x192xf32>
    %574 = math.tanh %573 : vector<8x192xf32>
    %cst_209 = arith.constant 5.000000e-01 : f32
    %575 = vector.broadcast %cst_209 : f32 to vector<8x192xf32>
    %576 = arith.mulf %575, %574 : vector<8x192xf32>
    %cst_210 = arith.constant 5.000000e-01 : f32
    %577 = vector.broadcast %cst_210 : f32 to vector<8x192xf32>
    %578 = arith.addf %576, %577 : vector<8x192xf32>
    %579 = vector.extract_strided_slice %578 {offsets = [0, 0], sizes = [8, 64], strides = [1, 1]} : vector<8x192xf32> to vector<8x64xf32>
    %580 = vector.extract_strided_slice %578 {offsets = [0, 64], sizes = [8, 64], strides = [1, 1]} : vector<8x192xf32> to vector<8x64xf32>
    %581 = vector.extract_strided_slice %578 {offsets = [0, 128], sizes = [8, 64], strides = [1, 1]} : vector<8x192xf32> to vector<8x64xf32>
    %582 = arith.mulf %580, %560 : vector<8x64xf32>
    %583 = vector.extract_strided_slice %570 {offsets = [0, 192], sizes = [8, 64], strides = [1, 1]} : vector<8x256xf32> to vector<8x64xf32>
    %584 = math.tanh %583 : vector<8x64xf32>
    %585 = arith.mulf %579, %584 : vector<8x64xf32>
    %586 = arith.addf %582, %585 : vector<8x64xf32>
    %587 = math.tanh %586 : vector<8x64xf32>
    %588 = arith.mulf %581, %587 : vector<8x64xf32>
    %589 = vector.extract_strided_slice %588 {offsets = [0, 0], sizes = [8, 32], strides = [1, 1]} : vector<8x64xf32> to vector<8x32xf32>
    %c32_211 = arith.constant 32 : index
    %c0_212 = arith.constant 0 : index
    %590 = vector.load %arg4[%c32_211, %c0_212] : memref<64x64xf32, #tpu.memory_space<vmem>>, vector<8x32xf32>
    tpu.vector_store %arg4[%c32_211, %c0_212], %589 {strides = array<i32>} : memref<64x64xf32, #tpu.memory_space<vmem>>, vector<8x32xf32>,
    %591 = vector.extract_strided_slice %588 {offsets = [0, 32], sizes = [8, 32], strides = [1, 1]} : vector<8x64xf32> to vector<8x32xf32>
    %c24_213 = arith.constant 24 : index
    %c32_214 = arith.constant 32 : index
    %592 = vector.load %arg4[%c24_213, %c32_214] : memref<64x64xf32, #tpu.memory_space<vmem>>, vector<8x32xf32>
    tpu.vector_store %arg4[%c24_213, %c32_214], %591 {strides = array<i32>} : memref<64x64xf32, #tpu.memory_space<vmem>>, vector<8x32xf32>,
    %c40_215 = arith.constant 40 : index
    %c0_216 = arith.constant 0 : index
    %593 = vector.load %arg6[%c40_215, %c0_216] : memref<64x256xf32, #tpu.memory_space<vmem>>, vector<8x256xf32>
    %594 = arith.truncf %588 : vector<8x64xf32> to vector<8x64xbf16>
    %cst_217 = arith.constant dense<0.000000e+00> : vector<8x256xf32>
    %595 = tpu.matmul %594, %462, %cst_217 {dimension_numbers = #tpu.dot_dimension_numbers<[1], [0], [0], [1], [0, 0, 1, 1], [], []>} : vector<8x64xbf16>, vector<64x256xbf16>, vector<8x256xf32> -> vector<8x256xf32>
    %596 = arith.addf %593, %595 : vector<8x256xf32>
    %597 = vector.extract_strided_slice %596 {offsets = [0, 0], sizes = [8, 192], strides = [1, 1]} : vector<8x256xf32> to vector<8x192xf32>
    %cst_218 = arith.constant 5.000000e-01 : f32
    %598 = vector.broadcast %cst_218 : f32 to vector<8x192xf32>
    %599 = arith.mulf %598, %597 : vector<8x192xf32>
    %600 = math.tanh %599 : vector<8x192xf32>
    %cst_219 = arith.constant 5.000000e-01 : f32
    %601 = vector.broadcast %cst_219 : f32 to vector<8x192xf32>
    %602 = arith.mulf %601, %600 : vector<8x192xf32>
    %cst_220 = arith.constant 5.000000e-01 : f32
    %603 = vector.broadcast %cst_220 : f32 to vector<8x192xf32>
    %604 = arith.addf %602, %603 : vector<8x192xf32>
    %605 = vector.extract_strided_slice %604 {offsets = [0, 0], sizes = [8, 64], strides = [1, 1]} : vector<8x192xf32> to vector<8x64xf32>
    %606 = vector.extract_strided_slice %604 {offsets = [0, 64], sizes = [8, 64], strides = [1, 1]} : vector<8x192xf32> to vector<8x64xf32>
    %607 = vector.extract_strided_slice %604 {offsets = [0, 128], sizes = [8, 64], strides = [1, 1]} : vector<8x192xf32> to vector<8x64xf32>
    %608 = arith.mulf %606, %586 : vector<8x64xf32>
    %609 = vector.extract_strided_slice %596 {offsets = [0, 192], sizes = [8, 64], strides = [1, 1]} : vector<8x256xf32> to vector<8x64xf32>
    %610 = math.tanh %609 : vector<8x64xf32>
    %611 = arith.mulf %605, %610 : vector<8x64xf32>
    %612 = arith.addf %608, %611 : vector<8x64xf32>
    %613 = math.tanh %612 : vector<8x64xf32>
    %614 = arith.mulf %607, %613 : vector<8x64xf32>
    %615 = vector.extract_strided_slice %614 {offsets = [0, 0], sizes = [8, 32], strides = [1, 1]} : vector<8x64xf32> to vector<8x32xf32>
    %c40_221 = arith.constant 40 : index
    %c0_222 = arith.constant 0 : index
    %616 = vector.load %arg4[%c40_221, %c0_222] : memref<64x64xf32, #tpu.memory_space<vmem>>, vector<8x32xf32>
    tpu.vector_store %arg4[%c40_221, %c0_222], %615 {strides = array<i32>} : memref<64x64xf32, #tpu.memory_space<vmem>>, vector<8x32xf32>,
    %617 = vector.extract_strided_slice %614 {offsets = [0, 32], sizes = [8, 32], strides = [1, 1]} : vector<8x64xf32> to vector<8x32xf32>
    %c16_223 = arith.constant 16 : index
    %c32_224 = arith.constant 32 : index
    %618 = vector.load %arg4[%c16_223, %c32_224] : memref<64x64xf32, #tpu.memory_space<vmem>>, vector<8x32xf32>
    tpu.vector_store %arg4[%c16_223, %c32_224], %617 {strides = array<i32>} : memref<64x64xf32, #tpu.memory_space<vmem>>, vector<8x32xf32>,
    %c48_225 = arith.constant 48 : index
    %c0_226 = arith.constant 0 : index
    %619 = vector.load %arg6[%c48_225, %c0_226] : memref<64x256xf32, #tpu.memory_space<vmem>>, vector<8x256xf32>
    %620 = arith.truncf %614 : vector<8x64xf32> to vector<8x64xbf16>
    %cst_227 = arith.constant dense<0.000000e+00> : vector<8x256xf32>
    %621 = tpu.matmul %620, %462, %cst_227 {dimension_numbers = #tpu.dot_dimension_numbers<[1], [0], [0], [1], [0, 0, 1, 1], [], []>} : vector<8x64xbf16>, vector<64x256xbf16>, vector<8x256xf32> -> vector<8x256xf32>
    %622 = arith.addf %619, %621 : vector<8x256xf32>
    %623 = vector.extract_strided_slice %622 {offsets = [0, 0], sizes = [8, 192], strides = [1, 1]} : vector<8x256xf32> to vector<8x192xf32>
    %cst_228 = arith.constant 5.000000e-01 : f32
    %624 = vector.broadcast %cst_228 : f32 to vector<8x192xf32>
    %625 = arith.mulf %624, %623 : vector<8x192xf32>
    %626 = math.tanh %625 : vector<8x192xf32>
    %cst_229 = arith.constant 5.000000e-01 : f32
    %627 = vector.broadcast %cst_229 : f32 to vector<8x192xf32>
    %628 = arith.mulf %627, %626 : vector<8x192xf32>
    %cst_230 = arith.constant 5.000000e-01 : f32
    %629 = vector.broadcast %cst_230 : f32 to vector<8x192xf32>
    %630 = arith.addf %628, %629 : vector<8x192xf32>
    %631 = vector.extract_strided_slice %630 {offsets = [0, 0], sizes = [8, 64], strides = [1, 1]} : vector<8x192xf32> to vector<8x64xf32>
    %632 = vector.extract_strided_slice %630 {offsets = [0, 64], sizes = [8, 64], strides = [1, 1]} : vector<8x192xf32> to vector<8x64xf32>
    %633 = vector.extract_strided_slice %630 {offsets = [0, 128], sizes = [8, 64], strides = [1, 1]} : vector<8x192xf32> to vector<8x64xf32>
    %634 = arith.mulf %632, %612 : vector<8x64xf32>
    %635 = vector.extract_strided_slice %622 {offsets = [0, 192], sizes = [8, 64], strides = [1, 1]} : vector<8x256xf32> to vector<8x64xf32>
    %636 = math.tanh %635 : vector<8x64xf32>
    %637 = arith.mulf %631, %636 : vector<8x64xf32>
    %638 = arith.addf %634, %637 : vector<8x64xf32>
    %639 = math.tanh %638 : vector<8x64xf32>
    %640 = arith.mulf %633, %639 : vector<8x64xf32>
    %641 = vector.extract_strided_slice %640 {offsets = [0, 0], sizes = [8, 32], strides = [1, 1]} : vector<8x64xf32> to vector<8x32xf32>
    %c48_231 = arith.constant 48 : index
    %c0_232 = arith.constant 0 : index
    %642 = vector.load %arg4[%c48_231, %c0_232] : memref<64x64xf32, #tpu.memory_space<vmem>>, vector<8x32xf32>
    tpu.vector_store %arg4[%c48_231, %c0_232], %641 {strides = array<i32>} : memref<64x64xf32, #tpu.memory_space<vmem>>, vector<8x32xf32>,
    %643 = vector.extract_strided_slice %640 {offsets = [0, 32], sizes = [8, 32], strides = [1, 1]} : vector<8x64xf32> to vector<8x32xf32>
    %c8_233 = arith.constant 8 : index
    %c32_234 = arith.constant 32 : index
    %644 = vector.load %arg4[%c8_233, %c32_234] : memref<64x64xf32, #tpu.memory_space<vmem>>, vector<8x32xf32>
    tpu.vector_store %arg4[%c8_233, %c32_234], %643 {strides = array<i32>} : memref<64x64xf32, #tpu.memory_space<vmem>>, vector<8x32xf32>,
    %c56_235 = arith.constant 56 : index
    %c0_236 = arith.constant 0 : index
    %645 = vector.load %arg6[%c56_235, %c0_236] : memref<64x256xf32, #tpu.memory_space<vmem>>, vector<8x256xf32>
    %646 = arith.truncf %640 : vector<8x64xf32> to vector<8x64xbf16>
    %cst_237 = arith.constant dense<0.000000e+00> : vector<8x256xf32>
    %647 = tpu.matmul %646, %462, %cst_237 {dimension_numbers = #tpu.dot_dimension_numbers<[1], [0], [0], [1], [0, 0, 1, 1], [], []>} : vector<8x64xbf16>, vector<64x256xbf16>, vector<8x256xf32> -> vector<8x256xf32>
    %648 = arith.addf %645, %647 : vector<8x256xf32>
    %649 = vector.extract_strided_slice %648 {offsets = [0, 0], sizes = [8, 192], strides = [1, 1]} : vector<8x256xf32> to vector<8x192xf32>
    %cst_238 = arith.constant 5.000000e-01 : f32
    %650 = vector.broadcast %cst_238 : f32 to vector<8x192xf32>
    %651 = arith.mulf %650, %649 : vector<8x192xf32>
    %652 = math.tanh %651 : vector<8x192xf32>
    %cst_239 = arith.constant 5.000000e-01 : f32
    %653 = vector.broadcast %cst_239 : f32 to vector<8x192xf32>
    %654 = arith.mulf %653, %652 : vector<8x192xf32>
    %cst_240 = arith.constant 5.000000e-01 : f32
    %655 = vector.broadcast %cst_240 : f32 to vector<8x192xf32>
    %656 = arith.addf %654, %655 : vector<8x192xf32>
    %657 = vector.extract_strided_slice %656 {offsets = [0, 0], sizes = [8, 64], strides = [1, 1]} : vector<8x192xf32> to vector<8x64xf32>
    %658 = vector.extract_strided_slice %656 {offsets = [0, 64], sizes = [8, 64], strides = [1, 1]} : vector<8x192xf32> to vector<8x64xf32>
    %659 = vector.extract_strided_slice %656 {offsets = [0, 128], sizes = [8, 64], strides = [1, 1]} : vector<8x192xf32> to vector<8x64xf32>
    %660 = arith.mulf %658, %638 : vector<8x64xf32>
    %661 = vector.extract_strided_slice %648 {offsets = [0, 192], sizes = [8, 64], strides = [1, 1]} : vector<8x256xf32> to vector<8x64xf32>
    %662 = math.tanh %661 : vector<8x64xf32>
    %663 = arith.mulf %657, %662 : vector<8x64xf32>
    %664 = arith.addf %660, %663 : vector<8x64xf32>
    %665 = math.tanh %664 : vector<8x64xf32>
    %666 = arith.mulf %659, %665 : vector<8x64xf32>
    %667 = vector.extract_strided_slice %666 {offsets = [0, 0], sizes = [8, 32], strides = [1, 1]} : vector<8x64xf32> to vector<8x32xf32>
    %c56_241 = arith.constant 56 : index
    %c0_242 = arith.constant 0 : index
    %668 = vector.load %arg4[%c56_241, %c0_242] : memref<64x64xf32, #tpu.memory_space<vmem>>, vector<8x32xf32>
    tpu.vector_store %arg4[%c56_241, %c0_242], %667 {strides = array<i32>} : memref<64x64xf32, #tpu.memory_space<vmem>>, vector<8x32xf32>,
    %669 = vector.extract_strided_slice %666 {offsets = [0, 32], sizes = [8, 32], strides = [1, 1]} : vector<8x64xf32> to vector<8x32xf32>
    %c0_243 = arith.constant 0 : index
    %c32_244 = arith.constant 32 : index
    %670 = vector.load %arg4[%c0_243, %c32_244] : memref<64x64xf32, #tpu.memory_space<vmem>>, vector<8x32xf32>
    tpu.vector_store %arg4[%c0_243, %c32_244], %669 {strides = array<i32>} : memref<64x64xf32, #tpu.memory_space<vmem>>, vector<8x32xf32>,
    %c0_245 = arith.constant 0 : index
    %c0_246 = arith.constant 0 : index
    %671 = vector.load %arg4[%c0_245, %c0_246] : memref<64x64xf32, #tpu.memory_space<vmem>>, vector<64x64xf32>
    %672 = vector.extract_strided_slice %671 {offsets = [56, 0], sizes = [8, 64], strides = [1, 1]} : vector<64x64xf32> to vector<8x64xf32>
    %673 = vector.extract_strided_slice %671 {offsets = [48, 0], sizes = [8, 64], strides = [1, 1]} : vector<64x64xf32> to vector<8x64xf32>
    %674 = vector.extract_strided_slice %671 {offsets = [40, 0], sizes = [8, 64], strides = [1, 1]} : vector<64x64xf32> to vector<8x64xf32>
    %675 = vector.extract_strided_slice %671 {offsets = [32, 0], sizes = [8, 64], strides = [1, 1]} : vector<64x64xf32> to vector<8x64xf32>
    %676 = vector.extract_strided_slice %671 {offsets = [24, 0], sizes = [8, 64], strides = [1, 1]} : vector<64x64xf32> to vector<8x64xf32>
    %677 = vector.extract_strided_slice %671 {offsets = [16, 0], sizes = [8, 64], strides = [1, 1]} : vector<64x64xf32> to vector<8x64xf32>
    %678 = vector.extract_strided_slice %671 {offsets = [8, 0], sizes = [8, 64], strides = [1, 1]} : vector<64x64xf32> to vector<8x64xf32>
    %679 = vector.extract_strided_slice %671 {offsets = [0, 0], sizes = [8, 64], strides = [1, 1]} : vector<64x64xf32> to vector<8x64xf32>
    %680 = tpu.concatenate %672, %673, %674, %675, %676, %677, %678, %679 in 0 : vector<8x64xf32>, vector<8x64xf32>, vector<8x64xf32>, vector<8x64xf32>, vector<8x64xf32>, vector<8x64xf32>, vector<8x64xf32>, vector<8x64xf32> -> vector<64x64xf32>
    %681 = tpu.concatenate %671, %680 in 1 : vector<64x64xf32>, vector<64x64xf32> -> vector<64x128xf32>
    %682 = arith.truncf %681 : vector<64x128xf32> to vector<64x128xbf16>
    %c752 = arith.constant 752 : index
    %c0_247 = arith.constant 0 : index
    %683 = vector.load %arg1[%c752, %c0_247] : memref<1008x256xbf16, #tpu.memory_space<vmem>>, vector<128x256xbf16>
    %cst_248 = arith.constant dense<0.000000e+00> : vector<64x256xf32>
    %684 = tpu.matmul %682, %683, %cst_248 {dimension_numbers = #tpu.dot_dimension_numbers<[1], [0], [0], [1], [0, 0, 1, 1], [], []>} : vector<64x128xbf16>, vector<128x256xbf16>, vector<64x256xf32> -> vector<64x256xf32>
    %c15 = arith.constant 15 : index
    %c0_249 = arith.constant 0 : index
    %685 = vector.load %arg2[%c15, %c0_249] : memref<17x256xf32, #tpu.memory_space<vmem>>, vector<1x256xf32>
    %686 = vector.broadcast %685 : vector<1x256xf32> to vector<64x256xf32>
    %687 = arith.addf %684, %686 : vector<64x256xf32>
    %c0_250 = arith.constant 0 : index
    %c0_251 = arith.constant 0 : index
    %688 = vector.load %arg6[%c0_250, %c0_251] : memref<64x256xf32, #tpu.memory_space<vmem>>, vector<64x256xf32>
    tpu.vector_store %arg6[%c0_250, %c0_251], %687 {strides = array<i32>} : memref<64x256xf32, #tpu.memory_space<vmem>>, vector<64x256xf32>,
    %c880 = arith.constant 880 : index
    %c0_252 = arith.constant 0 : index
    %689 = vector.load %arg1[%c880, %c0_252] : memref<1008x256xbf16, #tpu.memory_space<vmem>>, vector<64x256xbf16>
    %c0_253 = arith.constant 0 : index
    %c0_254 = arith.constant 0 : index
    %690 = vector.load %arg6[%c0_253, %c0_254] : memref<64x256xf32, #tpu.memory_space<vmem>>, vector<8x256xf32>
    %691 = arith.truncf %666 : vector<8x64xf32> to vector<8x64xbf16>
    %cst_255 = arith.constant dense<0.000000e+00> : vector<8x256xf32>
    %692 = tpu.matmul %691, %689, %cst_255 {dimension_numbers = #tpu.dot_dimension_numbers<[1], [0], [0], [1], [0, 0, 1, 1], [], []>} : vector<8x64xbf16>, vector<64x256xbf16>, vector<8x256xf32> -> vector<8x256xf32>
    %693 = arith.addf %690, %692 : vector<8x256xf32>
    %694 = vector.extract_strided_slice %693 {offsets = [0, 0], sizes = [8, 192], strides = [1, 1]} : vector<8x256xf32> to vector<8x192xf32>
    %cst_256 = arith.constant 5.000000e-01 : f32
    %695 = vector.broadcast %cst_256 : f32 to vector<8x192xf32>
    %696 = arith.mulf %695, %694 : vector<8x192xf32>
    %697 = math.tanh %696 : vector<8x192xf32>
    %cst_257 = arith.constant 5.000000e-01 : f32
    %698 = vector.broadcast %cst_257 : f32 to vector<8x192xf32>
    %699 = arith.mulf %698, %697 : vector<8x192xf32>
    %cst_258 = arith.constant 5.000000e-01 : f32
    %700 = vector.broadcast %cst_258 : f32 to vector<8x192xf32>
    %701 = arith.addf %699, %700 : vector<8x192xf32>
    %702 = vector.extract_strided_slice %701 {offsets = [0, 0], sizes = [8, 64], strides = [1, 1]} : vector<8x192xf32> to vector<8x64xf32>
    %703 = vector.extract_strided_slice %701 {offsets = [0, 64], sizes = [8, 64], strides = [1, 1]} : vector<8x192xf32> to vector<8x64xf32>
    %704 = vector.extract_strided_slice %701 {offsets = [0, 128], sizes = [8, 64], strides = [1, 1]} : vector<8x192xf32> to vector<8x64xf32>
    %705 = arith.mulf %703, %664 : vector<8x64xf32>
    %706 = vector.extract_strided_slice %693 {offsets = [0, 192], sizes = [8, 64], strides = [1, 1]} : vector<8x256xf32> to vector<8x64xf32>
    %707 = math.tanh %706 : vector<8x64xf32>
    %708 = arith.mulf %702, %707 : vector<8x64xf32>
    %709 = arith.addf %705, %708 : vector<8x64xf32>
    %710 = math.tanh %709 : vector<8x64xf32>
    %711 = arith.mulf %704, %710 : vector<8x64xf32>
    %712 = vector.extract_strided_slice %711 {offsets = [0, 0], sizes = [8, 32], strides = [1, 1]} : vector<8x64xf32> to vector<8x32xf32>
    %c0_259 = arith.constant 0 : index
    %c0_260 = arith.constant 0 : index
    %713 = vector.load %arg4[%c0_259, %c0_260] : memref<64x64xf32, #tpu.memory_space<vmem>>, vector<8x32xf32>
    tpu.vector_store %arg4[%c0_259, %c0_260], %712 {strides = array<i32>} : memref<64x64xf32, #tpu.memory_space<vmem>>, vector<8x32xf32>,
    %714 = vector.extract_strided_slice %711 {offsets = [0, 32], sizes = [8, 32], strides = [1, 1]} : vector<8x64xf32> to vector<8x32xf32>
    %c56_261 = arith.constant 56 : index
    %c32_262 = arith.constant 32 : index
    %715 = vector.load %arg4[%c56_261, %c32_262] : memref<64x64xf32, #tpu.memory_space<vmem>>, vector<8x32xf32>
    tpu.vector_store %arg4[%c56_261, %c32_262], %714 {strides = array<i32>} : memref<64x64xf32, #tpu.memory_space<vmem>>, vector<8x32xf32>,
    %c8_263 = arith.constant 8 : index
    %c0_264 = arith.constant 0 : index
    %716 = vector.load %arg6[%c8_263, %c0_264] : memref<64x256xf32, #tpu.memory_space<vmem>>, vector<8x256xf32>
    %717 = arith.truncf %711 : vector<8x64xf32> to vector<8x64xbf16>
    %cst_265 = arith.constant dense<0.000000e+00> : vector<8x256xf32>
    %718 = tpu.matmul %717, %689, %cst_265 {dimension_numbers = #tpu.dot_dimension_numbers<[1], [0], [0], [1], [0, 0, 1, 1], [], []>} : vector<8x64xbf16>, vector<64x256xbf16>, vector<8x256xf32> -> vector<8x256xf32>
    %719 = arith.addf %716, %718 : vector<8x256xf32>
    %720 = vector.extract_strided_slice %719 {offsets = [0, 0], sizes = [8, 192], strides = [1, 1]} : vector<8x256xf32> to vector<8x192xf32>
    %cst_266 = arith.constant 5.000000e-01 : f32
    %721 = vector.broadcast %cst_266 : f32 to vector<8x192xf32>
    %722 = arith.mulf %721, %720 : vector<8x192xf32>
    %723 = math.tanh %722 : vector<8x192xf32>
    %cst_267 = arith.constant 5.000000e-01 : f32
    %724 = vector.broadcast %cst_267 : f32 to vector<8x192xf32>
    %725 = arith.mulf %724, %723 : vector<8x192xf32>
    %cst_268 = arith.constant 5.000000e-01 : f32
    %726 = vector.broadcast %cst_268 : f32 to vector<8x192xf32>
    %727 = arith.addf %725, %726 : vector<8x192xf32>
    %728 = vector.extract_strided_slice %727 {offsets = [0, 0], sizes = [8, 64], strides = [1, 1]} : vector<8x192xf32> to vector<8x64xf32>
    %729 = vector.extract_strided_slice %727 {offsets = [0, 64], sizes = [8, 64], strides = [1, 1]} : vector<8x192xf32> to vector<8x64xf32>
    %730 = vector.extract_strided_slice %727 {offsets = [0, 128], sizes = [8, 64], strides = [1, 1]} : vector<8x192xf32> to vector<8x64xf32>
    %731 = arith.mulf %729, %709 : vector<8x64xf32>
    %732 = vector.extract_strided_slice %719 {offsets = [0, 192], sizes = [8, 64], strides = [1, 1]} : vector<8x256xf32> to vector<8x64xf32>
    %733 = math.tanh %732 : vector<8x64xf32>
    %734 = arith.mulf %728, %733 : vector<8x64xf32>
    %735 = arith.addf %731, %734 : vector<8x64xf32>
    %736 = math.tanh %735 : vector<8x64xf32>
    %737 = arith.mulf %730, %736 : vector<8x64xf32>
    %738 = vector.extract_strided_slice %737 {offsets = [0, 0], sizes = [8, 32], strides = [1, 1]} : vector<8x64xf32> to vector<8x32xf32>
    %c8_269 = arith.constant 8 : index
    %c0_270 = arith.constant 0 : index
    %739 = vector.load %arg4[%c8_269, %c0_270] : memref<64x64xf32, #tpu.memory_space<vmem>>, vector<8x32xf32>
    tpu.vector_store %arg4[%c8_269, %c0_270], %738 {strides = array<i32>} : memref<64x64xf32, #tpu.memory_space<vmem>>, vector<8x32xf32>,
    %740 = vector.extract_strided_slice %737 {offsets = [0, 32], sizes = [8, 32], strides = [1, 1]} : vector<8x64xf32> to vector<8x32xf32>
    %c48_271 = arith.constant 48 : index
    %c32_272 = arith.constant 32 : index
    %741 = vector.load %arg4[%c48_271, %c32_272] : memref<64x64xf32, #tpu.memory_space<vmem>>, vector<8x32xf32>
    tpu.vector_store %arg4[%c48_271, %c32_272], %740 {strides = array<i32>} : memref<64x64xf32, #tpu.memory_space<vmem>>, vector<8x32xf32>,
    %c16_273 = arith.constant 16 : index
    %c0_274 = arith.constant 0 : index
    %742 = vector.load %arg6[%c16_273, %c0_274] : memref<64x256xf32, #tpu.memory_space<vmem>>, vector<8x256xf32>
    %743 = arith.truncf %737 : vector<8x64xf32> to vector<8x64xbf16>
    %cst_275 = arith.constant dense<0.000000e+00> : vector<8x256xf32>
    %744 = tpu.matmul %743, %689, %cst_275 {dimension_numbers = #tpu.dot_dimension_numbers<[1], [0], [0], [1], [0, 0, 1, 1], [], []>} : vector<8x64xbf16>, vector<64x256xbf16>, vector<8x256xf32> -> vector<8x256xf32>
    %745 = arith.addf %742, %744 : vector<8x256xf32>
    %746 = vector.extract_strided_slice %745 {offsets = [0, 0], sizes = [8, 192], strides = [1, 1]} : vector<8x256xf32> to vector<8x192xf32>
    %cst_276 = arith.constant 5.000000e-01 : f32
    %747 = vector.broadcast %cst_276 : f32 to vector<8x192xf32>
    %748 = arith.mulf %747, %746 : vector<8x192xf32>
    %749 = math.tanh %748 : vector<8x192xf32>
    %cst_277 = arith.constant 5.000000e-01 : f32
    %750 = vector.broadcast %cst_277 : f32 to vector<8x192xf32>
    %751 = arith.mulf %750, %749 : vector<8x192xf32>
    %cst_278 = arith.constant 5.000000e-01 : f32
    %752 = vector.broadcast %cst_278 : f32 to vector<8x192xf32>
    %753 = arith.addf %751, %752 : vector<8x192xf32>
    %754 = vector.extract_strided_slice %753 {offsets = [0, 0], sizes = [8, 64], strides = [1, 1]} : vector<8x192xf32> to vector<8x64xf32>
    %755 = vector.extract_strided_slice %753 {offsets = [0, 64], sizes = [8, 64], strides = [1, 1]} : vector<8x192xf32> to vector<8x64xf32>
    %756 = vector.extract_strided_slice %753 {offsets = [0, 128], sizes = [8, 64], strides = [1, 1]} : vector<8x192xf32> to vector<8x64xf32>
    %757 = arith.mulf %755, %735 : vector<8x64xf32>
    %758 = vector.extract_strided_slice %745 {offsets = [0, 192], sizes = [8, 64], strides = [1, 1]} : vector<8x256xf32> to vector<8x64xf32>
    %759 = math.tanh %758 : vector<8x64xf32>
    %760 = arith.mulf %754, %759 : vector<8x64xf32>
    %761 = arith.addf %757, %760 : vector<8x64xf32>
    %762 = math.tanh %761 : vector<8x64xf32>
    %763 = arith.mulf %756, %762 : vector<8x64xf32>
    %764 = vector.extract_strided_slice %763 {offsets = [0, 0], sizes = [8, 32], strides = [1, 1]} : vector<8x64xf32> to vector<8x32xf32>
    %c16_279 = arith.constant 16 : index
    %c0_280 = arith.constant 0 : index
    %765 = vector.load %arg4[%c16_279, %c0_280] : memref<64x64xf32, #tpu.memory_space<vmem>>, vector<8x32xf32>
    tpu.vector_store %arg4[%c16_279, %c0_280], %764 {strides = array<i32>} : memref<64x64xf32, #tpu.memory_space<vmem>>, vector<8x32xf32>,
    %766 = vector.extract_strided_slice %763 {offsets = [0, 32], sizes = [8, 32], strides = [1, 1]} : vector<8x64xf32> to vector<8x32xf32>
    %c40_281 = arith.constant 40 : index
    %c32_282 = arith.constant 32 : index
    %767 = vector.load %arg4[%c40_281, %c32_282] : memref<64x64xf32, #tpu.memory_space<vmem>>, vector<8x32xf32>
    tpu.vector_store %arg4[%c40_281, %c32_282], %766 {strides = array<i32>} : memref<64x64xf32, #tpu.memory_space<vmem>>, vector<8x32xf32>,
    %c24_283 = arith.constant 24 : index
    %c0_284 = arith.constant 0 : index
    %768 = vector.load %arg6[%c24_283, %c0_284] : memref<64x256xf32, #tpu.memory_space<vmem>>, vector<8x256xf32>
    %769 = arith.truncf %763 : vector<8x64xf32> to vector<8x64xbf16>
    %cst_285 = arith.constant dense<0.000000e+00> : vector<8x256xf32>
    %770 = tpu.matmul %769, %689, %cst_285 {dimension_numbers = #tpu.dot_dimension_numbers<[1], [0], [0], [1], [0, 0, 1, 1], [], []>} : vector<8x64xbf16>, vector<64x256xbf16>, vector<8x256xf32> -> vector<8x256xf32>
    %771 = arith.addf %768, %770 : vector<8x256xf32>
    %772 = vector.extract_strided_slice %771 {offsets = [0, 0], sizes = [8, 192], strides = [1, 1]} : vector<8x256xf32> to vector<8x192xf32>
    %cst_286 = arith.constant 5.000000e-01 : f32
    %773 = vector.broadcast %cst_286 : f32 to vector<8x192xf32>
    %774 = arith.mulf %773, %772 : vector<8x192xf32>
    %775 = math.tanh %774 : vector<8x192xf32>
    %cst_287 = arith.constant 5.000000e-01 : f32
    %776 = vector.broadcast %cst_287 : f32 to vector<8x192xf32>
    %777 = arith.mulf %776, %775 : vector<8x192xf32>
    %cst_288 = arith.constant 5.000000e-01 : f32
    %778 = vector.broadcast %cst_288 : f32 to vector<8x192xf32>
    %779 = arith.addf %777, %778 : vector<8x192xf32>
    %780 = vector.extract_strided_slice %779 {offsets = [0, 0], sizes = [8, 64], strides = [1, 1]} : vector<8x192xf32> to vector<8x64xf32>
    %781 = vector.extract_strided_slice %779 {offsets = [0, 64], sizes = [8, 64], strides = [1, 1]} : vector<8x192xf32> to vector<8x64xf32>
    %782 = vector.extract_strided_slice %779 {offsets = [0, 128], sizes = [8, 64], strides = [1, 1]} : vector<8x192xf32> to vector<8x64xf32>
    %783 = arith.mulf %781, %761 : vector<8x64xf32>
    %784 = vector.extract_strided_slice %771 {offsets = [0, 192], sizes = [8, 64], strides = [1, 1]} : vector<8x256xf32> to vector<8x64xf32>
    %785 = math.tanh %784 : vector<8x64xf32>
    %786 = arith.mulf %780, %785 : vector<8x64xf32>
    %787 = arith.addf %783, %786 : vector<8x64xf32>
    %788 = math.tanh %787 : vector<8x64xf32>
    %789 = arith.mulf %782, %788 : vector<8x64xf32>
    %790 = vector.extract_strided_slice %789 {offsets = [0, 0], sizes = [8, 32], strides = [1, 1]} : vector<8x64xf32> to vector<8x32xf32>
    %c24_289 = arith.constant 24 : index
    %c0_290 = arith.constant 0 : index
    %791 = vector.load %arg4[%c24_289, %c0_290] : memref<64x64xf32, #tpu.memory_space<vmem>>, vector<8x32xf32>
    tpu.vector_store %arg4[%c24_289, %c0_290], %790 {strides = array<i32>} : memref<64x64xf32, #tpu.memory_space<vmem>>, vector<8x32xf32>,
    %792 = vector.extract_strided_slice %789 {offsets = [0, 32], sizes = [8, 32], strides = [1, 1]} : vector<8x64xf32> to vector<8x32xf32>
    %c32_291 = arith.constant 32 : index
    %c32_292 = arith.constant 32 : index
    %793 = vector.load %arg4[%c32_291, %c32_292] : memref<64x64xf32, #tpu.memory_space<vmem>>, vector<8x32xf32>
    tpu.vector_store %arg4[%c32_291, %c32_292], %792 {strides = array<i32>} : memref<64x64xf32, #tpu.memory_space<vmem>>, vector<8x32xf32>,
    %c32_293 = arith.constant 32 : index
    %c0_294 = arith.constant 0 : index
    %794 = vector.load %arg6[%c32_293, %c0_294] : memref<64x256xf32, #tpu.memory_space<vmem>>, vector<8x256xf32>
    %795 = arith.truncf %789 : vector<8x64xf32> to vector<8x64xbf16>
    %cst_295 = arith.constant dense<0.000000e+00> : vector<8x256xf32>
    %796 = tpu.matmul %795, %689, %cst_295 {dimension_numbers = #tpu.dot_dimension_numbers<[1], [0], [0], [1], [0, 0, 1, 1], [], []>} : vector<8x64xbf16>, vector<64x256xbf16>, vector<8x256xf32> -> vector<8x256xf32>
    %797 = arith.addf %794, %796 : vector<8x256xf32>
    %798 = vector.extract_strided_slice %797 {offsets = [0, 0], sizes = [8, 192], strides = [1, 1]} : vector<8x256xf32> to vector<8x192xf32>
    %cst_296 = arith.constant 5.000000e-01 : f32
    %799 = vector.broadcast %cst_296 : f32 to vector<8x192xf32>
    %800 = arith.mulf %799, %798 : vector<8x192xf32>
    %801 = math.tanh %800 : vector<8x192xf32>
    %cst_297 = arith.constant 5.000000e-01 : f32
    %802 = vector.broadcast %cst_297 : f32 to vector<8x192xf32>
    %803 = arith.mulf %802, %801 : vector<8x192xf32>
    %cst_298 = arith.constant 5.000000e-01 : f32
    %804 = vector.broadcast %cst_298 : f32 to vector<8x192xf32>
    %805 = arith.addf %803, %804 : vector<8x192xf32>
    %806 = vector.extract_strided_slice %805 {offsets = [0, 0], sizes = [8, 64], strides = [1, 1]} : vector<8x192xf32> to vector<8x64xf32>
    %807 = vector.extract_strided_slice %805 {offsets = [0, 64], sizes = [8, 64], strides = [1, 1]} : vector<8x192xf32> to vector<8x64xf32>
    %808 = vector.extract_strided_slice %805 {offsets = [0, 128], sizes = [8, 64], strides = [1, 1]} : vector<8x192xf32> to vector<8x64xf32>
    %809 = arith.mulf %807, %787 : vector<8x64xf32>
    %810 = vector.extract_strided_slice %797 {offsets = [0, 192], sizes = [8, 64], strides = [1, 1]} : vector<8x256xf32> to vector<8x64xf32>
    %811 = math.tanh %810 : vector<8x64xf32>
    %812 = arith.mulf %806, %811 : vector<8x64xf32>
    %813 = arith.addf %809, %812 : vector<8x64xf32>
    %814 = math.tanh %813 : vector<8x64xf32>
    %815 = arith.mulf %808, %814 : vector<8x64xf32>
    %816 = vector.extract_strided_slice %815 {offsets = [0, 0], sizes = [8, 32], strides = [1, 1]} : vector<8x64xf32> to vector<8x32xf32>
    %c32_299 = arith.constant 32 : index
    %c0_300 = arith.constant 0 : index
    %817 = vector.load %arg4[%c32_299, %c0_300] : memref<64x64xf32, #tpu.memory_space<vmem>>, vector<8x32xf32>
    tpu.vector_store %arg4[%c32_299, %c0_300], %816 {strides = array<i32>} : memref<64x64xf32, #tpu.memory_space<vmem>>, vector<8x32xf32>,
    %818 = vector.extract_strided_slice %815 {offsets = [0, 32], sizes = [8, 32], strides = [1, 1]} : vector<8x64xf32> to vector<8x32xf32>
    %c24_301 = arith.constant 24 : index
    %c32_302 = arith.constant 32 : index
    %819 = vector.load %arg4[%c24_301, %c32_302] : memref<64x64xf32, #tpu.memory_space<vmem>>, vector<8x32xf32>
    tpu.vector_store %arg4[%c24_301, %c32_302], %818 {strides = array<i32>} : memref<64x64xf32, #tpu.memory_space<vmem>>, vector<8x32xf32>,
    %c40_303 = arith.constant 40 : index
    %c0_304 = arith.constant 0 : index
    %820 = vector.load %arg6[%c40_303, %c0_304] : memref<64x256xf32, #tpu.memory_space<vmem>>, vector<8x256xf32>
    %821 = arith.truncf %815 : vector<8x64xf32> to vector<8x64xbf16>
    %cst_305 = arith.constant dense<0.000000e+00> : vector<8x256xf32>
    %822 = tpu.matmul %821, %689, %cst_305 {dimension_numbers = #tpu.dot_dimension_numbers<[1], [0], [0], [1], [0, 0, 1, 1], [], []>} : vector<8x64xbf16>, vector<64x256xbf16>, vector<8x256xf32> -> vector<8x256xf32>
    %823 = arith.addf %820, %822 : vector<8x256xf32>
    %824 = vector.extract_strided_slice %823 {offsets = [0, 0], sizes = [8, 192], strides = [1, 1]} : vector<8x256xf32> to vector<8x192xf32>
    %cst_306 = arith.constant 5.000000e-01 : f32
    %825 = vector.broadcast %cst_306 : f32 to vector<8x192xf32>
    %826 = arith.mulf %825, %824 : vector<8x192xf32>
    %827 = math.tanh %826 : vector<8x192xf32>
    %cst_307 = arith.constant 5.000000e-01 : f32
    %828 = vector.broadcast %cst_307 : f32 to vector<8x192xf32>
    %829 = arith.mulf %828, %827 : vector<8x192xf32>
    %cst_308 = arith.constant 5.000000e-01 : f32
    %830 = vector.broadcast %cst_308 : f32 to vector<8x192xf32>
    %831 = arith.addf %829, %830 : vector<8x192xf32>
    %832 = vector.extract_strided_slice %831 {offsets = [0, 0], sizes = [8, 64], strides = [1, 1]} : vector<8x192xf32> to vector<8x64xf32>
    %833 = vector.extract_strided_slice %831 {offsets = [0, 64], sizes = [8, 64], strides = [1, 1]} : vector<8x192xf32> to vector<8x64xf32>
    %834 = vector.extract_strided_slice %831 {offsets = [0, 128], sizes = [8, 64], strides = [1, 1]} : vector<8x192xf32> to vector<8x64xf32>
    %835 = arith.mulf %833, %813 : vector<8x64xf32>
    %836 = vector.extract_strided_slice %823 {offsets = [0, 192], sizes = [8, 64], strides = [1, 1]} : vector<8x256xf32> to vector<8x64xf32>
    %837 = math.tanh %836 : vector<8x64xf32>
    %838 = arith.mulf %832, %837 : vector<8x64xf32>
    %839 = arith.addf %835, %838 : vector<8x64xf32>
    %840 = math.tanh %839 : vector<8x64xf32>
    %841 = arith.mulf %834, %840 : vector<8x64xf32>
    %842 = vector.extract_strided_slice %841 {offsets = [0, 0], sizes = [8, 32], strides = [1, 1]} : vector<8x64xf32> to vector<8x32xf32>
    %c40_309 = arith.constant 40 : index
    %c0_310 = arith.constant 0 : index
    %843 = vector.load %arg4[%c40_309, %c0_310] : memref<64x64xf32, #tpu.memory_space<vmem>>, vector<8x32xf32>
    tpu.vector_store %arg4[%c40_309, %c0_310], %842 {strides = array<i32>} : memref<64x64xf32, #tpu.memory_space<vmem>>, vector<8x32xf32>,
    %844 = vector.extract_strided_slice %841 {offsets = [0, 32], sizes = [8, 32], strides = [1, 1]} : vector<8x64xf32> to vector<8x32xf32>
    %c16_311 = arith.constant 16 : index
    %c32_312 = arith.constant 32 : index
    %845 = vector.load %arg4[%c16_311, %c32_312] : memref<64x64xf32, #tpu.memory_space<vmem>>, vector<8x32xf32>
    tpu.vector_store %arg4[%c16_311, %c32_312], %844 {strides = array<i32>} : memref<64x64xf32, #tpu.memory_space<vmem>>, vector<8x32xf32>,
    %c48_313 = arith.constant 48 : index
    %c0_314 = arith.constant 0 : index
    %846 = vector.load %arg6[%c48_313, %c0_314] : memref<64x256xf32, #tpu.memory_space<vmem>>, vector<8x256xf32>
    %847 = arith.truncf %841 : vector<8x64xf32> to vector<8x64xbf16>
    %cst_315 = arith.constant dense<0.000000e+00> : vector<8x256xf32>
    %848 = tpu.matmul %847, %689, %cst_315 {dimension_numbers = #tpu.dot_dimension_numbers<[1], [0], [0], [1], [0, 0, 1, 1], [], []>} : vector<8x64xbf16>, vector<64x256xbf16>, vector<8x256xf32> -> vector<8x256xf32>
    %849 = arith.addf %846, %848 : vector<8x256xf32>
    %850 = vector.extract_strided_slice %849 {offsets = [0, 0], sizes = [8, 192], strides = [1, 1]} : vector<8x256xf32> to vector<8x192xf32>
    %cst_316 = arith.constant 5.000000e-01 : f32
    %851 = vector.broadcast %cst_316 : f32 to vector<8x192xf32>
    %852 = arith.mulf %851, %850 : vector<8x192xf32>
    %853 = math.tanh %852 : vector<8x192xf32>
    %cst_317 = arith.constant 5.000000e-01 : f32
    %854 = vector.broadcast %cst_317 : f32 to vector<8x192xf32>
    %855 = arith.mulf %854, %853 : vector<8x192xf32>
    %cst_318 = arith.constant 5.000000e-01 : f32
    %856 = vector.broadcast %cst_318 : f32 to vector<8x192xf32>
    %857 = arith.addf %855, %856 : vector<8x192xf32>
    %858 = vector.extract_strided_slice %857 {offsets = [0, 0], sizes = [8, 64], strides = [1, 1]} : vector<8x192xf32> to vector<8x64xf32>
    %859 = vector.extract_strided_slice %857 {offsets = [0, 64], sizes = [8, 64], strides = [1, 1]} : vector<8x192xf32> to vector<8x64xf32>
    %860 = vector.extract_strided_slice %857 {offsets = [0, 128], sizes = [8, 64], strides = [1, 1]} : vector<8x192xf32> to vector<8x64xf32>
    %861 = arith.mulf %859, %839 : vector<8x64xf32>
    %862 = vector.extract_strided_slice %849 {offsets = [0, 192], sizes = [8, 64], strides = [1, 1]} : vector<8x256xf32> to vector<8x64xf32>
    %863 = math.tanh %862 : vector<8x64xf32>
    %864 = arith.mulf %858, %863 : vector<8x64xf32>
    %865 = arith.addf %861, %864 : vector<8x64xf32>
    %866 = math.tanh %865 : vector<8x64xf32>
    %867 = arith.mulf %860, %866 : vector<8x64xf32>
    %868 = vector.extract_strided_slice %867 {offsets = [0, 0], sizes = [8, 32], strides = [1, 1]} : vector<8x64xf32> to vector<8x32xf32>
    %c48_319 = arith.constant 48 : index
    %c0_320 = arith.constant 0 : index
    %869 = vector.load %arg4[%c48_319, %c0_320] : memref<64x64xf32, #tpu.memory_space<vmem>>, vector<8x32xf32>
    tpu.vector_store %arg4[%c48_319, %c0_320], %868 {strides = array<i32>} : memref<64x64xf32, #tpu.memory_space<vmem>>, vector<8x32xf32>,
    %870 = vector.extract_strided_slice %867 {offsets = [0, 32], sizes = [8, 32], strides = [1, 1]} : vector<8x64xf32> to vector<8x32xf32>
    %c8_321 = arith.constant 8 : index
    %c32_322 = arith.constant 32 : index
    %871 = vector.load %arg4[%c8_321, %c32_322] : memref<64x64xf32, #tpu.memory_space<vmem>>, vector<8x32xf32>
    tpu.vector_store %arg4[%c8_321, %c32_322], %870 {strides = array<i32>} : memref<64x64xf32, #tpu.memory_space<vmem>>, vector<8x32xf32>,
    %c56_323 = arith.constant 56 : index
    %c0_324 = arith.constant 0 : index
    %872 = vector.load %arg6[%c56_323, %c0_324] : memref<64x256xf32, #tpu.memory_space<vmem>>, vector<8x256xf32>
    %873 = arith.truncf %867 : vector<8x64xf32> to vector<8x64xbf16>
    %cst_325 = arith.constant dense<0.000000e+00> : vector<8x256xf32>
    %874 = tpu.matmul %873, %689, %cst_325 {dimension_numbers = #tpu.dot_dimension_numbers<[1], [0], [0], [1], [0, 0, 1, 1], [], []>} : vector<8x64xbf16>, vector<64x256xbf16>, vector<8x256xf32> -> vector<8x256xf32>
    %875 = arith.addf %872, %874 : vector<8x256xf32>
    %876 = vector.extract_strided_slice %875 {offsets = [0, 0], sizes = [8, 192], strides = [1, 1]} : vector<8x256xf32> to vector<8x192xf32>
    %cst_326 = arith.constant 5.000000e-01 : f32
    %877 = vector.broadcast %cst_326 : f32 to vector<8x192xf32>
    %878 = arith.mulf %877, %876 : vector<8x192xf32>
    %879 = math.tanh %878 : vector<8x192xf32>
    %cst_327 = arith.constant 5.000000e-01 : f32
    %880 = vector.broadcast %cst_327 : f32 to vector<8x192xf32>
    %881 = arith.mulf %880, %879 : vector<8x192xf32>
    %cst_328 = arith.constant 5.000000e-01 : f32
    %882 = vector.broadcast %cst_328 : f32 to vector<8x192xf32>
    %883 = arith.addf %881, %882 : vector<8x192xf32>
    %884 = vector.extract_strided_slice %883 {offsets = [0, 0], sizes = [8, 64], strides = [1, 1]} : vector<8x192xf32> to vector<8x64xf32>
    %885 = vector.extract_strided_slice %883 {offsets = [0, 64], sizes = [8, 64], strides = [1, 1]} : vector<8x192xf32> to vector<8x64xf32>
    %886 = vector.extract_strided_slice %883 {offsets = [0, 128], sizes = [8, 64], strides = [1, 1]} : vector<8x192xf32> to vector<8x64xf32>
    %887 = arith.mulf %885, %865 : vector<8x64xf32>
    %888 = vector.extract_strided_slice %875 {offsets = [0, 192], sizes = [8, 64], strides = [1, 1]} : vector<8x256xf32> to vector<8x64xf32>
    %889 = math.tanh %888 : vector<8x64xf32>
    %890 = arith.mulf %884, %889 : vector<8x64xf32>
    %891 = arith.addf %887, %890 : vector<8x64xf32>
    %892 = math.tanh %891 : vector<8x64xf32>
    %893 = arith.mulf %886, %892 : vector<8x64xf32>
    %894 = vector.extract_strided_slice %893 {offsets = [0, 0], sizes = [8, 32], strides = [1, 1]} : vector<8x64xf32> to vector<8x32xf32>
    %c56_329 = arith.constant 56 : index
    %c0_330 = arith.constant 0 : index
    %895 = vector.load %arg4[%c56_329, %c0_330] : memref<64x64xf32, #tpu.memory_space<vmem>>, vector<8x32xf32>
    tpu.vector_store %arg4[%c56_329, %c0_330], %894 {strides = array<i32>} : memref<64x64xf32, #tpu.memory_space<vmem>>, vector<8x32xf32>,
    %896 = vector.extract_strided_slice %893 {offsets = [0, 32], sizes = [8, 32], strides = [1, 1]} : vector<8x64xf32> to vector<8x32xf32>
    %c0_331 = arith.constant 0 : index
    %c32_332 = arith.constant 32 : index
    %897 = vector.load %arg4[%c0_331, %c32_332] : memref<64x64xf32, #tpu.memory_space<vmem>>, vector<8x32xf32>
    tpu.vector_store %arg4[%c0_331, %c32_332], %896 {strides = array<i32>} : memref<64x64xf32, #tpu.memory_space<vmem>>, vector<8x32xf32>,
    %c0_333 = arith.constant 0 : index
    %c0_334 = arith.constant 0 : index
    %898 = vector.load %arg4[%c0_333, %c0_334] : memref<64x64xf32, #tpu.memory_space<vmem>>, vector<64x64xf32>
    %899 = arith.truncf %898 : vector<64x64xf32> to vector<64x64xbf16>
    %c944 = arith.constant 944 : index
    %c0_335 = arith.constant 0 : index
    %900 = vector.load %arg1[%c944, %c0_335] : memref<1008x256xbf16, #tpu.memory_space<vmem>>, vector<64x128xbf16>
    %cst_336 = arith.constant dense<0.000000e+00> : vector<64x128xf32>
    %901 = tpu.matmul %899, %900, %cst_336 {dimension_numbers = #tpu.dot_dimension_numbers<[1], [0], [0], [1], [0, 0, 1, 1], [], []>} : vector<64x64xbf16>, vector<64x128xbf16>, vector<64x128xf32> -> vector<64x128xf32>
    %c16_337 = arith.constant 16 : index
    %c0_338 = arith.constant 0 : index
    %902 = vector.load %arg2[%c16_337, %c0_338] : memref<17x256xf32, #tpu.memory_space<vmem>>, vector<1x128xf32>
    %903 = vector.broadcast %902 : vector<1x128xf32> to vector<64x128xf32>
    %904 = arith.addf %901, %903 : vector<64x128xf32>
    %c0_339 = arith.constant 0 : index
    %c0_340 = arith.constant 0 : index
    %905 = vector.load %arg3[%c0_339, %c0_340] : memref<64x128xf32, #tpu.memory_space<vmem>>, vector<64x128xf32>
    tpu.vector_store %arg3[%c0_339, %c0_340], %904 {strides = array<i32>} : memref<64x128xf32, #tpu.memory_space<vmem>>, vector<64x128xf32>,
    return
  }
}

</mosaic_0001>

<bundles_post_ra>
// kernel: cbhg_model_forward.1
= control target key start
LH: loop header
LB: loop body
LE: loop exit
PB: predicated region body
PF: predicated region fallthrough
CT: control target
= control target key end

     0   :  { %8 = vsyncpa [#allocation6], 0  ;;  %s5691_s12 = smov [#allocation5]   ;;  %s7118_s0 = inlined_call_operand.vmem [shape: s32[64,1], index: 0, kind: input, shape index: {}]   ;;  %s7119_s1 = inlined_call_operand.hbm [shape: bf16[1008,256], index: 1, kind: input, shape index: {}]   ;;  %s7120_s2 = inlined_call_operand.vmem [shape: f32[17,256], index: 2, kind: input, shape index: {}]   ;;  %s7121_s3 = inlined_call_operand.vmem [shape: f32[64,128], index: 3, kind: output, shape index: {}]  }
   0x1   :  { %s16_s13 = sshll.u32 %s5691_s12, 4  ;;  %s5667_s16 = scalar_lea.hbm %s7119_s1, 16128  ;;  %s17_s13 = int_to_ptr.vmem [resolvable:$true] %s16_s13 }
   0x2   :  { %p5668_p0 = scmp.ne.s32.totalorder %s7119_s1, %s5667_s16  ;;  %p5671_p1 = scmp.lt.u32.totalorder %s5667_s16, %s7119_s1 }
   0x4   :  { %p5673_p2 = pnand %p5671_p1, %p5668_p0 }
   0x6   :  { %5676 = shalt.err (!%p5673_p2)
}
   0x7   :  { %s5677_s21 = scalar_lea.vmem %s17_s13, 16128  ;;  %p5682_p4 = scmp.lt.s32.totalorder %s17_s13, %s17_s13 }
   0x8   :  { %p5678_p3 = scmp.ne.s32.totalorder %s17_s13, %s5677_s21  ;;  %p5683_p5 = scmp.lt.s32.totalorder %s5677_s21, %s5677_s21 }
   0xa   :  { %p5684_p6 = por %p5683_p5, %p5682_p4 }
   0xc   :  { %p5685_p7 = pnand %p5684_p6, %p5678_p3 }
   0xe   :  { %5688 = shalt.err (!%p5685_p7)
}
   0xf   :  { %s5692_s22 = smov 128   ;;  %s5693_s23 = smov 8  }
  0x10   :  { %22 = dma.hbm_to_vmem [thread:$0]  %s7119_s1, 16128, %s17_s13, [#allocation6], %s5692_s22, %s5692_s22, %s5693_s23  }
  0x11   :  { %5689 = dma.done.wait [#allocation6], 16128  }
  0x12   :  { %5690 = vsyncadd [#allocation6], 4294951168  ;;  %v5694_v0 = vmov 0   ;;  %v31_v1 = vld [vmem:[%s7118_s0 + $0x10] sm:$0xff]  ;;  %v29_v2 = vld [vmem:[%s7118_s0] sm:$0xff]  ;;  %v37_v12 = vlaneseq  ;;  %vm99_vm4 = vcmask 261120  }
  0x13   :  { %5139 = vset.pattern.permute.xlu1 %v5694_v0  ;;  %5138 = vset.pattern.permute.xlu0 %v5694_v0  ;;  %v32_v3 = vld [vmem:[%s7118_s0 + $0x18] sm:$0xff]  ;;  %v30_v4 = vld [vmem:[%s7118_s0 + $0x8] sm:$0xff]  ;;  %v33_v7 = vld [vmem:[%s7118_s0 + $0x20] sm:$0xff]  ;;  %v5695_v18 = vmov 0.0   ;;  %s5696_s17 = smov 16   ;;  %s5697_s18 = smov 32  }
  0x14   :  { %46 = vperm.xlu1 %5139, %v31_v1   ;;  %40 = vperm.xlu0 %5138, %v29_v2   ;;  %v5320_v5 = vld [vmem:[#allocation5] ss:$8 sps:$4 sm:$0xff]   ;;  %v5321_v8 = vld [vmem:[#allocation5 + $0x10] ss:$8 sps:$4 sm:$0xff]   ;;  %v38_v13 = vand.u32 127, %v37_v12  ;;  %s5698_s19 = smov 48  }
  0x15   :  { %v34_v6 = vld [vmem:[%s7118_s0 + $0x28] sm:$0xff]  ;;  %5005 = vmatprep.subr.bf16.mxu0 %v5320_v5  ;;  %v36_v9 = vld [vmem:[%s7118_s0 + $0x38] sm:$0xff]  ;;  %v35_v10 = vld [vmem:[%s7118_s0 + $0x30] sm:$0xff]  ;;  %vm470_vm9 = vcmask 130048   ;;  %vm487_vm10 = vcmask 392192   ;;  %vm532_vm11 = vcmask 523264  }
  0x16   :  { %5006 = vmatpush3.bf16.msra.mxu0 %v5320_v5  ;;  %v5322_v11 = vld [vmem:[#allocation5 + $0x20] ss:$8 sps:$4 sm:$0xff]   ;;  %v5323_v35 = vld [vmem:[#allocation5 + $0x30] ss:$8 sps:$4 sm:$0xff]   ;;  %s5699_s24 = smov 64   ;;  %vm4812_vm12 = vmneg %vm532_vm11  ;;  %vm5700_vm13 = vmmov 1  }
  0x17   :  { %5007 = vmatprep.subr.bf16.mxu0 %v5321_v8  ;;  %5017 = vmatprep.subr.bf16.mxu1 %v5322_v11  ;;  %v5324_v36 = vld [vmem:[#allocation5 + $0x40] ss:$8 sps:$4 sm:$0xff]   ;;  %v5325_v49 = vld [vmem:[#allocation5 + $0x50] ss:$8 sps:$4 sm:$0xff]   ;;  %vm4813_vm14 = vmpackc.low %vm5700_vm13, %vm4812_vm12  ;;  %s5701_s7 = smov 112   ;;  %vm2308_vm15 = vcmask 523520  }
  0x18   :  { %49 = vperm.xlu1 %5139, %v32_v3   ;;  %43 = vperm.xlu0 %5138, %v30_v4   ;;  %v185_v50 = vld [vmem:[%s7120_s2] ss:$0 sm:$0xff] }
  0x19   :  { %5018 = vmatpush3.bf16.msra.mxu1 %v5322_v11 }
  0x1a   :  { %5008 = vmatpush3.bf16.msra.mxu0 %v5321_v8  ;;  %5019 = vmatprep.subr.bf16.mxu1 %v5323_v35 }
  0x1b   :  { %5029 = vmatprep.subr.bf16.mxu0 %v5324_v36 }
  0x1c   :  { %55 = vperm.xlu1 %5139, %v34_v6   ;;  %52 = vperm.xlu0 %5138, %v33_v7  }
  0x1d   :  { %5020 = vmatpush3.bf16.msra.mxu1 %v5323_v35 }
  0x20   :  { %61 = vperm.xlu1 %5139, %v36_v9   ;;  %58 = vperm.xlu0 %5138, %v35_v10  }
  0x93   :  { %v47_v14 = vpop.permute.xlu1 %46  ;;  %v41_v15 = vpop.permute.xlu0 %40 }
  0x94   :  { %vm65_vm0 = vcmp.eq.s32.totalorder %v38_v13, %v47_v14  ;;  %vm63_vm1 = vcmp.eq.s32.totalorder %v38_v13, %v41_v15 }
  0x95   :  { %v73_v19 = vsel %vm65_vm0, 1.0, %v5695_v18  ;;  %v71_v21 = vsel %vm63_vm1, 1.0, %v5695_v18 }
  0x97   :  { %v50_v16 = vpop.permute.xlu1 %49  ;;  %v44_v17 = vpop.permute.xlu0 %43 }
  0x98   :  { %vm66_vm2 = vcmp.eq.s32.totalorder %v38_v13, %v50_v16  ;;  %vm64_vm3 = vcmp.eq.s32.totalorder %v38_v13, %v44_v17  ;;  %v5326_v17 = vld [vmem:[#allocation5 + $0x60] ss:$8 sps:$4 sm:$0xff]  }
  0x99   :  { %v74_v20 = vsel %vm66_vm2, 1.0, %v5695_v18  ;;  %v72_v22 = vsel %vm64_vm3, 1.0, %v5695_v18  ;;  %5041 = vmatprep.subr.bf16.mxu1 %v5326_v17 }
  0x9a   :  { %v80_v23 = vpack.c.bf16 %v74_v20, %v73_v19  ;;  %v79_v24 = vpack.c.bf16 %v72_v22, %v71_v21  ;;  %v5327_v19 = vld [vmem:[#allocation5 + $0x70] ss:$8 sps:$4 sm:$0xff]   ;;  %v291_v20 = vld [vmem:[%s7120_s2 + $0x1] ss:$0 sm:$0xff] }
  0x9b   :  { %v56_v25 = vpop.permute.xlu1 %55  ;;  %v53_v26 = vpop.permute.xlu0 %52  ;;  %v5328_v21 = vld [vmem:[#allocation5 + $0x80] ss:$8 sps:$4 sm:$0xff]  }
  0x9c   :  { %vm68_vm5 = vcmp.eq.s32.totalorder %v38_v13, %v56_v25  ;;  %vm67_vm6 = vcmp.eq.s32.totalorder %v38_v13, %v53_v26  ;;  %5009 = vmatprep.mubr.msk.bf16.mxu0 %vm99_vm4, %v79_v24 }
  0x9d   :  { %v76_v27 = vsel %vm68_vm5, 1.0, %v5695_v18  ;;  %v75_v28 = vsel %vm67_vm6, 1.0, %v5695_v18  ;;  %5010 = vmatmul.mubr.msk.bf16.vlgmr.msra.gmra.mrb[0].mxu0 %vm99_vm4, %v80_v23 }
  0x9e   :  { %v81_v29 = vpack.c.bf16 %v76_v27, %v75_v28  ;;  %5030 = vmatpush3.bf16.msra.mxu0 %v5324_v36 }
  0x9f   :  { %v62_v30 = vpop.permute.xlu1 %61  ;;  %v59_v31 = vpop.permute.xlu0 %58  ;;  %5031 = vmatprep.subr.bf16.mxu0 %v5325_v49 }
  0xa0   :  { %vm70_vm7 = vcmp.eq.s32.totalorder %v38_v13, %v62_v30  ;;  %vm69_vm8 = vcmp.eq.s32.totalorder %v38_v13, %v59_v31  ;;  %5013 = vmatprep.mubr.msk.bf16.mxu0 %vm99_vm4, %v81_v29  ;;  %v5329_v29 = vld [vmem:[#allocation5 + $0x90] ss:$8 sps:$4 sm:$0xff]  }
  0xa1   :  { %v78_v32 = vsel %vm70_vm7, 1.0, %v5695_v18  ;;  %v77_v33 = vsel %vm69_vm8, 1.0, %v5695_v18 }
  0xa2   :  { %v82_v34 = vpack.c.bf16 %v78_v32, %v77_v33  ;;  %5032 = vmatpush3.bf16.msra.mxu0 %v5325_v49 }
  0xa3   :  { %800 = vmatprep.subr.bf16.mxu0 %v5694_v0 }
  0xa5   :  { %5014 = vmatmul.mubr.msk.bf16.gmra.mrb[4].mxu0 %vm99_vm4, %v82_v34 }
 0x170   :  { %v5011_v37 = vpop.f32.mrb[0].mxu0 }
 0x171   :  { %v146_v38 = vpop.f32.mrb[1].mxu0 }
 0x172   :  { %v5012_v39 = vpop.f32.mrb[2].mxu0 }
 0x173   :  { %v178_v40 = vpack.c.bf16 %v5012_v39, %v5011_v37  ;;  %v149_v41 = vpop.f32.mrb[3].mxu0 }
 0x174   :  { %v177_v42 = vpack.c.bf16 %v149_v41, %v146_v38 }
 0x176   :  { %5021 = vmatprep.mubr.msk.bf16.mxu1 %vm99_vm4, %v177_v42 }
 0x177   :  { %5022 = vmatmul.mubr.msk.bf16.vlgmr.msra.gmra.mrb[0].mxu1 %vm99_vm4, %v178_v40 }
 0x178   :  { %v5015_v43 = vpop.f32.mrb[4].mxu0  ;;  %5042 = vmatpush3.bf16.msra.mxu1 %v5326_v17 }
 0x179   :  { %v162_v44 = vpop.f32.mrb[5].mxu0  ;;  %5043 = vmatprep.subr.bf16.mxu1 %v5327_v19 }
 0x17a   :  { %v5016_v45 = vpop.f32.mrb[6].mxu0 }
 0x17b   :  { %v180_v46 = vpack.c.bf16 %v5016_v45, %v5015_v43  ;;  %v165_v47 = vpop.f32.mrb[7].mxu0 }
 0x17c   :  { %v179_v48 = vpack.c.bf16 %v165_v47, %v162_v44  ;;  %5044 = vmatpush3.bf16.msra.mxu1 %v5327_v19 }
 0x17d   :  { %5045 = vmatprep.subr.bf16.mxu1 %v5328_v21 }
 0x17e   :  { %5025 = vmatprep.mubr.msk.bf16.mxu1 %vm99_vm4, %v179_v48 }
 0x17f   :  { %5026 = vmatmul.mubr.msk.bf16.gmra.mrb[4].mxu1 %vm99_vm4, %v180_v46 }
 0x180   :  { %5046 = vmatpush3.bf16.msra.mxu1 %v5328_v21 }
 0x181   :  { %5047 = vmatprep.subr.bf16.mxu1 %v5329_v29 }
 0x184   :  { %5048 = vmatpush3.bf16.msra.mxu1 %v5329_v29 }
 0x24a   :  { %v5023_v51 = vpop.f32.mrb[0].mxu1 }
 0x24b   :  { %v253_v52 = vadd.f32 %v5023_v51, %v185_v50  ;;  %v244_v53 = vpop.f32.mrb[1].mxu1 }
 0x24c   :  { %v245_v54 = vadd.f32 %v244_v53, %v185_v50  ;;  %v5024_v55 = vpop.f32.mrb[2].mxu1 }
 0x24d   :  { %v256_v56 = vadd.f32 %v5024_v55, %v185_v50  ;;  %v247_v57 = vpop.f32.mrb[3].mxu1  ;;  %v277_v59 = vmax.f32 %v253_v52, 0.0 }
 0x24e   :  { %v248_v58 = vadd.f32 %v247_v57, %v185_v50  ;;  %v275_v61 = vmax.f32 %v245_v54, 0.0 }
 0x24f   :  { %v278_v60 = vmax.f32 %v256_v56, 0.0 }
 0x250   :  { %v276_v62 = vmax.f32 %v248_v58, 0.0 }
 0x251   :  { %v284_v63 = vpack.c.bf16 %v278_v60, %v277_v59 }
 0x252   :  { %v283_v1 = vpack.c.bf16 %v276_v62, %v275_v61  ;;  %v5027_v2 = vpop.f32.mrb[4].mxu1 }
 0x253   :  { %v269_v3 = vadd.f32 %v5027_v2, %v185_v50  ;;  %v260_v4 = vpop.f32.mrb[5].mxu1 }
 0x254   :  { %v261_v5 = vadd.f32 %v260_v4, %v185_v50  ;;  %v5028_v6 = vpop.f32.mrb[6].mxu1  ;;  %5033 = vmatprep.mubr.msk.bf16.mxu0 %vm99_vm4, %v283_v1 }
 0x255   :  { %v272_v7 = vadd.f32 %v5028_v6, %v185_v50  ;;  %v263_v8 = vpop.f32.mrb[7].mxu1  ;;  %5034 = vmatmul.mubr.msk.bf16.vlgmr.msra.gmra.mrb[8].mxu0 %vm99_vm4, %v284_v63  ;;  %v281_v10 = vmax.f32 %v269_v3, 0.0 }
 0x256   :  { %v264_v9 = vadd.f32 %v263_v8, %v185_v50  ;;  %v279_v13 = vmax.f32 %v261_v5, 0.0 }
 0x257   :  { %v282_v11 = vmax.f32 %v272_v7, 0.0 }
 0x258   :  { %v280_v14 = vmax.f32 %v264_v9, 0.0 }
 0x259   :  { %v286_v15 = vpack.c.bf16 %v282_v11, %v281_v10 }
 0x25a   :  { %v285_v16 = vpack.c.bf16 %v280_v14, %v279_v13 }
 0x25c   :  { %5037 = vmatprep.mubr.msk.bf16.mxu0 %vm99_vm4, %v285_v16 }
 0x25d   :  { %5038 = vmatmul.mubr.msk.bf16.gmra.mrb[12].mxu0 %vm99_vm4, %v286_v15 }
 0x328   :  { %v5035_v22 = vpop.f32.mrb[8].mxu0 }
 0x329   :  { %v359_v23 = vadd.f32 %v5035_v22, %v291_v20  ;;  %v350_v24 = vpop.f32.mrb[9].mxu0 }
 0x32a   :  { %v351_v25 = vadd.f32 %v350_v24, %v291_v20  ;;  %v5036_v26 = vpop.f32.mrb[10].mxu0 }
 0x32b   :  { %v362_v27 = vadd.f32 %v5036_v26, %v291_v20  ;;  %v353_v28 = vpop.f32.mrb[11].mxu0  ;;  %v5790_v32 = vmax.f32 %v359_v23, 0.0 }
 0x32c   :  { %v5788_v30 = vmax.f32 %v351_v25, 0.0  ;;  %v354_v31 = vadd.f32 %v353_v28, %v291_v20 }
 0x32d   :  { %v5792_v33 = vmax.f32 %v362_v27, 0.0 }
 0x32e   :  { %v5794_v34 = vmax.f32 %v354_v31, 0.0  ;;  %v5140_v35 = vpack.i.bf16 %v5788_v30, %v5695_v18 }
 0x32f   :  { %v5145_v36 = vpack.i.bf16 %v5792_v33, %v5790_v32 }
 0x330   :  { %5141 = vrot.lane.b32.xlu0 %v5140_v35, %s5696_s17  ;;  %v5039_v37 = vpop.f32.mrb[12].mxu0  ;;  %v5155_v41 = vpack.i.bf16 %v5794_v34, %v5788_v30  ;;  %v5150_v44 = vpack.i.bf16 %v5790_v32, %v5794_v34 }
 0x331   :  { %5146 = vrot.lane.b32.xlu1 %v5145_v36, %s5697_s18  ;;  %v366_v38 = vpop.f32.mrb[13].mxu0  ;;  %v375_v46 = vadd.f32 %v5039_v37, %v291_v20 }
 0x332   :  { %v367_v39 = vadd.f32 %v366_v38, %v291_v20  ;;  %v5040_v40 = vpop.f32.mrb[14].mxu0 }
 0x333   :  { %v378_v42 = vadd.f32 %v5040_v40, %v291_v20  ;;  %v369_v43 = vpop.f32.mrb[15].mxu0  ;;  %v5814_v50 = vmax.f32 %v375_v46, 0.0 }
 0x334   :  { %v5806_v45 = vmax.f32 %v367_v39, 0.0  ;;  %5156 = vrot.lane.b32.xlu0 %v5155_v41, %s5697_s18  ;;  %v370_v47 = vadd.f32 %v369_v43, %v291_v20 }
 0x335   :  { %5151 = vrot.lane.b32.xlu1 %v5150_v44, %s5696_s17  ;;  %v5812_v49 = vmax.f32 %v378_v42, 0.0 }
 0x336   :  { %v5165_v48 = vpack.i.bf16 %v5806_v45, %v5792_v33  ;;  %v5816_v51 = vmax.f32 %v370_v47, 0.0 }
 0x337   :  { %v5175_v52 = vpack.i.bf16 %v5812_v49, %v5814_v50  ;;  %v5195_v55 = vpack.i.bf16 %v5695_v18, %v5812_v49 }
 0x338   :  { %5161 = vrot.lane.b32.xlu0 %v5150_v44, %s5698_s19  ;;  %v5185_v53 = vpack.i.bf16 %v5816_v51, %v5806_v45  ;;  %v5180_v54 = vpack.i.bf16 %v5814_v50, %v5816_v51 }
 0x339   :  { %5166 = vrot.lane.b32.xlu1 %v5165_v48, %s5698_s19 }
 0x33c   :  { %5171 = vrot.lane.b32.xlu0 %v5165_v48, %s5696_s17 }
 0x33d   :  { %5176 = vrot.lane.b32.xlu1 %v5175_v52, %s5697_s18 }
 0x340   :  { %5186 = vrot.lane.b32.xlu0 %v5185_v53, %s5697_s18 }
 0x341   :  { %5181 = vrot.lane.b32.xlu1 %v5180_v54, %s5696_s17 }
 0x344   :  { %5191 = vrot.lane.b32.xlu0 %v5180_v54, %s5698_s19 }
 0x345   :  { %5196 = vrot.lane.b32.xlu1 %v5195_v55, %s5698_s19 }
 0x3a2   :  { %v5142_v56 = vpop.permute.xlu0 %5141 }
 0x3a3   :  { %v5147_v57 = vpop.permute.xlu1 %5146  ;;  %v5144_v59 = vunpack.i.h.bf16 %v5142_v56  ;;  %v5143_v60 = vunpack.i.l.bf16 %v5142_v56 }
 0x3a4   :  { %v5149_v3 = vunpack.i.h.bf16 %v5147_v57  ;;  %v5148_v4 = vunpack.i.l.bf16 %v5147_v57 }
 0x3a5   :  { %v472_v8 = vsel %vm470_vm9, 0.0, %v5144_v59  ;;  %v471_v9 = vsel %vm470_vm9, 0.0, %v5143_v60 }
 0x3a6   :  { %v5157_v58 = vpop.permute.xlu0 %5156 }
 0x3a7   :  { %v5152_v61 = vpop.permute.xlu1 %5151  ;;  %v5159_v62 = vunpack.i.h.bf16 %v5157_v58  ;;  %v5158_v63 = vunpack.i.l.bf16 %v5157_v58 }
 0x3a8   :  { %v5154_v1 = vunpack.i.h.bf16 %v5152_v61  ;;  %v5153_v2 = vunpack.i.l.bf16 %v5152_v61 }
 0x3a9   :  { %v479_v14 = vsel %vm99_vm4, %v471_v9, %v5158_v63  ;;  %v480_v15 = vsel %vm99_vm4, %v472_v8, %v5159_v62  ;;  %v5334_v8 = vld [vmem:[#allocation5 + $0xe0] ss:$8 sps:$4 sm:$0xff]   ;;  %v5335_v9 = vld [vmem:[#allocation5 + $0xf0] ss:$8 sps:$4 sm:$0xff]  }
 0x3aa   :  { %v474_v5 = vsel %vm470_vm9, %v5794_v34, %v5154_v1  ;;  %v473_v6 = vsel %vm470_vm9, %v5788_v30, %v5153_v2  ;;  %v5162_v7 = vpop.permute.xlu0 %5161 }
 0x3ab   :  { %v5164_v10 = vunpack.i.h.bf16 %v5162_v7  ;;  %v5163_v11 = vunpack.i.l.bf16 %v5162_v7  ;;  %v5167_v13 = vpop.permute.xlu1 %5166  ;;  %v481_v21 = vsel %vm99_vm4, %v473_v6, %v5148_v4  ;;  %v482_v22 = vsel %vm99_vm4, %v474_v5, %v5149_v3  ;;  %v5330_v4 = vld [vmem:[#allocation5 + $0xa0] ss:$8 sps:$4 sm:$0xff]   ;;  %v5331_v5 = vld [vmem:[#allocation5 + $0xb0] ss:$8 sps:$4 sm:$0xff]  }
 0x3ac   :  { %v5169_v16 = vunpack.i.h.bf16 %v5167_v13  ;;  %v5168_v17 = vunpack.i.l.bf16 %v5167_v13  ;;  %801 = vmatpush1.bf16.msra.mxu0 %v5330_v4  ;;  %v5332_v6 = vld [vmem:[#allocation5 + $0xc0] ss:$8 sps:$4 sm:$0xff]   ;;  %v5333_v7 = vld [vmem:[#allocation5 + $0xd0] ss:$8 sps:$4 sm:$0xff]  }
 0x3ad   :  { %v488_v19 = vsel %vm487_vm10, %v479_v14, %v5163_v11  ;;  %v489_v20 = vsel %vm487_vm10, %v480_v15, %v5164_v10  ;;  %802 = vmatprep.subr.bf16.mxu0 %v5694_v0  ;;  %v5336_v10 = vld [vmem:[#allocation5 + $0x100] ss:$8 sps:$4 sm:$0xff]   ;;  %v5337_v11 = vld [vmem:[#allocation5 + $0x110] ss:$8 sps:$4 sm:$0xff]  }
 0x3ae   :  { %v491_v23 = vsel %vm487_vm10, %v482_v22, %v5169_v16  ;;  %v490_v24 = vsel %vm487_vm10, %v481_v21, %v5168_v17  ;;  %v5172_v25 = vpop.permute.xlu0 %5171  ;;  %v496_v26 = vpack.c.bf16 %v489_v20, %v488_v19  ;;  %v5338_v13 = vld [vmem:[#allocation5 + $0x120] ss:$8 sps:$4 sm:$0xff]   ;;  %v5339_v14 = vld [vmem:[#allocation5 + $0x130] ss:$8 sps:$4 sm:$0xff]  }
 0x3af   :  { %v497_v27 = vpack.c.bf16 %v491_v23, %v490_v24  ;;  %v5177_v28 = vpop.permute.xlu1 %5176  ;;  %v5174_v31 = vunpack.i.h.bf16 %v5172_v25  ;;  %v5173_v35 = vunpack.i.l.bf16 %v5172_v25  ;;  %v5340_v15 = vld [vmem:[#allocation5 + $0x140] ss:$8 sps:$4 sm:$0xff]   ;;  %v5341_v23 = vld [vmem:[#allocation5 + $0x150] ss:$8 sps:$4 sm:$0xff]  }
 0x3b0   :  { %5049 = vmatprep.mubr.msk.bf16.mxu1 %vm532_vm11, %v496_v26  ;;  %v5179_v41 = vunpack.i.h.bf16 %v5177_v28  ;;  %v5178_v42 = vunpack.i.l.bf16 %v5177_v28  ;;  %803 = vmatpush1.bf16.msra.mxu0 %v5331_v5  ;;  %v618_v17 = vld [vmem:[%s7120_s2 + $0x2] ss:$0 sm:$0xff]  ;;  %v627_v25 = vld [vmem:[%s7120_s2 + $0x3] ss:$0 sm:$0xff] }
 0x3b1   :  { %5050 = vmatmul.mubr.msk.bf16.vlgmr.msra.gmra.mrb[8].mxu1 %vm532_vm11, %v497_v27  ;;  %v476_v47 = vsel %vm470_vm9, %v5792_v33, %v5174_v31  ;;  %v475_v48 = vsel %vm470_vm9, %v5790_v32, %v5173_v35  ;;  %804 = vmatprep.subr.bf16.mxu0 %v5694_v0 }
 0x3b2   :  { %v5187_v29 = vpop.permute.xlu0 %5186 }
 0x3b3   :  { %v5182_v36 = vpop.permute.xlu1 %5181  ;;  %v5189_v37 = vunpack.i.h.bf16 %v5187_v29  ;;  %v5188_v38 = vunpack.i.l.bf16 %v5187_v29 }
 0x3b4   :  { %v5184_v39 = vunpack.i.h.bf16 %v5182_v36  ;;  %v5183_v40 = vunpack.i.l.bf16 %v5182_v36  ;;  %805 = vmatpush1.bf16.msra.mxu0 %v5332_v6 }
 0x3b5   :  { %v483_v55 = vsel %vm99_vm4, %v475_v48, %v5188_v38  ;;  %v484_v56 = vsel %vm99_vm4, %v476_v47, %v5189_v37  ;;  %806 = vmatprep.subr.bf16.mxu0 %v5694_v0 }
 0x3b6   :  { %v478_v43 = vsel %vm470_vm9, %v5816_v51, %v5184_v39  ;;  %v477_v44 = vsel %vm470_vm9, %v5806_v45, %v5183_v40  ;;  %v5192_v46 = vpop.permute.xlu0 %5191 }
 0x3b7   :  { %v5194_v52 = vunpack.i.h.bf16 %v5192_v46  ;;  %v5193_v53 = vunpack.i.l.bf16 %v5192_v46  ;;  %v5197_v54 = vpop.permute.xlu1 %5196  ;;  %v485_v61 = vsel %vm99_vm4, %v477_v44, %v5178_v42  ;;  %v486_v62 = vsel %vm99_vm4, %v478_v43, %v5179_v41 }
 0x3b8   :  { %v5199_v57 = vunpack.i.h.bf16 %v5197_v54  ;;  %v5198_v58 = vunpack.i.l.bf16 %v5197_v54  ;;  %807 = vmatpush1.bf16.msra.mxu0 %v5333_v7 }
 0x3b9   :  { %v492_v59 = vsel %vm487_vm10, %v483_v55, %v5193_v53  ;;  %v493_v60 = vsel %vm487_vm10, %v484_v56, %v5194_v52  ;;  %808 = vmatprep.subr.bf16.mxu0 %v5694_v0 }
 0x3ba   :  { %v494_v63 = vsel %vm487_vm10, %v485_v61, %v5198_v58  ;;  %v495_v1 = vsel %vm487_vm10, %v486_v62, %v5199_v57  ;;  %v498_v2 = vpack.c.bf16 %v493_v60, %v492_v59 }
 0x3bb   :  { %v499_v3 = vpack.c.bf16 %v495_v1, %v494_v63 }
 0x3bc   :  { %5053 = vmatprep.mubr.msk.bf16.mxu1 %vm532_vm11, %v498_v2  ;;  %809 = vmatpush1.bf16.msra.mxu0 %v5334_v8 }
 0x3bd   :  { %5054 = vmatmul.mubr.msk.bf16.gmra.mrb[12].mxu1 %vm532_vm11, %v499_v3  ;;  %810 = vmatprep.subr.bf16.mxu0 %v5694_v0 }
 0x3c0   :  { %811 = vmatpush1.bf16.msra.mxu0 %v5335_v9 }
 0x3c1   :  { %812 = vmatprep.subr.bf16.mxu0 %v5694_v0 }
 0x3c4   :  { %813 = vmatpush1.bf16.msra.mxu0 %v5336_v10 }
 0x3c5   :  { %814 = vmatprep.subr.bf16.mxu0 %v5694_v0 }
 0x3c8   :  { %815 = vmatpush1.bf16.msra.mxu0 %v5337_v11 }
 0x3c9   :  { %816 = vmatprep.subr.bf16.mxu0 %v5694_v0 }
 0x3cc   :  { %817 = vmatpush1.bf16.msra.mxu0 %v5338_v13 }
 0x3cd   :  { %818 = vmatprep.subr.bf16.mxu0 %v5694_v0 }
 0x3d0   :  { %819 = vmatpush1.bf16.msra.mxu0 %v5339_v14 }
 0x3d1   :  { %820 = vmatprep.subr.bf16.mxu0 %v5694_v0 }
 0x3d4   :  { %821 = vmatpush1.bf16.msra.mxu0 %v5340_v15 }
 0x3d5   :  { %822 = vmatprep.subr.bf16.mxu0 %v5694_v0 }
 0x3d8   :  { %823 = vmatpush1.bf16.msra.mxu0 %v5341_v23 }
 0x484   :  { %v5051_v16 = vpop.f32.mrb[8].mxu1 }
 0x485   :  { %v612_v19 = vmax.f32 %v5051_v16, 0.0  ;;  %v579_v20 = vpop.f32.mrb[9].mxu1 }
 0x486   :  { %v610_v21 = vmax.f32 %v579_v20, 0.0  ;;  %v5052_v22 = vpop.f32.mrb[10].mxu1 }
 0x487   :  { %v621_v24 = vmul.f32 %v618_v17, %v612_v19  ;;  %v613_v26 = vmax.f32 %v5052_v22, 0.0  ;;  %v582_v27 = vpop.f32.mrb[11].mxu1 }
 0x488   :  { %v619_v28 = vmul.f32 %v618_v17, %v610_v21  ;;  %v611_v29 = vmax.f32 %v582_v27, 0.0 }
 0x489   :  { %v622_v31 = vmul.f32 %v618_v17, %v613_v26  ;;  %v630_v37 = vadd.f32 %v627_v25, %v621_v24 }
 0x48a   :  { %v628_v35 = vadd.f32 %v627_v25, %v619_v28  ;;  %v620_v36 = vmul.f32 %v618_v17, %v611_v29 }
 0x48b   :  { %v631_v38 = vadd.f32 %v627_v25, %v622_v31 }
 0x48c   :  { %v629_v39 = vadd.f32 %v627_v25, %v620_v36  ;;  %v636_v43 = vmax.f32 %v628_v35, -1e+30 }
 0x48d   :  { %v639_v40 = vmax.f32 %v631_v38, %v630_v37 }
 0x48e   :  { %v637_v41 = vmax.f32 %v629_v39, %v628_v35  ;;  %v638_v42 = vmax.f32 %v630_v37, %v629_v39 }
 0x490   :  { %v5055_v44 = vpop.f32.mrb[12].mxu1  ;;  %v5205_v46 = vpack.i.bf16 %v639_v40, %v638_v42  ;;  %v5200_v47 = vpack.i.bf16 %v636_v43, %v637_v41  ;;  %v685_v48 = vpack.c.bf16 %v638_v42, %v637_v41 }
 0x491   :  { %v616_v52 = vmax.f32 %v5055_v44, 0.0  ;;  %v595_v53 = vpop.f32.mrb[13].mxu1  ;;  %v5342_v44 = vld [vmem:[#allocation5 + $0x160] ss:$8 sps:$4 sm:$0xff]  }
 0x492   :  { %v614_v54 = vmax.f32 %v595_v53, 0.0  ;;  %5206 = vrot.lane.b32.xlu1 %v5205_v46, %s5699_s24  ;;  %5201 = vrot.lane.b32.xlu0 %v5200_v47, %s5699_s24  ;;  %v5056_v55 = vpop.f32.mrb[14].mxu1 }
 0x493   :  { %v625_v56 = vmul.f32 %v618_v17, %v616_v52  ;;  %v617_v57 = vmax.f32 %v5056_v55, 0.0  ;;  %4811 = vmatprep.mubr.msk.bf16.mxu0 %vm532_vm11, %v685_v48  ;;  %v598_v58 = vpop.f32.mrb[15].mxu1  ;;  %5057 = vmatprep.subr.bf16.mxu1 %v5342_v44  ;;  %v882_v55 = vld [vmem:[%s7120_s2 + $0x5] ss:$0 sm:$0xff] }
 0x494   :  { %v623_v59 = vmul.f32 %v618_v17, %v614_v54  ;;  %v615_v60 = vmax.f32 %v598_v58, 0.0  ;;  %5058 = vmatpush3.bf16.msra.mxu1 %v5342_v44 }
 0x495   :  { %v626_v61 = vmul.f32 %v618_v17, %v617_v57  ;;  %v634_v1 = vadd.f32 %v627_v25, %v625_v56 }
 0x496   :  { %v632_v62 = vadd.f32 %v627_v25, %v623_v59  ;;  %v624_v63 = vmul.f32 %v618_v17, %v615_v60  ;;  %v5343_v60 = vld [vmem:[#allocation5 + $0x170] ss:$8 sps:$4 sm:$0xff]  }
 0x497   :  { %v635_v2 = vadd.f32 %v627_v25, %v626_v61  ;;  %5059 = vmatprep.subr.bf16.mxu1 %v5343_v60 }
 0x498   :  { %v640_v3 = vmax.f32 %v632_v62, %v631_v38  ;;  %v633_v4 = vadd.f32 %v627_v25, %v624_v63  ;;  %5060 = vmatpush3.bf16.msra.mxu1 %v5343_v60 }
 0x499   :  { %v643_v5 = vmax.f32 %v635_v2, %v634_v1 }
 0x49a   :  { %v641_v6 = vmax.f32 %v633_v4, %v632_v62  ;;  %v642_v7 = vmax.f32 %v634_v1, %v633_v4  ;;  %v687_v20 = vpack.c.bf16 %v640_v3, %v639_v40  ;;  %v5344_v1 = vld [vmem:[#allocation5 + $0x180] ss:$8 sps:$4 sm:$0xff]  }
 0x49b   :  { %v691_v38 = vpack.c.bf16 %v5695_v18, %v643_v5  ;;  %5061 = vmatprep.subr.bf16.mxu1 %v5344_v1 }
 0x49c   :  { %v5215_v8 = vpack.i.bf16 %v643_v5, %v642_v7  ;;  %v5210_v9 = vpack.i.bf16 %v641_v6, %v640_v3  ;;  %v689_v27 = vpack.c.bf16 %v642_v7, %v641_v6  ;;  %5062 = vmatpush3.bf16.msra.mxu1 %v5344_v1 }
 0x49e   :  { %5216 = vrot.lane.b32.xlu1 %v5215_v8, %s5699_s24  ;;  %5211 = vrot.lane.b32.xlu0 %v5210_v9, %s5699_s24 }
 0x504   :  { %v5202_v10 = vpop.permute.xlu0 %5201  ;;  %v5207_v14 = vpop.permute.xlu1 %5206 }
 0x505   :  { %v5204_v11 = vunpack.i.h.bf16 %v5202_v10  ;;  %v5203_v13 = vunpack.i.l.bf16 %v5202_v10  ;;  %v5209_v17 = vunpack.i.h.bf16 %v5207_v14  ;;  %v5208_v19 = vunpack.i.l.bf16 %v5207_v14 }
 0x507   :  { %v677_v15 = vsel %vm532_vm11, %v636_v43, %v5203_v13  ;;  %v678_v21 = vsel %vm532_vm11, %v637_v41, %v5208_v19  ;;  %v679_v22 = vsel %vm532_vm11, %v638_v42, %v5209_v17 }
 0x508   :  { %v4814_v16 = vpack.c.bf16 %v677_v15, %v5204_v11  ;;  %v686_v24 = vpack.c.bf16 %v679_v22, %v678_v21 }
 0x50a   :  { %4815 = vmatmul.mubr.msk.bf16.vlgmr.msra.gmra.mrb[16].mxu0 %vm4813_vm14, %v4814_v16 }
 0x50b   :  { %4816 = vmatprep.mubr.msk.bf16.mxu0 %vm532_vm11, %v687_v20 }
 0x510   :  { %v5212_v23 = vpop.permute.xlu0 %5211  ;;  %v5217_v31 = vpop.permute.xlu1 %5216 }
 0x511   :  { %v5214_v25 = vunpack.i.h.bf16 %v5212_v23  ;;  %v5213_v26 = vunpack.i.l.bf16 %v5212_v23  ;;  %v5219_v36 = vunpack.i.h.bf16 %v5217_v31  ;;  %v5218_v37 = vunpack.i.l.bf16 %v5217_v31 }
 0x512   :  { %841 = vmatmul.mubr.bf16.gmra.mrb[20].mxu0 %v686_v24 }
 0x513   :  { %4817 = vmatprep.mubr.msk.bf16.mxu0 %vm532_vm11, %v689_v27  ;;  %v680_v28 = vsel %vm532_vm11, %v639_v40, %v5213_v26  ;;  %v681_v29 = vsel %vm532_vm11, %v640_v3, %v5214_v25  ;;  %v682_v39 = vsel %vm532_vm11, %v641_v6, %v5218_v37  ;;  %v683_v41 = vsel %vm532_vm11, %v642_v7, %v5219_v36  ;;  %v873_v40 = vld [vmem:[%s7120_s2 + $0x4] ss:$0 sm:$0xff] }
 0x514   :  { %v688_v35 = vpack.c.bf16 %v681_v29, %v680_v28  ;;  %v690_v42 = vpack.c.bf16 %v683_v41, %v682_v39  ;;  %v5345_v41 = vld [vmem:[#allocation5 + $0x190] ss:$8 sps:$4 sm:$0xff]  }
 0x515   :  { %5071 = vmatprep.subr.bf16.mxu1 %v5345_v41 }
 0x51a   :  { %849 = vmatmul.mubr.bf16.gmra.mrb[24].mxu0 %v688_v35 }
 0x51b   :  { %4818 = vmatprep.mubr.msk.bf16.mxu0 %vm532_vm11, %v691_v38 }
 0x522   :  { %857 = vmatmul.mubr.bf16.gmra.mrb[28].mxu0 %v690_v42 }
 0x5dd   :  { %v834_v43 = vpop.f32.mrb[16].mxu0 }
 0x5de   :  { %v865_v46 = vmax.f32 %v834_v43, 0.0  ;;  %v836_v47 = vpop.f32.mrb[17].mxu0 }
 0x5df   :  { %v837_v48 = vpop.f32.mrb[18].mxu0 }
 0x5e0   :  { %v874_v52 = vmul.f32 %v873_v40, %v865_v46  ;;  %v866_v53 = vmax.f32 %v837_v48, 0.0  ;;  %v839_v54 = vpop.f32.mrb[19].mxu0 }
 0x5e2   :  { %v875_v56 = vmul.f32 %v873_v40, %v866_v53  ;;  %v5904_v57 = vadd.f32 %v882_v55, %v874_v52 }
 0x5e4   :  { %v5906_v58 = vadd.f32 %v882_v55, %v875_v56 }
 0x5e5   :  { %v842_v59 = vpop.f32.mrb[20].mxu0 }
 0x5e6   :  { %v867_v61 = vmax.f32 %v842_v59, 0.0  ;;  %v844_v62 = vpop.f32.mrb[21].mxu0  ;;  %v5220_v63 = vpack.i.bf16 %v5906_v58, %v5904_v57 }
 0x5e7   :  { %v845_v2 = vpop.f32.mrb[22].mxu0 }
 0x5e8   :  { %v876_v3 = vmul.f32 %v873_v40, %v867_v61  ;;  %v868_v4 = vmax.f32 %v845_v2, 0.0  ;;  %v847_v5 = vpop.f32.mrb[23].mxu0  ;;  %5221 = vrot.lane.b32.xlu0 %v5220_v63, %s5696_s17 }
 0x5ea   :  { %v885_v6 = vadd.f32 %v882_v55, %v876_v3  ;;  %v877_v7 = vmul.f32 %v873_v40, %v868_v4 }
 0x5ec   :  { %v5911_v8 = vadd.f32 %v882_v55, %v877_v7  ;;  %v5225_v9 = vpack.i.bf16 %v885_v6, %v5906_v58 }
 0x5ed   :  { %v850_v10 = vpop.f32.mrb[24].mxu0 }
 0x5ee   :  { %v869_v11 = vmax.f32 %v850_v10, 0.0  ;;  %5226 = vrot.lane.b32.xlu0 %v5225_v9, %s5697_s18  ;;  %v852_v13 = vpop.f32.mrb[25].mxu0  ;;  %v5230_v14 = vpack.i.bf16 %v5911_v8, %v885_v6 }
 0x5ef   :  { %v853_v15 = vpop.f32.mrb[26].mxu0 }
 0x5f0   :  { %v878_v16 = vmul.f32 %v873_v40, %v869_v11  ;;  %v870_v17 = vmax.f32 %v853_v15, 0.0  ;;  %5231 = vrot.lane.b32.xlu1 %v5230_v14, %s5696_s17  ;;  %v855_v19 = vpop.f32.mrb[27].mxu0 }
 0x5f2   :  { %v887_v20 = vadd.f32 %v882_v55, %v878_v16  ;;  %v879_v21 = vmul.f32 %v873_v40, %v870_v17 }
 0x5f4   :  { %v5917_v22 = vadd.f32 %v882_v55, %v879_v21  ;;  %v5235_v23 = vpack.i.bf16 %v887_v20, %v5911_v8 }
 0x5f5   :  { %v858_v24 = vpop.f32.mrb[28].mxu0 }
 0x5f6   :  { %v871_v25 = vmax.f32 %v858_v24, 0.0  ;;  %5236 = vrot.lane.b32.xlu1 %v5235_v23, %s5697_s18  ;;  %v860_v26 = vpop.f32.mrb[29].mxu0  ;;  %v5240_v27 = vpack.i.bf16 %v5917_v22, %v887_v20 }
 0x5f7   :  { %v861_v28 = vpop.f32.mrb[30].mxu0 }
 0x5f8   :  { %v880_v29 = vmul.f32 %v873_v40, %v871_v25  ;;  %v872_v31 = vmax.f32 %v861_v28, 0.0  ;;  %5241 = vrot.lane.b32.xlu0 %v5240_v27, %s5696_s17  ;;  %v863_v35 = vpop.f32.mrb[31].mxu0 }
 0x5fa   :  { %v889_v36 = vadd.f32 %v882_v55, %v880_v29  ;;  %v881_v37 = vmul.f32 %v873_v40, %v872_v31  ;;  %v1068_v31 = vld [vmem:[%s7120_s2 + $0x6] ss:$0 sm:$0xff] }
 0x5fc   :  { %v890_v38 = vadd.f32 %v882_v55, %v881_v37  ;;  %v5245_v39 = vpack.i.bf16 %v889_v36, %v5917_v22 }
 0x5fe   :  { %5246 = vrot.lane.b32.xlu0 %v5245_v39, %s5697_s18  ;;  %v5250_v42 = vpack.i.bf16 %v890_v38, %v889_v36  ;;  %v5255_v43 = vpack.i.bf16 %v5695_v18, %v890_v38 }
 0x600   :  { %5251 = vrot.lane.b32.xlu1 %v5250_v42, %s5696_s17 }
 0x604   :  { %5256 = vrot.lane.b32.xlu1 %v5255_v43, %s5697_s18 }
 0x65a   :  { %v5222_v44 = vpop.permute.xlu0 %5221 }
 0x65b   :  { %v5224_v46 = vunpack.i.h.bf16 %v5222_v44  ;;  %v5223_v47 = vunpack.i.l.bf16 %v5222_v44 }
 0x65d   :  { %v948_v53 = vsel %vm470_vm9, %v5904_v57, %v5224_v46  ;;  %v947_v54 = vsel %vm470_vm9, 0.0, %v5223_v47 }
 0x660   :  { %v5227_v48 = vpop.permute.xlu0 %5226 }
 0x661   :  { %v5229_v52 = vunpack.i.h.bf16 %v5227_v48  ;;  %v5228_v40 = vunpack.i.l.bf16 %v5227_v48 }
 0x662   :  { %v5232_v59 = vpop.permute.xlu1 %5231 }
 0x663   :  { %v955_v55 = vsel %vm99_vm4, %v947_v54, %v5228_v40  ;;  %v956_v56 = vsel %vm99_vm4, %v948_v53, %v5229_v52  ;;  %v5234_v18 = vunpack.i.h.bf16 %v5232_v59  ;;  %v5233_v61 = vunpack.i.l.bf16 %v5232_v59 }
 0x664   :  { %v963_v60 = vpack.c.bf16 %v956_v56, %v955_v55 }
 0x665   :  { %v950_v2 = vsel %vm470_vm9, %v885_v6, %v5234_v18  ;;  %v949_v57 = vsel %vm470_vm9, %v5906_v58, %v5233_v61 }
 0x666   :  { %5063 = vmatprep.mubr.msk.bf16.mxu1 %vm487_vm10, %v963_v60 }
 0x668   :  { %v5237_v62 = vpop.permute.xlu1 %5236 }
 0x669   :  { %v5239_v63 = vunpack.i.h.bf16 %v5237_v62  ;;  %v5238_v1 = vunpack.i.l.bf16 %v5237_v62 }
 0x66a   :  { %v5242_v5 = vpop.permute.xlu0 %5241 }
 0x66b   :  { %v958_v3 = vsel %vm99_vm4, %v950_v2, %v5239_v63  ;;  %v957_v4 = vsel %vm99_vm4, %v949_v57, %v5238_v1  ;;  %v5244_v9 = vunpack.i.h.bf16 %v5242_v5  ;;  %v5243_v10 = vunpack.i.l.bf16 %v5242_v5 }
 0x66c   :  { %v964_v7 = vpack.c.bf16 %v958_v3, %v957_v4 }
 0x66d   :  { %v952_v15 = vsel %vm470_vm9, %v887_v20, %v5244_v9  ;;  %v951_v6 = vsel %vm470_vm9, %v5911_v8, %v5243_v10 }
 0x66e   :  { %5064 = vmatmul.mubr.msk.bf16.vlgmr.msra.gmra.mrb[16].mxu1 %vm487_vm10, %v964_v7 }
 0x66f   :  { %5072 = vmatpush3.bf16.msra.mxu1 %v5345_v41 }
 0x670   :  { %v5247_v11 = vpop.permute.xlu0 %5246 }
 0x671   :  { %v5249_v13 = vunpack.i.h.bf16 %v5247_v11  ;;  %v5248_v14 = vunpack.i.l.bf16 %v5247_v11 }
 0x672   :  { %v5252_v58 = vpop.permute.xlu1 %5251 }
 0x673   :  { %v960_v16 = vsel %vm99_vm4, %v952_v15, %v5249_v13  ;;  %v959_v17 = vsel %vm99_vm4, %v951_v6, %v5248_v14  ;;  %v5254_v19 = vunpack.i.h.bf16 %v5252_v58  ;;  %v5253_v21 = vunpack.i.l.bf16 %v5252_v58 }
 0x674   :  { %v965_v23 = vpack.c.bf16 %v960_v16, %v959_v17 }
 0x675   :  { %v954_v27 = vsel %vm470_vm9, %v889_v36, %v5254_v19  ;;  %v953_v20 = vsel %vm470_vm9, %v5917_v22, %v5253_v21  ;;  %v1077_v36 = vld [vmem:[%s7120_s2 + $0x7] ss:$0 sm:$0xff]  ;;  %v5346_v19 = vld [vmem:[#allocation5 + $0x1a0] ss:$8 sps:$4 sm:$0xff]  }
 0x676   :  { %5067 = vmatprep.mubr.msk.bf16.mxu1 %vm487_vm10, %v965_v23  ;;  %v5257_v24 = vpop.permute.xlu1 %5256  ;;  %5081 = vmatprep.subr.bf16.mxu1 %v5346_v19 }
 0x677   :  { %v5259_v25 = vunpack.i.h.bf16 %v5257_v24  ;;  %v5258_v26 = vunpack.i.l.bf16 %v5257_v24 }
 0x679   :  { %v961_v8 = vsel %vm99_vm4, %v953_v20, %v5258_v26  ;;  %v962_v28 = vsel %vm99_vm4, %v954_v27, %v5259_v25 }
 0x67a   :  { %v966_v29 = vpack.c.bf16 %v962_v28, %v961_v8 }
 0x67c   :  { %5068 = vmatmul.mubr.msk.bf16.gmra.mrb[20].mxu1 %vm487_vm10, %v966_v29 }
 0x741   :  { %v5065_v35 = vpop.f32.mrb[16].mxu1 }
 0x742   :  { %v1071_v37 = vmul.f32 %v5065_v35, %v1068_v31  ;;  %v1037_v38 = vpop.f32.mrb[17].mxu1 }
 0x743   :  { %v1069_v39 = vmul.f32 %v1068_v31, %v1037_v38  ;;  %v5066_v22 = vpop.f32.mrb[18].mxu1 }
 0x744   :  { %v1072_v41 = vmul.f32 %v5066_v22, %v1068_v31  ;;  %v1040_v42 = vpop.f32.mrb[19].mxu1  ;;  %v1080_v46 = vadd.f32 %v1077_v36, %v1071_v37 }
 0x745   :  { %v1078_v43 = vadd.f32 %v1077_v36, %v1069_v39  ;;  %v1070_v44 = vmul.f32 %v1068_v31, %v1040_v42 }
 0x746   :  { %v1081_v47 = vadd.f32 %v1077_v36, %v1072_v41  ;;  %v5968_v54 = vadd.f32 %v1080_v46, %v5790_v32 }
 0x747   :  { %v1079_v48 = vadd.f32 %v1077_v36, %v1070_v44  ;;  %v5962_v40 = vadd.f32 %v1078_v43, %v5788_v30 }
 0x748   :  { %v5959_v52 = vadd.f32 %v1081_v47, %v5792_v33 }
 0x749   :  { %v5965_v53 = vadd.f32 %v1079_v48, %v5794_v34 }
 0x74a   :  { %v1103_v56 = vpack.c.bf16 %v5959_v52, %v5968_v54 }
 0x74b   :  { %v1102_v55 = vpack.c.bf16 %v5965_v53, %v5962_v40 }
 0x74d   :  { %5073 = vmatprep.mubr.msk.bf16.mxu1 %vm470_vm9, %v1102_v55 }
 0x74e   :  { %5074 = vmatmul.mubr.msk.bf16.vlgmr.msra.gmra.mrb[24].mxu1 %vm470_vm9, %v1103_v56 }
 0x74f   :  { %v5069_v33 = vpop.f32.mrb[20].mxu1  ;;  %5082 = vmatpush3.bf16.msra.mxu1 %v5346_v19 }
 0x750   :  { %v1075_v59 = vmul.f32 %v5069_v33, %v1068_v31  ;;  %v1053_v30 = vpop.f32.mrb[21].mxu1 }
 0x751   :  { %v1073_v60 = vmul.f32 %v1068_v31, %v1053_v30  ;;  %v5070_v18 = vpop.f32.mrb[22].mxu1 }
 0x752   :  { %v1076_v34 = vmul.f32 %v5070_v18, %v1068_v31  ;;  %v1056_v61 = vpop.f32.mrb[23].mxu1  ;;  %v1084_v63 = vadd.f32 %v1077_v36, %v1075_v59 }
 0x753   :  { %v1082_v62 = vadd.f32 %v1077_v36, %v1073_v60  ;;  %v1074_v32 = vmul.f32 %v1068_v31, %v1056_v61 }
 0x754   :  { %v1085_v1 = vadd.f32 %v1077_v36, %v1076_v34  ;;  %v5986_v5 = vadd.f32 %v1084_v63, %v5814_v50 }
 0x755   :  { %v1083_v2 = vadd.f32 %v1077_v36, %v1074_v32  ;;  %v5980_v3 = vadd.f32 %v1082_v62, %v5806_v45  ;;  %v1106_v45 = vld [vmem:[%s7120_s2 + $0x10] ss:$0 sm:$0xff] }
 0x756   :  { %v5977_v57 = vadd.f32 %v1085_v1, %v5812_v49 }
 0x757   :  { %v5983_v4 = vadd.f32 %v1083_v2, %v5816_v51 }
 0x758   :  { %v1105_v9 = vpack.c.bf16 %v5977_v57, %v5986_v5 }
 0x759   :  { %v1104_v7 = vpack.c.bf16 %v5983_v4, %v5980_v3 }
 0x75b   :  { %5077 = vmatprep.mubr.msk.bf16.mxu1 %vm470_vm9, %v1104_v7 }
 0x75c   :  { %5078 = vmatmul.mubr.msk.bf16.gmra.mrb[28].mxu1 %vm470_vm9, %v1105_v9 }
 0x821   :  { %v5075_v49 = vpop.f32.mrb[24].mxu1 }
 0x822   :  { %v5997_v51 = vadd.f32 %v5075_v49, %v1106_v45  ;;  %v1159_v10 = vpop.f32.mrb[25].mxu1 }
 0x823   :  { %v5999_v50 = vadd.f32 %v1159_v10, %v1106_v45  ;;  %v5076_v11 = vpop.f32.mrb[26].mxu1 }
 0x824   :  { %v1200_v13 = vmul.f32 0.5, %v5997_v51  ;;  %v6002_v14 = vadd.f32 %v5076_v11, %v1106_v45  ;;  %v1162_v15 = vpop.f32.mrb[27].mxu1 }
 0x825   :  { %v1198_v6 = vmul.f32 0.5, %v5999_v50  ;;  %v6005_v58 = vadd.f32 %v1162_v15, %v1106_v45 }
 0x826   :  { %5443 = vtanh.f32 %v1200_v13  ;;  %v1201_v16 = vmul.f32 0.5, %v6002_v14 }
 0x827   :  { %5445 = vtanh.f32 %v1198_v6  ;;  %v1199_v17 = vmul.f32 0.5, %v6005_v58 }
 0x828   :  { %5447 = vtanh.f32 %v1201_v16 }
 0x829   :  { %5449 = vtanh.f32 %v1199_v17 }
 0x82f   :  { %v5079_v21 = vpop.f32.mrb[28].mxu1 }
 0x830   :  { %v5444_v23 = vpop.eup %5443  ;;  %v6009_v24 = vadd.f32 %v5079_v21, %v1106_v45  ;;  %v1175_v25 = vpop.f32.mrb[29].mxu1 }
 0x831   :  { %v5446_v26 = vpop.eup %5445  ;;  %v6011_v27 = vadd.f32 %v1175_v25, %v1106_v45  ;;  %v5080_v20 = vpop.f32.mrb[30].mxu1  ;;  %v1216_v8 = vmul.f32 0.5, %v5444_v23  ;;  %v1193_v23 = vmax.f32 %v6002_v14, 0.0 }
 0x832   :  { %v5448_v28 = vpop.eup %5447  ;;  %v1204_v29 = vmul.f32 0.5, %v6009_v24  ;;  %v6014_v31 = vadd.f32 %v5080_v20, %v1106_v45  ;;  %v1178_v35 = vpop.f32.mrb[31].mxu1  ;;  %v1214_v22 = vmul.f32 0.5, %v5446_v26  ;;  %v1190_v26 = vmax.f32 %v5999_v50, 0.0 }
 0x833   :  { %v5450_v37 = vpop.eup %5449  ;;  %v1202_v36 = vmul.f32 0.5, %v6011_v27  ;;  %v6017_v38 = vadd.f32 %v1178_v35, %v1106_v45  ;;  %v1224_v39 = vadd.f32 0.5, %v1216_v8  ;;  %v1217_v42 = vmul.f32 0.5, %v5448_v28 }
 0x834   :  { %5451 = vtanh.f32 %v1204_v29  ;;  %v1205_v41 = vmul.f32 0.5, %v6014_v31  ;;  %v1215_v46 = vmul.f32 0.5, %v5450_v37  ;;  %v1222_v47 = vadd.f32 0.5, %v1214_v22 }
 0x835   :  { %5453 = vtanh.f32 %v1202_v36  ;;  %v1203_v43 = vmul.f32 0.5, %v6017_v38  ;;  %1242 = vrot.lane.b32.xlu0 %v1224_v39, %s5701_s7  ;;  %v1225_v44 = vadd.f32 0.5, %v1217_v42  ;;  %v1272_v55 = vsub.f32 1.0, %v1224_v39 }
 0x836   :  { %5455 = vtanh.f32 %v1205_v41  ;;  %v1223_v48 = vadd.f32 0.5, %v1215_v46  ;;  %v1270_v30 = vsub.f32 1.0, %v1222_v47  ;;  %v1191_v20 = vmax.f32 %v6005_v58, 0.0 }
 0x837   :  { %1244 = vrot.lane.b32.xlu1 %v1225_v44, %s5701_s7  ;;  %5457 = vtanh.f32 %v1203_v43  ;;  %v1273_v33 = vsub.f32 1.0, %v1225_v44  ;;  %v1192_v28 = vmax.f32 %v5997_v51, 0.0  ;;  %v1194_v46 = vmax.f32 %v6011_v27, 0.0 }
 0x838   :  { %v1271_v34 = vsub.f32 1.0, %v1223_v48 }
 0x839   :  { %1238 = vrot.lane.b32.xlu0 %v1222_v47, %s5701_s7  ;;  %v1195_v47 = vmax.f32 %v6017_v38, 0.0 }
 0x83b   :  { %1240 = vrot.lane.b32.xlu1 %v1223_v48, %s5701_s7 }
 0x83d   :  { %1290 = vrot.lane.b32.xlu0 %v1272_v55, %s5701_s7 }
 0x83e   :  { %v5452_v56 = vpop.eup %5451 }
 0x83f   :  { %v5454_v59 = vpop.eup %5453  ;;  %v1220_v60 = vmul.f32 0.5, %v5452_v56  ;;  %1292 = vrot.lane.b32.xlu1 %v1273_v33, %s5701_s7 }
 0x840   :  { %v5456_v18 = vpop.eup %5455  ;;  %v1218_v63 = vmul.f32 0.5, %v5454_v59 }
 0x841   :  { %1286 = vrot.lane.b32.xlu0 %v1270_v30, %s5701_s7  ;;  %v1221_v61 = vmul.f32 0.5, %v5456_v18  ;;  %v5458_v62 = vpop.eup %5457  ;;  %v1228_v32 = vadd.f32 0.5, %v1220_v60  ;;  %v1196_v60 = vmax.f32 %v6009_v24, 0.0  ;;  %v1197_v18 = vmax.f32 %v6014_v31, 0.0 }
 0x842   :  { %v1219_v2 = vmul.f32 0.5, %v5458_v62  ;;  %v1226_v7 = vadd.f32 0.5, %v1218_v63 }
 0x843   :  { %1288 = vrot.lane.b32.xlu1 %v1271_v34, %s5701_s7  ;;  %v1229_v1 = vadd.f32 0.5, %v1221_v61  ;;  %v1276_v10 = vsub.f32 1.0, %v1228_v32 }
 0x844   :  { %v1227_v9 = vadd.f32 0.5, %v1219_v2  ;;  %v1274_v45 = vsub.f32 1.0, %v1226_v7 }
 0x845   :  { %1250 = vrot.lane.b32.xlu0 %v1228_v32, %s5701_s7  ;;  %v1277_v11 = vsub.f32 1.0, %v1229_v1 }
 0x846   :  { %v1275_v49 = vsub.f32 1.0, %v1227_v9 }
 0x847   :  { %1252 = vrot.lane.b32.xlu1 %v1229_v1, %s5701_s7 }
 0x849   :  { %1246 = vrot.lane.b32.xlu0 %v1226_v7, %s5701_s7 }
 0x84b   :  { %1248 = vrot.lane.b32.xlu1 %v1227_v9, %s5701_s7 }
 0x84d   :  { %1294 = vrot.lane.b32.xlu0 %v1274_v45, %s5701_s7 }
 0x84f   :  { %1296 = vrot.lane.b32.xlu1 %v1275_v49, %s5701_s7 }
 0x851   :  { %1298 = vrot.lane.b32.xlu0 %v1276_v10, %s5701_s7 }
 0x853   :  { %1300 = vrot.lane.b32.xlu1 %v1277_v11, %s5701_s7 }
 0x8a7   :  { %v1243_v13 = vpop.permute.xlu0 %1242 }
 0x8a8   :  { %v1264_v14 = vmul.f32 %v1243_v13, %v1192_v28 }
 0x8a9   :  { %v1245_v15 = vpop.permute.xlu1 %1244 }
 0x8aa   :  { %v1265_v29 = vmul.f32 %v1245_v15, %v1193_v23 }
 0x8ab   :  { %v1239_v6 = vpop.permute.xlu0 %1238 }
 0x8ac   :  { %v1262_v36 = vmul.f32 %v1239_v6, %v1190_v26 }
 0x8ad   :  { %v1241_v16 = vpop.permute.xlu1 %1240 }
 0x8ae   :  { %v1263_v39 = vmul.f32 %v1241_v16, %v1191_v20  ;;  %v5347_v16 = vld [vmem:[#allocation5 + $0x1b0] ss:$8 sps:$4 sm:$0xff]  }
 0x8af   :  { %v1291_v17 = vpop.permute.xlu0 %1290  ;;  %5091 = vmatprep.subr.bf16.mxu1 %v5347_v16 }
 0x8b0   :  { %v1312_v35 = vmul.f32 %v1291_v17, %v5968_v54 }
 0x8b1   :  { %v1293_v19 = vpop.permute.xlu1 %1292 }
 0x8b2   :  { %v1313_v25 = vmul.f32 %v1293_v19, %v5959_v52  ;;  %v6051_v58 = vadd.f32 %v1312_v35, %v1264_v14 }
 0x8b3   :  { %v1287_v21 = vpop.permute.xlu0 %1286 }
 0x8b4   :  { %v1310_v8 = vmul.f32 %v1287_v21, %v5962_v40  ;;  %v6045_v42 = vadd.f32 %v1313_v25, %v1265_v29 }
 0x8b5   :  { %v1289_v37 = vpop.permute.xlu1 %1288 }
 0x8b6   :  { %v1311_v22 = vmul.f32 %v1289_v37, %v5965_v53  ;;  %v6047_v52 = vadd.f32 %v1310_v8, %v1262_v36  ;;  %v1327_v43 = vpack.c.bf16 %v6045_v42, %v6051_v58 }
 0x8b7   :  { %v1251_v41 = vpop.permute.xlu0 %1250 }
 0x8b8   :  { %v6049_v50 = vadd.f32 %v1311_v22, %v1263_v39  ;;  %v1268_v38 = vmul.f32 %v1251_v41, %v1196_v60 }
 0x8b9   :  { %v1253_v40 = vpop.permute.xlu1 %1252 }
 0x8ba   :  { %v1326_v51 = vpack.c.bf16 %v6049_v50, %v6047_v52  ;;  %v1269_v32 = vmul.f32 %v1253_v40, %v1197_v18 }
 0x8bb   :  { %v1247_v54 = vpop.permute.xlu0 %1246 }
 0x8bc   :  { %5083 = vmatprep.mubr.msk.bf16.mxu1 %vm470_vm9, %v1326_v51  ;;  %v1266_v56 = vmul.f32 %v1247_v54, %v1194_v46 }
 0x8bd   :  { %5084 = vmatmul.mubr.msk.bf16.vlgmr.msra.gmra.mrb[32].mxu1 %vm470_vm9, %v1327_v43  ;;  %v1249_v53 = vpop.permute.xlu1 %1248 }
 0x8be   :  { %v1267_v33 = vmul.f32 %v1249_v53, %v1195_v47  ;;  %5092 = vmatpush3.bf16.msra.mxu1 %v5347_v16 }
 0x8bf   :  { %v1295_v44 = vpop.permute.xlu0 %1294 }
 0x8c0   :  { %v1314_v48 = vmul.f32 %v1295_v44, %v5980_v3 }
 0x8c1   :  { %v1297_v55 = vpop.permute.xlu1 %1296 }
 0x8c2   :  { %v1315_v59 = vmul.f32 %v1297_v55, %v5983_v4  ;;  %v6065_v34 = vadd.f32 %v1314_v48, %v1266_v56 }
 0x8c3   :  { %v1299_v30 = vpop.permute.xlu0 %1298 }
 0x8c4   :  { %v6067_v61 = vadd.f32 %v1315_v59, %v1267_v33  ;;  %v1316_v27 = vmul.f32 %v1299_v30, %v5986_v5  ;;  %v1330_v5 = vld [vmem:[%s7120_s2 + $0x11] ss:$0 sm:$0xff] }
 0x8c5   :  { %v1301_v62 = vpop.permute.xlu1 %1300 }
 0x8c6   :  { %v1328_v3 = vpack.c.bf16 %v6067_v61, %v6065_v34  ;;  %v1317_v63 = vmul.f32 %v1301_v62, %v5977_v57  ;;  %v6073_v4 = vadd.f32 %v1316_v27, %v1268_v38 }
 0x8c8   :  { %v6075_v1 = vadd.f32 %v1317_v63, %v1269_v32  ;;  %5087 = vmatprep.mubr.msk.bf16.mxu1 %vm470_vm9, %v1328_v3 }
 0x8ca   :  { %v1329_v24 = vpack.c.bf16 %v6075_v1, %v6073_v4 }
 0x8cc   :  { %5088 = vmatmul.mubr.msk.bf16.gmra.mrb[36].mxu1 %vm470_vm9, %v1329_v24 }
 0x990   :  { %v5085_v31 = vpop.f32.mrb[32].mxu1 }
 0x991   :  { %v6084_v2 = vadd.f32 %v5085_v31, %v1330_v5  ;;  %v1383_v7 = vpop.f32.mrb[33].mxu1 }
 0x992   :  { %v6086_v57 = vadd.f32 %v1383_v7, %v1330_v5  ;;  %v5086_v9 = vpop.f32.mrb[34].mxu1 }
 0x993   :  { %v1424_v45 = vmul.f32 0.5, %v6084_v2  ;;  %v6089_v49 = vadd.f32 %v5086_v9, %v1330_v5  ;;  %v1386_v10 = vpop.f32.mrb[35].mxu1 }
 0x994   :  { %v1422_v11 = vmul.f32 0.5, %v6086_v57  ;;  %v6092_v13 = vadd.f32 %v1386_v10, %v1330_v5 }
 0x995   :  { %5459 = vtanh.f32 %v1424_v45  ;;  %v1425_v15 = vmul.f32 0.5, %v6089_v49 }
 0x996   :  { %5461 = vtanh.f32 %v1422_v11  ;;  %v1423_v6 = vmul.f32 0.5, %v6092_v13 }
 0x997   :  { %5463 = vtanh.f32 %v1425_v15 }
 0x998   :  { %5465 = vtanh.f32 %v1423_v6 }
 0x99f   :  { %v5460_v17 = vpop.eup %5459  ;;  %v5089_v19 = vpop.f32.mrb[36].mxu1 }
 0x9a0   :  { %v5462_v21 = vpop.eup %5461  ;;  %v6096_v23 = vadd.f32 %v5089_v19, %v1330_v5  ;;  %v1399_v25 = vpop.f32.mrb[37].mxu1  ;;  %v1440_v26 = vmul.f32 0.5, %v5460_v17  ;;  %v1417_v19 = vmax.f32 %v6089_v49, 0.0 }
 0x9a1   :  { %v5464_v20 = vpop.eup %5463  ;;  %v6098_v8 = vadd.f32 %v1399_v25, %v1330_v5  ;;  %v5090_v28 = vpop.f32.mrb[38].mxu1  ;;  %v1438_v39 = vmul.f32 0.5, %v5462_v21  ;;  %v1414_v25 = vmax.f32 %v6086_v57, 0.0 }
 0x9a2   :  { %v1428_v29 = vmul.f32 0.5, %v6096_v23  ;;  %v6101_v35 = vadd.f32 %v5090_v28, %v1330_v5  ;;  %v1402_v37 = vpop.f32.mrb[39].mxu1  ;;  %v1448_v36 = vadd.f32 0.5, %v1440_v26  ;;  %v5466_v22 = vpop.eup %5465  ;;  %v1441_v40 = vmul.f32 0.5, %v5464_v20 }
 0x9a3   :  { %v1426_v41 = vmul.f32 0.5, %v6098_v8  ;;  %v6104_v14 = vadd.f32 %v1402_v37, %v1330_v5  ;;  %v1446_v53 = vadd.f32 0.5, %v1438_v39  ;;  %v1439_v44 = vmul.f32 0.5, %v5466_v22 }
 0x9a4   :  { %5467 = vtanh.f32 %v1428_v29  ;;  %v1429_v51 = vmul.f32 0.5, %v6101_v35  ;;  %1466 = vrot.lane.b32.xlu0 %v1448_v36, %s5701_s7  ;;  %v1449_v43 = vadd.f32 0.5, %v1441_v40  ;;  %v1496_v47 = vsub.f32 1.0, %v1448_v36 }
 0x9a5   :  { %5469 = vtanh.f32 %v1426_v41  ;;  %v1427_v54 = vmul.f32 0.5, %v6104_v14  ;;  %v1447_v46 = vadd.f32 0.5, %v1439_v44  ;;  %v1494_v56 = vsub.f32 1.0, %v1446_v53 }
 0x9a6   :  { %5471 = vtanh.f32 %v1429_v51  ;;  %1468 = vrot.lane.b32.xlu1 %v1449_v43, %s5701_s7  ;;  %v1497_v48 = vsub.f32 1.0, %v1449_v43  ;;  %v1415_v26 = vmax.f32 %v6092_v13, 0.0  ;;  %v1416_v28 = vmax.f32 %v6084_v2, 0.0 }
 0x9a7   :  { %5473 = vtanh.f32 %v1427_v54  ;;  %v1495_v60 = vsub.f32 1.0, %v1447_v46  ;;  %v1419_v44 = vmax.f32 %v6104_v14, 0.0 }
 0x9a8   :  { %1462 = vrot.lane.b32.xlu0 %v1446_v53, %s5701_s7  ;;  %v1418_v53 = vmax.f32 %v6098_v8, 0.0 }
 0x9aa   :  { %1464 = vrot.lane.b32.xlu1 %v1447_v46, %s5701_s7 }
 0x9ac   :  { %1514 = vrot.lane.b32.xlu0 %v1496_v47, %s5701_s7 }
 0x9ae   :  { %v5468_v55 = vpop.eup %5467  ;;  %1516 = vrot.lane.b32.xlu1 %v1497_v48, %s5701_s7 }
 0x9af   :  { %v5470_v33 = vpop.eup %5469  ;;  %v1444_v59 = vmul.f32 0.5, %v5468_v55 }
 0x9b0   :  { %v5472_v30 = vpop.eup %5471  ;;  %1510 = vrot.lane.b32.xlu0 %v1494_v56, %s5701_s7  ;;  %v1442_v38 = vmul.f32 0.5, %v5470_v33 }
 0x9b1   :  { %v1452_v18 = vadd.f32 0.5, %v1444_v59  ;;  %v1445_v27 = vmul.f32 0.5, %v5472_v30  ;;  %v5474_v62 = vpop.eup %5473  ;;  %v1420_v59 = vmax.f32 %v6096_v23, 0.0  ;;  %v1421_v30 = vmax.f32 %v6101_v35, 0.0 }
 0x9b2   :  { %1512 = vrot.lane.b32.xlu1 %v1495_v60, %s5701_s7  ;;  %v1443_v3 = vmul.f32 0.5, %v5474_v62  ;;  %v1450_v63 = vadd.f32 0.5, %v1442_v38 }
 0x9b3   :  { %v1453_v32 = vadd.f32 0.5, %v1445_v27  ;;  %v1500_v7 = vsub.f32 1.0, %v1452_v18 }
 0x9b4   :  { %1474 = vrot.lane.b32.xlu0 %v1452_v18, %s5701_s7  ;;  %v1451_v24 = vadd.f32 0.5, %v1443_v3  ;;  %v1498_v5 = vsub.f32 1.0, %v1450_v63 }
 0x9b5   :  { %v1501_v9 = vsub.f32 1.0, %v1453_v32 }
 0x9b6   :  { %1476 = vrot.lane.b32.xlu1 %v1453_v32, %s5701_s7  ;;  %v1499_v31 = vsub.f32 1.0, %v1451_v24 }
 0x9b8   :  { %1470 = vrot.lane.b32.xlu0 %v1450_v63, %s5701_s7 }
 0x9ba   :  { %1472 = vrot.lane.b32.xlu1 %v1451_v24, %s5701_s7 }
 0x9bc   :  { %1518 = vrot.lane.b32.xlu0 %v1498_v5, %s5701_s7 }
 0x9be   :  { %1520 = vrot.lane.b32.xlu1 %v1499_v31, %s5701_s7 }
 0x9c0   :  { %1522 = vrot.lane.b32.xlu0 %v1500_v7, %s5701_s7 }
 0x9c2   :  { %1524 = vrot.lane.b32.xlu1 %v1501_v9, %s5701_s7 }
 0xa16   :  { %v1467_v45 = vpop.permute.xlu0 %1466 }
 0xa17   :  { %v1488_v49 = vmul.f32 %v1467_v45, %v1416_v28 }
 0xa18   :  { %v1469_v10 = vpop.permute.xlu1 %1468 }
 0xa19   :  { %v1489_v29 = vmul.f32 %v1469_v10, %v1417_v19 }
 0xa1a   :  { %v1463_v11 = vpop.permute.xlu0 %1462 }
 0xa1b   :  { %v1486_v39 = vmul.f32 %v1463_v11, %v1414_v25 }
 0xa1c   :  { %v1465_v15 = vpop.permute.xlu1 %1464 }
 0xa1d   :  { %v1487_v22 = vmul.f32 %v1465_v15, %v1415_v26 }
 0xa1e   :  { %v1515_v6 = vpop.permute.xlu0 %1514 }
 0xa1f   :  { %v1536_v37 = vmul.f32 %v1515_v6, %v6051_v58 }
 0xa20   :  { %v1517_v16 = vpop.permute.xlu1 %1516 }
 0xa21   :  { %v1537_v21 = vmul.f32 %v1517_v16, %v6045_v42  ;;  %v6138_v13 = vadd.f32 %v1536_v37, %v1488_v49 }
 0xa22   :  { %v1511_v17 = vpop.permute.xlu0 %1510 }
 0xa23   :  { %v1534_v20 = vmul.f32 %v1511_v17, %v6047_v52  ;;  %v6132_v51 = vadd.f32 %v1537_v21, %v1489_v29 }
 0xa24   :  { %v1513_v36 = vpop.permute.xlu1 %1512 }
 0xa25   :  { %v1535_v41 = vmul.f32 %v1513_v36, %v6049_v50  ;;  %v6134_v42 = vadd.f32 %v1534_v20, %v1486_v39  ;;  %v1551_v54 = vpack.c.bf16 %v6132_v51, %v6138_v13 }
 0xa26   :  { %v1475_v40 = vpop.permute.xlu0 %1474 }
 0xa27   :  { %v6136_v57 = vadd.f32 %v1535_v41, %v1487_v22  ;;  %v1492_v14 = vmul.f32 %v1475_v40, %v1420_v59 }
 0xa28   :  { %v1477_v52 = vpop.permute.xlu1 %1476 }
 0xa29   :  { %v1550_v2 = vpack.c.bf16 %v6136_v57, %v6134_v42  ;;  %v1493_v62 = vmul.f32 %v1477_v52, %v1421_v30 }
 0xa2a   :  { %v1471_v58 = vpop.permute.xlu0 %1470 }
 0xa2b   :  { %5093 = vmatprep.mubr.msk.bf16.mxu1 %vm470_vm9, %v1550_v2  ;;  %v1490_v48 = vmul.f32 %v1471_v58, %v1418_v53 }
 0xa2c   :  { %5094 = vmatmul.mubr.msk.bf16.vlgmr.msra.gmra.mrb[40].mxu1 %vm470_vm9, %v1551_v54  ;;  %v1473_v50 = vpop.permute.xlu1 %1472 }
 0xa2d   :  { %v1491_v55 = vmul.f32 %v1473_v50, %v1419_v44 }
 0xa2e   :  { %v1519_v43 = vpop.permute.xlu0 %1518 }
 0xa2f   :  { %v1538_v46 = vmul.f32 %v1519_v43, %v6065_v34 }
 0xa30   :  { %v1521_v47 = vpop.permute.xlu1 %1520 }
 0xa31   :  { %v1539_v56 = vmul.f32 %v1521_v47, %v6067_v61  ;;  %v6152_v60 = vadd.f32 %v1538_v46, %v1490_v48 }
 0xa32   :  { %v1523_v33 = vpop.permute.xlu0 %1522 }
 0xa33   :  { %v6154_v18 = vadd.f32 %v1539_v56, %v1491_v55  ;;  %v1540_v8 = vmul.f32 %v1523_v33, %v6073_v4  ;;  %v5348_v4 = vld [vmem:[#allocation5 + $0x1c0] ss:$8 sps:$4 sm:$0xff]  }
 0xa34   :  { %v1525_v27 = vpop.permute.xlu1 %1524  ;;  %5101 = vmatprep.subr.bf16.mxu0 %v5348_v4 }
 0xa35   :  { %v1552_v34 = vpack.c.bf16 %v6154_v18, %v6152_v60  ;;  %v1541_v38 = vmul.f32 %v1525_v27, %v6075_v1  ;;  %v6160_v61 = vadd.f32 %v1540_v8, %v1492_v14  ;;  %5102 = vmatpush3.bf16.msra.mxu0 %v5348_v4  ;;  %v1554_v1 = vld [vmem:[%s7120_s2 + $0x12] ss:$0 sm:$0xff] }
 0xa37   :  { %v6162_v32 = vadd.f32 %v1541_v38, %v1493_v62  ;;  %5097 = vmatprep.mubr.msk.bf16.mxu1 %vm470_vm9, %v1552_v34 }
 0xa39   :  { %v1553_v23 = vpack.c.bf16 %v6162_v32, %v6160_v61 }
 0xa3b   :  { %5098 = vmatmul.mubr.msk.bf16.gmra.mrb[44].mxu1 %vm470_vm9, %v1553_v23 }
 0xa3c   :  { %2123 = vmatprep.mubr.bf16.mxu1 %v5694_v0 }
 0xaff   :  { %v5095_v35 = vpop.f32.mrb[40].mxu1 }
 0xb00   :  { %v6172_v3 = vadd.f32 %v5095_v35, %v1554_v1  ;;  %v1607_v63 = vpop.f32.mrb[41].mxu1 }
 0xb01   :  { %v6174_v24 = vadd.f32 %v1607_v63, %v1554_v1  ;;  %v5096_v5 = vpop.f32.mrb[42].mxu1 }
 0xb02   :  { %v1648_v31 = vmul.f32 0.5, %v6172_v3  ;;  %v6177_v7 = vadd.f32 %v5096_v5, %v1554_v1  ;;  %v1610_v9 = vpop.f32.mrb[43].mxu1 }
 0xb03   :  { %v1646_v45 = vmul.f32 0.5, %v6174_v24  ;;  %v6180_v10 = vadd.f32 %v1610_v9, %v1554_v1 }
 0xb04   :  { %5475 = vtanh.f32 %v1648_v31  ;;  %v1649_v11 = vmul.f32 0.5, %v6177_v7 }
 0xb05   :  { %5477 = vtanh.f32 %v1646_v45  ;;  %v1647_v15 = vmul.f32 0.5, %v6180_v10 }
 0xb06   :  { %5479 = vtanh.f32 %v1649_v11 }
 0xb07   :  { %5481 = vtanh.f32 %v1647_v15 }
 0xb0e   :  { %v5476_v6 = vpop.eup %5475  ;;  %v5099_v16 = vpop.f32.mrb[44].mxu1 }
 0xb0f   :  { %v5478_v17 = vpop.eup %5477  ;;  %v6184_v19 = vadd.f32 %v5099_v16, %v1554_v1  ;;  %v1623_v21 = vpop.f32.mrb[45].mxu1  ;;  %v1664_v25 = vmul.f32 0.5, %v5476_v6  ;;  %v1641_v16 = vmax.f32 %v6177_v7, 0.0 }
 0xb10   :  { %v5480_v26 = vpop.eup %5479  ;;  %v6186_v20 = vadd.f32 %v1623_v21, %v1554_v1  ;;  %v5100_v28 = vpop.f32.mrb[46].mxu1  ;;  %v1662_v22 = vmul.f32 0.5, %v5478_v17  ;;  %v1638_v21 = vmax.f32 %v6174_v24, 0.0 }
 0xb11   :  { %v1652_v29 = vmul.f32 0.5, %v6184_v19  ;;  %v6189_v37 = vadd.f32 %v5100_v28, %v1554_v1  ;;  %v1626_v36 = vpop.f32.mrb[47].mxu1  ;;  %v1672_v39 = vadd.f32 0.5, %v1664_v25  ;;  %v5482_v41 = vpop.eup %5481  ;;  %v1665_v52 = vmul.f32 0.5, %v5480_v26 }
 0xb12   :  { %v1650_v40 = vmul.f32 0.5, %v6186_v20  ;;  %v6192_v49 = vadd.f32 %v1626_v36, %v1554_v1  ;;  %v1670_v50 = vadd.f32 0.5, %v1662_v22  ;;  %v1663_v43 = vmul.f32 0.5, %v5482_v41 }
 0xb13   :  { %5483 = vtanh.f32 %v1652_v29  ;;  %v1653_v2 = vmul.f32 0.5, %v6189_v37  ;;  %1690 = vrot.lane.b32.xlu0 %v1672_v39, %s5701_s7  ;;  %v1673_v54 = vadd.f32 0.5, %v1665_v52  ;;  %v1720_v44 = vsub.f32 1.0, %v1672_v39 }
 0xb14   :  { %5485 = vtanh.f32 %v1650_v40  ;;  %v1651_v58 = vmul.f32 0.5, %v6192_v49  ;;  %v1671_v53 = vadd.f32 0.5, %v1663_v43  ;;  %v1718_v48 = vsub.f32 1.0, %v1670_v50 }
 0xb15   :  { %5487 = vtanh.f32 %v1653_v2  ;;  %1692 = vrot.lane.b32.xlu1 %v1673_v54, %s5701_s7  ;;  %v1721_v46 = vsub.f32 1.0, %v1673_v54  ;;  %v1639_v25 = vmax.f32 %v6180_v10, 0.0  ;;  %v1640_v28 = vmax.f32 %v6172_v3, 0.0 }
 0xb16   :  { %5489 = vtanh.f32 %v1651_v58  ;;  %v1719_v59 = vsub.f32 1.0, %v1671_v53  ;;  %v1643_v43 = vmax.f32 %v6192_v49, 0.0 }
 0xb17   :  { %1686 = vrot.lane.b32.xlu0 %v1670_v50, %s5701_s7  ;;  %v1642_v50 = vmax.f32 %v6186_v20, 0.0 }
 0xb19   :  { %1688 = vrot.lane.b32.xlu1 %v1671_v53, %s5701_s7 }
 0xb1b   :  { %1738 = vrot.lane.b32.xlu0 %v1720_v44, %s5701_s7 }
 0xb1d   :  { %v5484_v47 = vpop.eup %5483  ;;  %1740 = vrot.lane.b32.xlu1 %v1721_v46, %s5701_s7 }
 0xb1e   :  { %v5486_v55 = vpop.eup %5485  ;;  %v1668_v56 = vmul.f32 0.5, %v5484_v47 }
 0xb1f   :  { %v5488_v33 = vpop.eup %5487  ;;  %1734 = vrot.lane.b32.xlu0 %v1718_v48, %s5701_s7  ;;  %v1666_v14 = vmul.f32 0.5, %v5486_v55 }
 0xb20   :  { %v1676_v30 = vadd.f32 0.5, %v1668_v56  ;;  %v1669_v8 = vmul.f32 0.5, %v5488_v33  ;;  %v5490_v27 = vpop.eup %5489  ;;  %v1644_v56 = vmax.f32 %v6184_v19, 0.0  ;;  %v1645_v33 = vmax.f32 %v6189_v37, 0.0 }
 0xb21   :  { %1736 = vrot.lane.b32.xlu1 %v1719_v59, %s5701_s7  ;;  %v1667_v34 = vmul.f32 0.5, %v5490_v27  ;;  %v1674_v38 = vadd.f32 0.5, %v1666_v14 }
 0xb22   :  { %v1677_v62 = vadd.f32 0.5, %v1669_v8  ;;  %v1724_v35 = vsub.f32 1.0, %v1676_v30 }
 0xb23   :  { %1698 = vrot.lane.b32.xlu0 %v1676_v30, %s5701_s7  ;;  %v1675_v23 = vadd.f32 0.5, %v1667_v34  ;;  %v1722_v4 = vsub.f32 1.0, %v1674_v38 }
 0xb24   :  { %v1725_v63 = vsub.f32 1.0, %v1677_v62 }
 0xb25   :  { %1700 = vrot.lane.b32.xlu1 %v1677_v62, %s5701_s7  ;;  %v1723_v1 = vsub.f32 1.0, %v1675_v23 }
 0xb27   :  { %1694 = vrot.lane.b32.xlu0 %v1674_v38, %s5701_s7 }
 0xb29   :  { %1696 = vrot.lane.b32.xlu1 %v1675_v23, %s5701_s7 }
 0xb2b   :  { %1742 = vrot.lane.b32.xlu0 %v1722_v4, %s5701_s7 }
 0xb2d   :  { %1744 = vrot.lane.b32.xlu1 %v1723_v1, %s5701_s7 }
 0xb2f   :  { %1746 = vrot.lane.b32.xlu0 %v1724_v35, %s5701_s7 }
 0xb31   :  { %1748 = vrot.lane.b32.xlu1 %v1725_v63, %s5701_s7 }
 0xb85   :  { %v1691_v5 = vpop.permute.xlu0 %1690 }
 0xb86   :  { %v1712_v7 = vmul.f32 %v1691_v5, %v1640_v28 }
 0xb87   :  { %v1693_v31 = vpop.permute.xlu1 %1692 }
 0xb88   :  { %v1713_v29 = vmul.f32 %v1693_v31, %v1641_v16 }
 0xb89   :  { %v1687_v9 = vpop.permute.xlu0 %1686 }
 0xb8a   :  { %v1710_v22 = vmul.f32 %v1687_v9, %v1638_v21 }
 0xb8b   :  { %v1689_v45 = vpop.permute.xlu1 %1688 }
 0xb8c   :  { %v1711_v41 = vmul.f32 %v1689_v45, %v1639_v25 }
 0xb8d   :  { %v1739_v11 = vpop.permute.xlu0 %1738 }
 0xb8e   :  { %v1760_v36 = vmul.f32 %v1739_v11, %v6138_v13 }
 0xb8f   :  { %v1741_v15 = vpop.permute.xlu1 %1740 }
 0xb90   :  { %v1761_v17 = vmul.f32 %v1741_v15, %v6132_v51  ;;  %v6226_v10 = vadd.f32 %v1760_v36, %v1712_v7 }
 0xb91   :  { %v1735_v6 = vpop.permute.xlu0 %1734 }
 0xb92   :  { %v1758_v26 = vmul.f32 %v1735_v6, %v6134_v42  ;;  %v6220_v2 = vadd.f32 %v1761_v17, %v1713_v29 }
 0xb93   :  { %v1737_v39 = vpop.permute.xlu1 %1736 }
 0xb94   :  { %v1759_v40 = vmul.f32 %v1737_v39, %v6136_v57  ;;  %v6222_v51 = vadd.f32 %v1758_v26, %v1710_v22  ;;  %v1775_v58 = vpack.c.bf16 %v6220_v2, %v6226_v10 }
 0xb95   :  { %v1699_v52 = vpop.permute.xlu0 %1698 }
 0xb96   :  { %v6224_v24 = vadd.f32 %v1759_v40, %v1711_v41  ;;  %v1716_v49 = vmul.f32 %v1699_v52, %v1644_v56  ;;  %v6301_v56 = vld [vmem:[#allocation5 + $0x214] ss:$8 sps:$4 sm:$0xff]  }
 0xb97   :  { %v1701_v42 = vpop.permute.xlu1 %1700 }
 0xb98   :  { %v1774_v3 = vpack.c.bf16 %v6224_v24, %v6222_v51  ;;  %v1717_v27 = vmul.f32 %v1701_v42, %v1645_v33  ;;  %v6303_v33 = vld [vmem:[#allocation5 + $0x210] ss:$8 sps:$4 sm:$0xff]  }
 0xb99   :  { %v1695_v13 = vpop.permute.xlu0 %1694 }
 0xb9a   :  { %5103 = vmatprep.mubr.msk.bf16.mxu0 %vm470_vm9, %v1774_v3  ;;  %v1714_v46 = vmul.f32 %v1695_v13, %v1642_v50  ;;  %v5349_v13 = vld [vmem:[#allocation5 + $0x1d0] ss:$8 sps:$4 sm:$0xff]  }
 0xb9b   :  { %5104 = vmatmul.mubr.msk.bf16.vlgmr.msra.gmra.mrb[32].mxu0 %vm470_vm9, %v1775_v58  ;;  %v1697_v57 = vpop.permute.xlu1 %1696  ;;  %v5351_v58 = vld [vmem:[#allocation5 + $0x1d4] ss:$8 sps:$4 sm:$0xff]   ;;  %v6286_v50 = vld [vmem:[#allocation5 + $0x1f0] ss:$8 sps:$4 sm:$0xff]  }
 0xb9c   :  { %v1715_v47 = vmul.f32 %v1697_v57, %v1643_v43  ;;  %v6283_v57 = vld [vmem:[#allocation5 + $0x1f4] ss:$8 sps:$4 sm:$0xff]   ;;  %v5357_v43 = vld [vmem:[#allocation5 + $0x1e4] ss:$8 sps:$4 sm:$0xff]   ;;  %2091 = vmatprep.subr.bf16.mxu1 %v5351_v58 }
 0xb9d   :  { %v1743_v54 = vpop.permute.xlu0 %1742  ;;  %2246 = vmatprep.subr.bf16.mxu0 %v6283_v57  ;;  %2092 = vmatpush1.bf16.msra.mxu1 %v5349_v13  ;;  %v4846_v58 = vld [vmem:[%s7120_s2 + $0x14] ss:$8 sm:$0x3] }
 0xb9e   :  { %v1762_v53 = vmul.f32 %v1743_v54, %v6152_v60  ;;  %2247 = vmatpush1.bf16.msra.mxu0 %v6286_v50  ;;  %2093 = vmatprep.subr.bf16.mxu1 %v5357_v43 }
 0xb9f   :  { %v1745_v44 = vpop.permute.xlu1 %1744 }
 0xba0   :  { %v1763_v48 = vmul.f32 %v1745_v44, %v6154_v18  ;;  %v6240_v59 = vadd.f32 %v1762_v53, %v1714_v46  ;;  %v6289_v53 = vld [vmem:[#allocation5 + $0x204] ss:$8 sps:$4 sm:$0xff]   ;;  %v5355_v46 = vld [vmem:[#allocation5 + $0x1e0] ss:$8 sps:$4 sm:$0xff]  }
 0xba1   :  { %v1747_v55 = vpop.permute.xlu0 %1746  ;;  %2248 = vmatprep.subr.bf16.mxu0 %v6289_v53  ;;  %2094 = vmatpush1.bf16.msra.mxu1 %v5355_v46 }
 0xba2   :  { %v6242_v30 = vadd.f32 %v1763_v48, %v1715_v47  ;;  %v1764_v20 = vmul.f32 %v1747_v55, %v6160_v61  ;;  %v1778_v61 = vld [vmem:[%s7120_s2 + $0x13] ss:$0 sm:$0xff]  ;;  %v6293_v47 = vld [vmem:[#allocation5 + $0x200] ss:$8 sps:$4 sm:$0xff]   ;;  %2391 = vmatprep.subr.bf16.mxu1 %v6283_v57 }
 0xba3   :  { %v1749_v8 = vpop.permute.xlu1 %1748  ;;  %2249 = vmatpush1.bf16.msra.mxu0 %v6293_v47 }
 0xba4   :  { %v1776_v60 = vpack.c.bf16 %v6242_v30, %v6240_v59  ;;  %v1765_v14 = vmul.f32 %v1749_v8, %v6162_v32  ;;  %v6248_v18 = vadd.f32 %v1764_v20, %v1716_v49  ;;  %2250 = vmatprep.subr.bf16.mxu0 %v6301_v56  ;;  %v6307_v20 = vld [vmem:[#allocation5 + $0x224] ss:$8 sps:$4 sm:$0xff]   ;;  %v6309_v8 = vld [vmem:[#allocation5 + $0x220] ss:$8 sps:$4 sm:$0xff]  }
 0xba6   :  { %v6250_v62 = vadd.f32 %v1765_v14, %v1717_v27  ;;  %5107 = vmatprep.mubr.msk.bf16.mxu0 %vm470_vm9, %v1776_v60 }
 0xba7   :  { %2251 = vmatpush1.bf16.msra.mxu0 %v6303_v33 }
 0xba8   :  { %v1777_v19 = vpack.c.bf16 %v6250_v62, %v6248_v18  ;;  %2252 = vmatprep.subr.bf16.mxu0 %v6307_v20 }
 0xbaa   :  { %5108 = vmatmul.mubr.msk.bf16.gmra.mrb[36].mxu0 %vm470_vm9, %v1777_v19 }
 0xbab   :  { %2278 = vmatprep.mubr.bf16.mxu0 %v5694_v0  ;;  %2253 = vmatpush1.bf16.msra.mxu0 %v6309_v8 }
 0xbac   :  { %2319 = vmatprep.subr.bf16.mxu0 %v6283_v57 }
 0xbb2   :  { %2279 = vmatmul.mubr.bf16.vlgmr.msra.gmra.mrb[40].mxu0 %v5694_v0 }
 0xbb3   :  { %2320 = vmatpush1.bf16.msra.mxu0 %v6286_v50  ;;  %2351 = vmatprep.mubr.bf16.mxu0 %v5694_v0 }
 0xbb4   :  { %2321 = vmatprep.subr.bf16.mxu0 %v6289_v53 }
 0xbb7   :  { %2322 = vmatpush1.bf16.msra.mxu0 %v6293_v47 }
 0xbb8   :  { %2323 = vmatprep.subr.bf16.mxu0 %v6301_v56 }
 0xbbb   :  { %2324 = vmatpush1.bf16.msra.mxu0 %v6303_v33 }
 0xbbc   :  { %2325 = vmatprep.subr.bf16.mxu0 %v6307_v20 }
 0xbbf   :  { %2326 = vmatpush1.bf16.msra.mxu0 %v6309_v8 }
 0xbc0   :  { %2463 = vmatprep.subr.bf16.mxu0 %v6283_v57 }
 0xc6e   :  { %v5105_v37 = vpop.f32.mrb[32].mxu0 }
 0xc6f   :  { %v6260_v34 = vadd.f32 %v5105_v37, %v1778_v61  ;;  %v1831_v32 = vpop.f32.mrb[33].mxu0 }
 0xc70   :  { %v5106_v38 = vpop.f32.mrb[34].mxu0  ;;  %v6264_v35 = vadd.f32 %v1831_v32, %v1778_v61 }
 0xc71   :  { %v6262_v23 = vadd.f32 %v5106_v38, %v1778_v61  ;;  %v1834_v4 = vpop.f32.mrb[35].mxu0 }
 0xc72   :  { %v6270_v45 = vadd.f32 %v1834_v4, %v1778_v61  ;;  %v1870_v17 = vmul.f32 0.5, %v6264_v35 }
 0xc74   :  { %v1871_v25 = vmul.f32 0.5, %v6270_v45 }
 0xc7d   :  { %v5109_v1 = vpop.f32.mrb[36].mxu0 }
 0xc7e   :  { %v6266_v63 = vadd.f32 %v5109_v1, %v1778_v61  ;;  %v1847_v5 = vpop.f32.mrb[37].mxu0 }
 0xc7f   :  { %v6268_v31 = vadd.f32 %v1847_v5, %v1778_v61  ;;  %v5110_v9 = vpop.f32.mrb[38].mxu0 }
 0xc80   :  { %v1876_v11 = vmul.f32 0.5, %v6266_v63  ;;  %v6273_v15 = vadd.f32 %v5110_v9, %v1778_v61  ;;  %v1850_v6 = vpop.f32.mrb[39].mxu0  ;;  %v1868_v14 = vmax.f32 %v6266_v63, 0.0 }
 0xc81   :  { %v6275_v16 = vadd.f32 %v1850_v6, %v1778_v61  ;;  %v1863_v6 = vmax.f32 %v6270_v45, 0.0 }
 0xc82   :  { %5491 = vtanh.f32 %v1876_v11  ;;  %v1877_v21 = vmul.f32 0.5, %v6273_v15  ;;  %v1869_v19 = vmax.f32 %v6273_v15, 0.0  ;;  %v1862_v15 = vmax.f32 %v6264_v35, 0.0 }
 0xc84   :  { %5493 = vtanh.f32 %v1877_v21 }
 0xc85   :  { %5495 = vtanh.f32 %v1870_v17 }
 0xc86   :  { %5497 = vtanh.f32 %v1871_v25 }
 0xc8c   :  { %v5492_v26 = vpop.eup %5491 }
 0xc8d   :  { %v1892_v28 = vmul.f32 0.5, %v5492_v26 }
 0xc8e   :  { %v5494_v29 = vpop.eup %5493 }
 0xc8f   :  { %v1900_v36 = vadd.f32 0.5, %v1892_v28  ;;  %v1893_v39 = vmul.f32 0.5, %v5494_v29  ;;  %v5496_v22 = vpop.eup %5495 }
 0xc90   :  { %v5498_v40 = vpop.eup %5497  ;;  %v1886_v7 = vmul.f32 0.5, %v5496_v22 }
 0xc91   :  { %1922 = vrot.lane.b32.xlu0 %v1900_v36, %s5701_s7  ;;  %v1901_v41 = vadd.f32 0.5, %v1893_v39  ;;  %v1948_v52 = vsub.f32 1.0, %v1900_v36  ;;  %v1887_v3 = vmul.f32 0.5, %v5498_v40 }
 0xc92   :  { %v1894_v54 = vadd.f32 0.5, %v1886_v7  ;;  %v2050_v7 = vshrl.u32 %v37_v12, 7 }
 0xc93   :  { %1924 = vrot.lane.b32.xlu1 %v1901_v41, %s5701_s7  ;;  %v1949_v42 = vsub.f32 1.0, %v1901_v41  ;;  %v1895_v44 = vadd.f32 0.5, %v1887_v3  ;;  %v4855_v3 = vld [vmem:[%s7120_s2 + $0x15] ss:$8 sm:$0x3] }
 0xc94   :  { %v1942_v48 = vsub.f32 1.0, %v1894_v54  ;;  %v6363_v13 = vsub.s32 1, %v2050_v7 }
 0xc95   :  { %1970 = vrot.lane.b32.xlu0 %v1948_v52, %s5701_s7  ;;  %v1943_v55 = vsub.f32 1.0, %v1895_v44 }
 0xc96   :  { %v6375_v12 = vrot.slane %v4846_v58, %v6363_v13 }
 0xc97   :  { %1972 = vrot.lane.b32.xlu1 %v1949_v42, %s5701_s7  ;;  %v6358_v42 = vsub.s32 0, %v2050_v7 }
 0xc99   :  { %1910 = vrot.lane.b32.xlu0 %v1894_v54, %s5701_s7  ;;  %v6369_v54 = vrot.slane %v4855_v3, %v6358_v42  ;;  %v6372_v43 = vrot.slane %v4846_v58, %v6358_v42 }
 0xc9b   :  { %1912 = vrot.lane.b32.xlu1 %v1895_v44, %s5701_s7 }
 0xc9d   :  { %1958 = vrot.lane.b32.xlu0 %v1942_v48, %s5701_s7 }
 0xc9f   :  { %1960 = vrot.lane.b32.xlu1 %v1943_v55, %s5701_s7 }
 0xd03   :  { %v1923_v49 = vpop.permute.xlu0 %1922 }
 0xd04   :  { %v1940_v32 = vmul.f32 %v1923_v49, %v1868_v14 }
 0xd05   :  { %v1925_v27 = vpop.permute.xlu1 %1924 }
 0xd06   :  { %v1941_v38 = vmul.f32 %v1925_v27, %v1869_v19 }
 0xd07   :  { %v1971_v60 = vpop.permute.xlu0 %1970 }
 0xd08   :  { %v1988_v61 = vmul.f32 %v1971_v60, %v6248_v18 }
 0xd09   :  { %v1973_v37 = vpop.permute.xlu1 %1972 }
 0xd0a   :  { %v1989_v4 = vmul.f32 %v1973_v37, %v6250_v62  ;;  %v6322_v1 = vadd.f32 %v1988_v61, %v1940_v32  ;;  %v6387_v32 = vrot.slane %v4855_v3, %v6363_v13 }
 0xd0b   :  { %v1911_v62 = vpop.permute.xlu0 %1910 }
 0xd0c   :  { %v6324_v5 = vadd.f32 %v1989_v4, %v1941_v38  ;;  %v1934_v25 = vmul.f32 %v1911_v62, %v1862_v15  ;;  %v1874_v4 = vmul.f32 0.5, %v6268_v31 }
 0xd0d   :  { %v1913_v63 = vpop.permute.xlu1 %1912 }
 0xd0e   :  { %v5260_v18 = vpack.i.bf16 %v6322_v1, %v6324_v5  ;;  %v1935_v26 = vmul.f32 %v1913_v63, %v1863_v6  ;;  %v1872_v6 = vmul.f32 0.5, %v6260_v34 }
 0xd0f   :  { %v1959_v9 = vpop.permute.xlu0 %1958 }
 0xd10   :  { %5261 = vrot.lane.b32.xlu0 %v5260_v18, %s5696_s17  ;;  %v1982_v17 = vmul.f32 %v1959_v9, %v6222_v51  ;;  %v2280_v51 = vpop.f32.mrb[40].mxu0 }
 0xd11   :  { %v1961_v11 = vpop.permute.xlu1 %1960  ;;  %v2281_v44 = vadd.f32 %v2280_v51, %v6369_v54  ;;  %v1873_v51 = vmul.f32 0.5, %v6262_v23 }
 0xd12   :  { %v1983_v21 = vmul.f32 %v1961_v11, %v6224_v24  ;;  %v6339_v29 = vadd.f32 %v1982_v17, %v1934_v25  ;;  %v2282_v24 = vpop.f32.mrb[41].mxu0 }
 0xd13   :  { %v2284_v40 = vpop.f32.mrb[42].mxu0  ;;  %v2283_v63 = vadd.f32 %v2282_v24, %v6387_v32 }
 0xd14   :  { %v6341_v36 = vadd.f32 %v1983_v21, %v1935_v26  ;;  %v2285_v52 = vpop.f32.mrb[43].mxu0 }
 0xd82   :  { %v5262_v28 = vpop.permute.xlu0 %5261 }
 0xd83   :  { %v5264_v39 = vunpack.i.h.bf16 %v5262_v28  ;;  %v5263_v22 = vunpack.i.l.bf16 %v5262_v28 }
 0xd85   :  { %v2031_v41 = vsel %vm470_vm9, %v6341_v36, %v5264_v39  ;;  %v2030_v35 = vsel %vm470_vm9, %v6339_v29, %v5263_v22 }
 0xd86   :  { %v2038_v45 = vpack.c.bf16 %v2031_v41, %v2030_v35 }
 0xd88   :  { %4851 = vmatmul.mubr.msk.bf16.vlgmr.msra.gmra.mrb[48].mxu1 %vm99_vm4, %v2038_v45  ;;  %v1875_v45 = vmul.f32 0.5, %v6275_v16 }
 0xd89   :  { %2133 = vmatprep.mubr.bf16.mxu1 %v5694_v0  ;;  %2392 = vmatpush1.bf16.msra.mxu1 %v6286_v50 }
 0xd8a   :  { %2393 = vmatprep.subr.bf16.mxu1 %v6289_v53 }
 0xd8d   :  { %2394 = vmatpush1.bf16.msra.mxu1 %v6293_v47 }
 0xd8e   :  { %2395 = vmatprep.subr.bf16.mxu1 %v6301_v56 }
 0xd91   :  { %2396 = vmatpush1.bf16.msra.mxu1 %v6303_v33 }
 0xd92   :  { %2397 = vmatprep.subr.bf16.mxu1 %v6307_v20 }
 0xd95   :  { %2398 = vmatpush1.bf16.msra.mxu1 %v6309_v8 }
 0xd96   :  { %2535 = vmatprep.subr.bf16.mxu1 %v6283_v57 }
 0xe5b   :  { %v2125_v46 = vpop.f32.mrb[48].mxu1 }
 0xe5c   :  { %v2126_v48 = vadd.f32 %v2125_v46, %v6372_v43  ;;  %v2127_v55 = vpop.f32.mrb[49].mxu1 }
 0xe5d   :  { %v2128_v49 = vadd.f32 %v2127_v55, %v6375_v12  ;;  %v2129_v27 = vpop.f32.mrb[50].mxu1 }
 0xe5e   :  { %v6381_v60 = vadd.f32 %v2129_v27, %v6372_v43  ;;  %v2131_v14 = vpop.f32.mrb[51].mxu1  ;;  %v2287_v19 = vadd.f32 %v2281_v44, %v2126_v48 }
 0xe5f   :  { %2165 = vst.msk [vmem:[#allocation3 + $0x8] sm:$0xff] %vm532_vm11, %v2128_v49  ;;  %v2132_v61 = vadd.f32 %v2131_v14, %v6375_v12 }
 0xe60   :  { %v2288_v37 = vmul.f32 0.5, %v2287_v19 }
 0xe61   :  { %2167 = vst.msk [vmem:[#allocation3 + $0x18] sm:$0xff] %vm532_vm11, %v2132_v61 }
 0xe62   :  { %5499 = vtanh.f32 %v2288_v37 }
 0xe63   :  { %5501 = vtanh.f32 %v1874_v4 }
 0xe66   :  { %v2191_v11 = vld [vmem:[#allocation3 + $0x8] sm:$0xff] }
 0xe6c   :  { %v5500_v38 = vpop.eup %5499 }
 0xe6d   :  { %v2290_v18 = vmul.f32 0.5, %v5500_v38  ;;  %v5502_v17 = vpop.eup %5501 }
 0xe6e   :  { %v1890_v21 = vmul.f32 0.5, %v5502_v17 }
 0xe6f   :  { %v2291_v62 = vadd.f32 0.5, %v2290_v18  ;;  %v1866_v18 = vmax.f32 %v6268_v31, 0.0 }
 0xe70   :  { %v1898_v26 = vadd.f32 0.5, %v1890_v21 }
 0xe71   :  { %v2292_v9 = vmul.f32 %v2291_v62, %v2283_v63  ;;  %v2295_v24 = vsub.f32 1.0, %v2291_v62  ;;  %v2301_v52 = vmul.f32 0.0, %v2291_v62  ;;  %v1867_v63 = vmax.f32 %v6275_v16, 0.0 }
 0xe72   :  { %v1946_v39 = vsub.f32 1.0, %v1898_v26 }
 0xe73   :  { %v2293_v15 = vadd.f32 %v2292_v9, %v2191_v11 }
 0xe75   :  { %5503 = vtanh.f32 %v2293_v15 }
 0xe76   :  { %5505 = vtanh.f32 %v1872_v6 }
 0xe77   :  { %5507 = vtanh.f32 %v1875_v45 }
 0xe78   :  { %5509 = vtanh.f32 %v1873_v51 }
 0xe7f   :  { %v5504_v25 = vpop.eup %5503 }
 0xe80   :  { %2297 = vrot.lane.b32.xlu1 %v5504_v25, %s5699_s24  ;;  %v5506_v28 = vpop.eup %5505 }
 0xe81   :  { %v1888_v22 = vmul.f32 0.5, %v5506_v28  ;;  %v5508_v3 = vpop.eup %5507  ;;  %v1864_v28 = vmax.f32 %v6260_v34, 0.0 }
 0xe82   :  { %v1891_v46 = vmul.f32 0.5, %v5508_v3  ;;  %v5510_v55 = vpop.eup %5509 }
 0xe83   :  { %v1896_v41 = vadd.f32 0.5, %v1888_v22  ;;  %v1889_v27 = vmul.f32 0.5, %v5510_v55  ;;  %v1865_v22 = vmax.f32 %v6262_v23, 0.0 }
 0xe84   :  { %1918 = vrot.lane.b32.xlu1 %v1898_v26, %s5701_s7  ;;  %v1899_v48 = vadd.f32 0.5, %v1891_v46 }
 0xe85   :  { %v1944_v35 = vsub.f32 1.0, %v1896_v41  ;;  %v1897_v14 = vadd.f32 0.5, %v1889_v27 }
 0xe86   :  { %v1947_v49 = vsub.f32 1.0, %v1899_v48 }
 0xe87   :  { %v1945_v19 = vsub.f32 1.0, %v1897_v14 }
 0xe88   :  { %1966 = vrot.lane.b32.xlu1 %v1946_v39, %s5701_s7 }
 0xe8c   :  { %1914 = vrot.lane.b32.xlu1 %v1896_v41, %s5701_s7 }
 0xe90   :  { %1962 = vrot.lane.b32.xlu1 %v1944_v35, %s5701_s7 }
 0xef2   :  { %v2298_v40 = vpop.permute.xlu1 %2297 }
 0xef3   :  { %v2300_v7 = vmul.f32 %v2298_v40, %v2295_v24 }
 0xef5   :  { %v6399_v58 = vadd.f32 %v2301_v52, %v2300_v7 }
 0xef6   :  { %v1919_v61 = vpop.permute.xlu1 %1918 }
 0xef7   :  { %v2312_v44 = vpack.c.bf16 %v6399_v58, %v6399_v58  ;;  %v1938_v11 = vmul.f32 %v1919_v61, %v1866_v18  ;;  %v2311_v61 = vld [vmem:[#allocation3 + $0x18] sm:$0xff] }
 0xef9   :  { %2314 = vrot.lane.b32.xlu0 %v2312_v44, %s5699_s24 }
 0xefa   :  { %v1967_v38 = vpop.permute.xlu1 %1966 }
 0xefb   :  { %v1986_v62 = vmul.f32 %v1967_v38, %v6240_v59 }
 0xefd   :  { %1920 = vrot.lane.b32.xlu0 %v1899_v48, %s5701_s7  ;;  %v6419_v17 = vadd.f32 %v1986_v62, %v1938_v11 }
 0xefe   :  { %v1915_v31 = vpop.permute.xlu1 %1914 }
 0xeff   :  { %v1936_v35 = vmul.f32 %v1915_v31, %v1864_v28 }
 0xf01   :  { %1968 = vrot.lane.b32.xlu0 %v1947_v49, %s5701_s7 }
 0xf02   :  { %v1963_v25 = vpop.permute.xlu1 %1962 }
 0xf03   :  { %v1984_v39 = vmul.f32 %v1963_v25, %v6226_v10 }
 0xf05   :  { %1916 = vrot.lane.b32.xlu0 %v1897_v14, %s5701_s7  ;;  %v1992_v24 = vadd.f32 %v1984_v39, %v1936_v35 }
 0xf09   :  { %1964 = vrot.lane.b32.xlu0 %v1945_v19, %s5701_s7 }
 0xf6b   :  { %v2315_v37 = vpop.permute.xlu0 %2314 }
 0xf6c   :  { %4864 = vmatmul.mubr.msk.bf16.vlgmr.msra.gmra.mrb[44].mxu0 %vm532_vm11, %v2315_v37 }
 0xf6d   :  { %2464 = vmatpush1.bf16.msra.mxu0 %v6286_v50  ;;  %2495 = vmatprep.mubr.bf16.mxu0 %v5694_v0 }
 0xf6e   :  { %2465 = vmatprep.subr.bf16.mxu0 %v6289_v53 }
 0xf6f   :  { %v1921_v4 = vpop.permute.xlu0 %1920 }
 0xf70   :  { %v1939_v15 = vmul.f32 %v1921_v4, %v1867_v63 }
 0xf71   :  { %2466 = vmatpush1.bf16.msra.mxu0 %v6293_v47 }
 0xf72   :  { %2467 = vmatprep.subr.bf16.mxu0 %v6301_v56 }
 0xf73   :  { %v1969_v9 = vpop.permute.xlu0 %1968 }
 0xf74   :  { %v1987_v6 = vmul.f32 %v1969_v9, %v6242_v30  ;;  %v5275_v30 = vpack.i.bf16 %v6339_v29, %v6341_v36 }
 0xf75   :  { %2468 = vmatpush1.bf16.msra.mxu0 %v6303_v33 }
 0xf76   :  { %v6421_v21 = vadd.f32 %v1987_v6, %v1939_v15  ;;  %2469 = vmatprep.subr.bf16.mxu0 %v6307_v20 }
 0xf77   :  { %v1917_v16 = vpop.permute.xlu0 %1916 }
 0xf78   :  { %v5265_v59 = vpack.i.bf16 %v6419_v17, %v6421_v21  ;;  %v1937_v45 = vmul.f32 %v1917_v16, %v1865_v22 }
 0xf79   :  { %2470 = vmatpush1.bf16.msra.mxu0 %v6309_v8 }
 0xf7a   :  { %5266 = vrot.lane.b32.xlu0 %v5265_v59, %s5696_s17  ;;  %2607 = vmatprep.subr.bf16.mxu0 %v6283_v57 }
 0xf7b   :  { %v1965_v26 = vpop.permute.xlu0 %1964 }
 0xf7c   :  { %v1985_v41 = vmul.f32 %v1965_v26, %v6220_v2 }
 0xf7e   :  { %5276 = vrot.lane.b32.xlu0 %v5275_v30, %s5696_s17  ;;  %v1993_v40 = vadd.f32 %v1985_v41, %v1937_v45 }
 0xf80   :  { %v5270_v4 = vpack.i.bf16 %v1992_v24, %v1993_v40 }
 0xfec   :  { %v5267_v51 = vpop.permute.xlu0 %5266 }
 0xfed   :  { %v5269_v29 = vunpack.i.h.bf16 %v5267_v51  ;;  %v5268_v36 = vunpack.i.l.bf16 %v5267_v51 }
 0xfef   :  { %v2033_v52 = vsel %vm470_vm9, %v1993_v40, %v5269_v29  ;;  %v2032_v7 = vsel %vm470_vm9, %v1992_v24, %v5268_v36 }
 0xff0   :  { %v2039_v3 = vpack.c.bf16 %v2033_v52, %v2032_v7  ;;  %v5277_v41 = vpop.permute.xlu0 %5276 }
 0xff1   :  { %v5279_v24 = vunpack.i.h.bf16 %v5277_v41  ;;  %v5278_v40 = vunpack.i.l.bf16 %v5277_v41 }
 0xff2   :  { %4852 = vmatmul.mubr.msk.bf16.gmra.mrb[52].mxu1 %vm99_vm4, %v2039_v3 }
 0xff3   :  { %2143 = vmatprep.mubr.bf16.mxu1 %v5694_v0  ;;  %v2037_v29 = vsel %vm470_vm9, %v6324_v5, %v5279_v24  ;;  %v2036_v36 = vsel %vm470_vm9, %v6322_v1, %v5278_v40 }
 0xff4   :  { %v2041_v52 = vpack.c.bf16 %v2037_v29, %v2036_v36 }
0x103f   :  { %v2353_v10 = vpop.f32.mrb[44].mxu0 }
0x1040   :  { %v2354_v34 = vadd.f32 %v2353_v10, %v6369_v54  ;;  %v2355_v2 = vpop.f32.mrb[45].mxu0 }
0x1041   :  { %v2357_v23 = vpop.f32.mrb[46].mxu0  ;;  %v2356_v14 = vadd.f32 %v2355_v2, %v6387_v32 }
0x1042   :  { %v2360_v44 = vadd.f32 %v2354_v34, %v6381_v60  ;;  %v2358_v46 = vpop.f32.mrb[47].mxu0 }
0x1044   :  { %v2361_v48 = vmul.f32 0.5, %v2360_v44 }
0x1046   :  { %5511 = vtanh.f32 %v2361_v48 }
0x1050   :  { %v5512_v55 = vpop.eup %5511 }
0x1051   :  { %v2363_v49 = vmul.f32 0.5, %v5512_v55 }
0x1053   :  { %v2364_v27 = vadd.f32 0.5, %v2363_v49 }
0x1055   :  { %v2365_v19 = vmul.f32 %v2364_v27, %v2356_v14  ;;  %v2368_v59 = vsub.f32 1.0, %v2364_v27  ;;  %v2374_v31 = vmul.f32 %v2364_v27, %v6399_v58 }
0x1057   :  { %v2366_v37 = vadd.f32 %v2365_v19, %v2311_v61 }
0x1059   :  { %5513 = vtanh.f32 %v2366_v37 }
0x1063   :  { %v5514_v38 = vpop.eup %5513 }
0x1064   :  { %2370 = vrot.lane.b32.xlu1 %v5514_v38, %s5699_s24 }
0x1068   :  { %5271 = vrot.lane.b32.xlu1 %v5270_v4, %s5696_s17 }
0x10c5   :  { %v2135_v18 = vpop.f32.mrb[52].mxu1 }
0x10c6   :  { %v6446_v60 = vadd.f32 %v2135_v18, %v6372_v43  ;;  %v2137_v62 = vpop.f32.mrb[53].mxu1 }
0x10c7   :  { %v2138_v63 = vadd.f32 %v2137_v62, %v6375_v12  ;;  %v2139_v9 = vpop.f32.mrb[54].mxu1 }
0x10c8   :  { %v6450_v11 = vadd.f32 %v2139_v9, %v6372_v43  ;;  %v2141_v15 = vpop.f32.mrb[55].mxu1 }
0x10c9   :  { %2169 = vst.msk [vmem:[#allocation3 + $0x28] sm:$0xff] %vm532_vm11, %v2138_v63  ;;  %v2142_v6 = vadd.f32 %v2141_v15, %v6375_v12 }
0x10cb   :  { %2171 = vst.msk [vmem:[#allocation3 + $0x38] sm:$0xff] %vm532_vm11, %v2142_v6 }
0x10d6   :  { %v2371_v30 = vpop.permute.xlu1 %2370 }
0x10d7   :  { %v2373_v16 = vmul.f32 %v2371_v30, %v2368_v59  ;;  %v2383_v59 = vld [vmem:[#allocation3 + $0x28] sm:$0xff] }
0x10d9   :  { %v6456_v25 = vadd.f32 %v2374_v31, %v2373_v16 }
0x10da   :  { %v5272_v26 = vpop.permute.xlu1 %5271 }
0x10db   :  { %v2384_v28 = vpack.c.bf16 %v6456_v25, %v6456_v25  ;;  %v5274_v39 = vunpack.i.h.bf16 %v5272_v26  ;;  %v5273_v22 = vunpack.i.l.bf16 %v5272_v26 }
0x10dd   :  { %v2035_v35 = vsel %vm470_vm9, %v6421_v21, %v5274_v39  ;;  %v2034_v45 = vsel %vm470_vm9, %v6419_v17, %v5273_v22  ;;  %2386 = vrot.lane.b32.xlu1 %v2384_v28, %s5699_s24 }
0x10de   :  { %v2040_v51 = vpack.c.bf16 %v2035_v35, %v2034_v45 }
0x10e0   :  { %4853 = vmatmul.mubr.msk.bf16.gmra.mrb[56].mxu1 %vm99_vm4, %v2040_v51 }
0x10e1   :  { %2153 = vmatprep.mubr.bf16.mxu1 %v5694_v0 }
0x10e8   :  { %4854 = vmatmul.mubr.msk.bf16.gmra.mrb[60].mxu1 %vm99_vm4, %v2041_v52 }
0x10e9   :  { %2423 = vmatprep.mubr.bf16.mxu1 %v5694_v0 }
0x114f   :  { %v2387_v17 = vpop.permute.xlu1 %2386 }
0x1150   :  { %4865 = vmatmul.mubr.msk.bf16.vlgmr.msra.gmra.mrb[64].mxu1 %vm532_vm11, %v2387_v17 }
0x1151   :  { %2536 = vmatpush1.bf16.msra.mxu1 %v6286_v50  ;;  %2567 = vmatprep.mubr.bf16.mxu1 %v5694_v0 }
0x1152   :  { %2537 = vmatprep.subr.bf16.mxu1 %v6289_v53 }
0x1155   :  { %2538 = vmatpush1.bf16.msra.mxu1 %v6293_v47 }
0x1156   :  { %2539 = vmatprep.subr.bf16.mxu1 %v6301_v56 }
0x1159   :  { %2540 = vmatpush1.bf16.msra.mxu1 %v6303_v33 }
0x115a   :  { %2541 = vmatprep.subr.bf16.mxu1 %v6307_v20 }
0x115d   :  { %2542 = vmatpush1.bf16.msra.mxu1 %v6309_v8 }
0x115e   :  { %2679 = vmatprep.subr.bf16.mxu1 %v6283_v57 }
0x11b3   :  { %v2145_v1 = vpop.f32.mrb[56].mxu1 }
0x11b4   :  { %v6484_v5 = vadd.f32 %v2145_v1, %v6372_v43  ;;  %v2147_v21 = vpop.f32.mrb[57].mxu1 }
0x11b5   :  { %v2148_v7 = vadd.f32 %v2147_v21, %v6375_v12  ;;  %v2149_v3 = vpop.f32.mrb[58].mxu1 }
0x11b6   :  { %v6488_v10 = vadd.f32 %v2149_v3, %v6372_v43  ;;  %v2151_v34 = vpop.f32.mrb[59].mxu1 }
0x11b7   :  { %2173 = vst.msk [vmem:[#allocation3 + $0x48] sm:$0xff] %vm532_vm11, %v2148_v7  ;;  %v2152_v2 = vadd.f32 %v2151_v34, %v6375_v12  ;;  %v2455_v7 = vld [vmem:[#allocation3 + $0x38] sm:$0xff] }
0x11b9   :  { %2175 = vst.msk [vmem:[#allocation3 + $0x58] sm:$0xff] %vm532_vm11, %v2152_v2 }
0x11bb   :  { %v2155_v23 = vpop.f32.mrb[60].mxu1 }
0x11bc   :  { %v6494_v44 = vadd.f32 %v2155_v23, %v6372_v43  ;;  %v2157_v46 = vpop.f32.mrb[61].mxu1 }
0x11bd   :  { %v2158_v48 = vadd.f32 %v2157_v46, %v6375_v12  ;;  %v2159_v55 = vpop.f32.mrb[62].mxu1 }
0x11be   :  { %v6498_v49 = vadd.f32 %v2159_v55, %v6372_v43  ;;  %v2161_v27 = vpop.f32.mrb[63].mxu1 }
0x11bf   :  { %2177 = vst.msk [vmem:[#allocation3 + $0x68] sm:$0xff] %vm532_vm11, %v2158_v48  ;;  %v2162_v14 = vadd.f32 %v2161_v27, %v6375_v12 }
0x11c1   :  { %2179 = vst.msk [vmem:[#allocation3 + $0x78] sm:$0xff] %vm532_vm11, %v2162_v14 }
0x1223   :  { %v2425_v19 = vpop.f32.mrb[64].mxu1 }
0x1224   :  { %v2426_v61 = vadd.f32 %v2425_v19, %v6369_v54  ;;  %v2427_v37 = vpop.f32.mrb[65].mxu1 }
0x1225   :  { %v2429_v38 = vpop.f32.mrb[66].mxu1  ;;  %v2428_v15 = vadd.f32 %v2427_v37, %v6387_v32 }
0x1226   :  { %v2432_v4 = vadd.f32 %v2426_v61, %v6446_v60  ;;  %v2430_v18 = vpop.f32.mrb[67].mxu1 }
0x1228   :  { %v2433_v62 = vmul.f32 0.5, %v2432_v4 }
0x122a   :  { %5515 = vtanh.f32 %v2433_v62 }
0x1234   :  { %v5516_v63 = vpop.eup %5515 }
0x1235   :  { %v2435_v43 = vmul.f32 0.5, %v5516_v63 }
0x1237   :  { %v2436_v9 = vadd.f32 0.5, %v2435_v43 }
0x1239   :  { %v2437_v6 = vmul.f32 %v2436_v9, %v2428_v15  ;;  %v2440_v31 = vsub.f32 1.0, %v2436_v9  ;;  %v2446_v26 = vmul.f32 %v2436_v9, %v6456_v25  ;;  %v2527_v15 = vld [vmem:[#allocation3 + $0x48] sm:$0xff] }
0x123b   :  { %v2438_v12 = vadd.f32 %v2437_v6, %v2383_v59 }
0x123d   :  { %5517 = vtanh.f32 %v2438_v12 }
0x1247   :  { %v5518_v30 = vpop.eup %5517 }
0x1248   :  { %2442 = vrot.lane.b32.xlu0 %v5518_v30, %s5699_s24 }
0x12ba   :  { %v2443_v16 = vpop.permute.xlu0 %2442 }
0x12bb   :  { %v2445_v60 = vmul.f32 %v2443_v16, %v2440_v31 }
0x12bd   :  { %v6508_v28 = vadd.f32 %v2446_v26, %v2445_v60 }
0x12bf   :  { %v2456_v39 = vpack.c.bf16 %v6508_v28, %v6508_v28 }
0x12c1   :  { %2458 = vrot.lane.b32.xlu1 %v2456_v39, %s5699_s24 }
0x1333   :  { %v2459_v22 = vpop.permute.xlu1 %2458 }
0x1334   :  { %4866 = vmatmul.mubr.msk.bf16.vlgmr.msra.gmra.mrb[48].mxu0 %vm532_vm11, %v2459_v22 }
0x1335   :  { %2608 = vmatpush1.bf16.msra.mxu0 %v6286_v50  ;;  %2639 = vmatprep.mubr.bf16.mxu0 %v5694_v0 }
0x1336   :  { %2609 = vmatprep.subr.bf16.mxu0 %v6289_v53 }
0x1339   :  { %2610 = vmatpush1.bf16.msra.mxu0 %v6293_v47 }
0x133a   :  { %2611 = vmatprep.subr.bf16.mxu0 %v6301_v56 }
0x133d   :  { %2612 = vmatpush1.bf16.msra.mxu0 %v6303_v33 }
0x133e   :  { %2613 = vmatprep.subr.bf16.mxu0 %v6307_v20 }
0x1341   :  { %2614 = vmatpush1.bf16.msra.mxu0 %v6309_v8 }
0x1342   :  { %2751 = vmatprep.subr.bf16.mxu0 %v6283_v57 }
0x1407   :  { %v2497_v41 = vpop.f32.mrb[48].mxu0 }
0x1408   :  { %v2498_v35 = vadd.f32 %v2497_v41, %v6369_v54  ;;  %v2499_v45 = vpop.f32.mrb[49].mxu0 }
0x1409   :  { %v2501_v51 = vpop.f32.mrb[50].mxu0  ;;  %v2500_v1 = vadd.f32 %v2499_v45, %v6387_v32 }
0x140a   :  { %v2504_v24 = vadd.f32 %v2498_v35, %v6450_v11  ;;  %v2502_v40 = vpop.f32.mrb[51].mxu0 }
0x140b   :  { %v2599_v40 = vld [vmem:[#allocation3 + $0x58] sm:$0xff] }
0x140c   :  { %v2505_v29 = vmul.f32 0.5, %v2504_v24 }
0x140e   :  { %5519 = vtanh.f32 %v2505_v29 }
0x1418   :  { %v5520_v36 = vpop.eup %5519 }
0x1419   :  { %v2507_v52 = vmul.f32 0.5, %v5520_v36 }
0x141b   :  { %v2508_v17 = vadd.f32 0.5, %v2507_v52 }
0x141d   :  { %v2509_v21 = vmul.f32 %v2508_v17, %v2500_v1  ;;  %v2512_v34 = vsub.f32 1.0, %v2508_v17  ;;  %v2518_v23 = vmul.f32 %v2508_v17, %v6508_v28 }
0x141f   :  { %v2510_v3 = vadd.f32 %v2509_v21, %v2455_v7 }
0x1421   :  { %5521 = vtanh.f32 %v2510_v3 }
0x142b   :  { %v5522_v57 = vpop.eup %5521 }
0x142c   :  { %2514 = vrot.lane.b32.xlu0 %v5522_v57, %s5699_s24 }
0x149e   :  { %v2515_v2 = vpop.permute.xlu0 %2514 }
0x149f   :  { %v2517_v11 = vmul.f32 %v2515_v2, %v2512_v34 }
0x14a1   :  { %v6528_v46 = vadd.f32 %v2518_v23, %v2517_v11 }
0x14a3   :  { %v2528_v48 = vpack.c.bf16 %v6528_v46, %v6528_v46 }
0x14a5   :  { %2530 = vrot.lane.b32.xlu1 %v2528_v48, %s5699_s24 }
0x1517   :  { %v2531_v55 = vpop.permute.xlu1 %2530 }
0x1518   :  { %4867 = vmatmul.mubr.msk.bf16.vlgmr.msra.gmra.mrb[68].mxu1 %vm532_vm11, %v2531_v55 }
0x1519   :  { %2680 = vmatpush1.bf16.msra.mxu1 %v6286_v50  ;;  %2711 = vmatprep.mubr.bf16.mxu1 %v5694_v0 }
0x151a   :  { %2681 = vmatprep.subr.bf16.mxu1 %v6289_v53 }
0x151d   :  { %2682 = vmatpush1.bf16.msra.mxu1 %v6293_v47 }
0x151e   :  { %2683 = vmatprep.subr.bf16.mxu1 %v6301_v56 }
0x1521   :  { %2684 = vmatpush1.bf16.msra.mxu1 %v6303_v33 }
0x1522   :  { %2685 = vmatprep.subr.bf16.mxu1 %v6307_v20 }
0x1525   :  { %2686 = vmatpush1.bf16.msra.mxu1 %v6309_v8 }
0x15eb   :  { %v2569_v27 = vpop.f32.mrb[68].mxu1 }
0x15ec   :  { %v2570_v14 = vadd.f32 %v2569_v27, %v6369_v54  ;;  %v2571_v19 = vpop.f32.mrb[69].mxu1 }
0x15ed   :  { %v2573_v61 = vpop.f32.mrb[70].mxu1  ;;  %v2572_v43 = vadd.f32 %v2571_v19, %v6387_v32 }
0x15ee   :  { %v2576_v37 = vadd.f32 %v2570_v14, %v6484_v5  ;;  %v2574_v38 = vpop.f32.mrb[71].mxu1  ;;  %v2671_v61 = vld [vmem:[#allocation3 + $0x68] sm:$0xff] }
0x15f0   :  { %v2577_v4 = vmul.f32 0.5, %v2576_v37 }
0x15f2   :  { %5523 = vtanh.f32 %v2577_v4 }
0x15fc   :  { %v5524_v18 = vpop.eup %5523 }
0x15fd   :  { %v2579_v62 = vmul.f32 0.5, %v5524_v18 }
0x15ff   :  { %v2580_v63 = vadd.f32 0.5, %v2579_v62 }
0x1601   :  { %v2581_v9 = vmul.f32 %v2580_v63, %v2572_v43  ;;  %v2584_v12 = vsub.f32 1.0, %v2580_v63  ;;  %v2590_v31 = vmul.f32 %v2580_v63, %v6528_v46 }
0x1603   :  { %v2582_v6 = vadd.f32 %v2581_v9, %v2527_v15 }
0x1605   :  { %5525 = vtanh.f32 %v2582_v6 }
0x160f   :  { %v5526_v59 = vpop.eup %5525 }
0x1610   :  { %2586 = vrot.lane.b32.xlu0 %v5526_v59, %s5699_s24 }
0x1682   :  { %v2587_v30 = vpop.permute.xlu0 %2586 }
0x1683   :  { %v2589_v5 = vmul.f32 %v2587_v30, %v2584_v12 }
0x1685   :  { %v6547_v16 = vadd.f32 %v2590_v31, %v2589_v5 }
0x1687   :  { %v2600_v26 = vpack.c.bf16 %v6547_v16, %v6547_v16 }
0x1689   :  { %2602 = vrot.lane.b32.xlu1 %v2600_v26, %s5699_s24 }
0x16fb   :  { %v2603_v60 = vpop.permute.xlu1 %2602 }
0x16fc   :  { %4868 = vmatmul.mubr.msk.bf16.vlgmr.msra.gmra.mrb[52].mxu0 %vm532_vm11, %v2603_v60 }
0x16fd   :  { %2752 = vmatpush1.bf16.msra.mxu0 %v6286_v50  ;;  %2783 = vmatprep.mubr.bf16.mxu0 %v5694_v0 }
0x16fe   :  { %2753 = vmatprep.subr.bf16.mxu0 %v6289_v53 }
0x1701   :  { %2754 = vmatpush1.bf16.msra.mxu0 %v6293_v47 }
0x1702   :  { %2755 = vmatprep.subr.bf16.mxu0 %v6301_v56 }
0x1705   :  { %2756 = vmatpush1.bf16.msra.mxu0 %v6303_v33 }
0x1706   :  { %2757 = vmatprep.subr.bf16.mxu0 %v6307_v20 }
0x1709   :  { %2758 = vmatpush1.bf16.msra.mxu0 %v6309_v8 }
0x17cf   :  { %v2641_v39 = vpop.f32.mrb[52].mxu0 }
0x17d0   :  { %v2642_v22 = vadd.f32 %v2641_v39, %v6369_v54  ;;  %v2643_v41 = vpop.f32.mrb[53].mxu0 }
0x17d1   :  { %v2645_v35 = vpop.f32.mrb[54].mxu0  ;;  %v2644_v56 = vadd.f32 %v2643_v41, %v6387_v32 }
0x17d2   :  { %v2648_v50 = vadd.f32 %v2642_v22, %v6488_v10  ;;  %v2646_v45 = vpop.f32.mrb[55].mxu0  ;;  %v2743_v35 = vld [vmem:[#allocation3 + $0x78] sm:$0xff] }
0x17d4   :  { %v2649_v51 = vmul.f32 0.5, %v2648_v50 }
0x17d6   :  { %5527 = vtanh.f32 %v2649_v51 }
0x17e0   :  { %v5528_v53 = vpop.eup %5527 }
0x17e1   :  { %v2651_v47 = vmul.f32 0.5, %v5528_v53 }
0x17e3   :  { %v2652_v24 = vadd.f32 0.5, %v2651_v47  ;;  %v5367_v47 = vld [vmem:[#allocation5 + $0x230] ss:$8 sps:$4 sm:$0xff]  }
0x17e5   :  { %v2653_v33 = vmul.f32 %v2652_v24, %v2644_v56  ;;  %v2656_v29 = vsub.f32 1.0, %v2652_v24  ;;  %v2662_v52 = vmul.f32 %v2652_v24, %v6547_v16  ;;  %v5369_v24 = vld [vmem:[#allocation5 + $0x234] ss:$8 sps:$4 sm:$0xff]  }
0x17e6   :  { %2975 = vmatprep.subr.bf16.mxu1 %v5369_v24 }
0x17e7   :  { %v2654_v20 = vadd.f32 %v2653_v33, %v2599_v40  ;;  %v5372_v33 = vld [vmem:[#allocation5 + $0x244] ss:$8 sps:$4 sm:$0xff]  }
0x17e9   :  { %5529 = vtanh.f32 %v2654_v20 }
0x17f3   :  { %v5530_v8 = vpop.eup %5529 }
0x17f4   :  { %2658 = vrot.lane.b32.xlu0 %v5530_v8, %s5699_s24  ;;  %v6597_v8 = vld [vmem:[#allocation5 + $0x2b0] ss:$8 sps:$4 sm:$0xff]  }
0x1866   :  { %v2659_v36 = vpop.permute.xlu0 %2658 }
0x1867   :  { %v2661_v10 = vmul.f32 %v2659_v36, %v2656_v29  ;;  %v5375_v29 = vld [vmem:[#allocation5 + $0x254] ss:$8 sps:$4 sm:$0xff]   ;;  %v6602_v36 = vld [vmem:[#allocation5 + $0x2c4] ss:$8 sps:$4 sm:$0xff]  }
0x1869   :  { %v6566_v17 = vadd.f32 %v2662_v52, %v2661_v10  ;;  %v6605_v52 = vld [vmem:[#allocation5 + $0x2c0] ss:$8 sps:$4 sm:$0xff]   ;;  %v6608_v10 = vld [vmem:[#allocation5 + $0x2d4] ss:$8 sps:$4 sm:$0xff]  }
0x186b   :  { %v2672_v1 = vpack.c.bf16 %v6566_v17, %v6566_v17 }
0x186d   :  { %2674 = vrot.lane.b32.xlu1 %v2672_v1, %s5699_s24  ;;  %v5373_v1 = vld [vmem:[#allocation5 + $0x250] ss:$8 sps:$4 sm:$0xff]  }
0x18df   :  { %v2675_v21 = vpop.permute.xlu1 %2674 }
0x18e0   :  { %4869 = vmatmul.mubr.msk.bf16.vlgmr.msra.gmra.mrb[72].mxu1 %vm532_vm11, %v2675_v21  ;;  %v5378_v21 = vld [vmem:[#allocation5 + $0x264] ss:$8 sps:$4 sm:$0xff]  }
0x18e1   :  { %3007 = vmatprep.mubr.bf16.mxu1 %v5694_v0  ;;  %2976 = vmatpush1.bf16.msra.mxu1 %v5367_v47 }
0x18e2   :  { %2977 = vmatprep.subr.bf16.mxu1 %v5372_v33 }
0x19b3   :  { %v2713_v7 = vpop.f32.mrb[72].mxu1 }
0x19b4   :  { %v2714_v3 = vadd.f32 %v2713_v7, %v6369_v54  ;;  %v2715_v57 = vpop.f32.mrb[73].mxu1  ;;  %v6611_v7 = vld [vmem:[#allocation5 + $0x2d0] ss:$8 sps:$4 sm:$0xff]  }
0x19b5   :  { %v2717_v34 = vpop.f32.mrb[74].mxu1  ;;  %v2716_v14 = vadd.f32 %v2715_v57, %v6387_v32  ;;  %v5383_v57 = vld [vmem:[#allocation5 + $0x274] ss:$8 sps:$4 sm:$0xff]  }
0x19b6   :  { %v2720_v2 = vadd.f32 %v2714_v3, %v6494_v44  ;;  %v2718_v23 = vpop.f32.mrb[75].mxu1  ;;  %v5376_v3 = vld [vmem:[#allocation5 + $0x260] ss:$8 sps:$4 sm:$0xff]   ;;  %v5381_v34 = vld [vmem:[#allocation5 + $0x270] ss:$8 sps:$4 sm:$0xff]  }
0x19b7   :  { %v5387_v23 = vld [vmem:[#allocation5 + $0x280] ss:$8 sps:$4 sm:$0xff]  }
0x19b8   :  { %v2721_v11 = vmul.f32 0.5, %v2720_v2  ;;  %v5389_v2 = vld [vmem:[#allocation5 + $0x284] ss:$8 sps:$4 sm:$0xff]  }
0x19ba   :  { %5531 = vtanh.f32 %v2721_v11  ;;  %v5395_v11 = vld [vmem:[#allocation5 + $0x294] ss:$8 sps:$4 sm:$0xff]  }
0x19c4   :  { %v5532_v48 = vpop.eup %5531 }
0x19c5   :  { %v2723_v55 = vmul.f32 0.5, %v5532_v48  ;;  %v5393_v48 = vld [vmem:[#allocation5 + $0x290] ss:$8 sps:$4 sm:$0xff]  }
0x19c7   :  { %v2724_v27 = vadd.f32 0.5, %v2723_v55 }
0x19c9   :  { %v2725_v19 = vmul.f32 %v2724_v27, %v2716_v14  ;;  %v2728_v4 = vsub.f32 1.0, %v2724_v27  ;;  %v2734_v62 = vmul.f32 %v2724_v27, %v6566_v17  ;;  %v6615_v27 = vld [vmem:[#allocation5 + $0x2e4] ss:$8 sps:$4 sm:$0xff]   ;;  %v5399_v14 = vld [vmem:[#allocation5 + $0x2a0] ss:$8 sps:$4 sm:$0xff]  }
0x19cb   :  { %v2726_v37 = vadd.f32 %v2725_v19, %v2671_v61  ;;  %v5401_v19 = vld [vmem:[#allocation5 + $0x2a4] ss:$8 sps:$4 sm:$0xff]   ;;  %v6619_v61 = vld [vmem:[#allocation5 + $0x2e0] ss:$8 sps:$4 sm:$0xff]  }
0x19cd   :  { %5533 = vtanh.f32 %v2726_v37 }
0x19d7   :  { %v5534_v38 = vpop.eup %5533 }
0x19d8   :  { %2730 = vrot.lane.b32.xlu0 %v5534_v38, %s5699_s24 }
0x1a4a   :  { %v2731_v18 = vpop.permute.xlu0 %2730 }
0x1a4b   :  { %v2733_v44 = vmul.f32 %v2731_v18, %v2728_v4 }
0x1a4d   :  { %v2735_v63 = vadd.f32 %v2734_v62, %v2733_v44 }
0x1a4f   :  { %v2744_v43 = vpack.c.bf16 %v2735_v63, %v2735_v63 }
0x1a51   :  { %2746 = vrot.lane.b32.xlu1 %v2744_v43, %s5699_s24 }
0x1a55   :  { %2304 = vrot.lane.b32.xlu1 %v6399_v58, %s5699_s24 }
0x1a59   :  { %2737 = vrot.lane.b32.xlu1 %v2735_v63, %s5699_s24 }
0x1ac3   :  { %v2747_v9 = vpop.permute.xlu1 %2746 }
0x1ac4   :  { %4870 = vmatmul.mubr.msk.bf16.vlgmr.msra.gmra.mrb[56].mxu0 %vm532_vm11, %v2747_v9 }
0x1ac5   :  { %3146 = vmatprep.mubr.bf16.mxu0 %v5694_v0 }
0x1ac7   :  { %v2305_v15 = vpop.permute.xlu1 %2304 }
0x1ac8   :  { %2307 = vst.msk [vmem:[#allocation2] sm:$0xff] %vm99_vm4, %v2305_v15 }
0x1ac9   :  { %2309 = vst.msk [vmem:[#allocation2 + $0x38] sm:$0xff] %vm2308_vm15, %v2305_v15 }
0x1acb   :  { %v2738_v20 = vpop.permute.xlu1 %2737 }
0x1b97   :  { %v2785_v6 = vpop.f32.mrb[56].mxu0 }
0x1b98   :  { %v2786_v59 = vadd.f32 %v2785_v6, %v6369_v54  ;;  %v2787_v12 = vpop.f32.mrb[57].mxu0 }
0x1b99   :  { %v2789_v30 = vpop.f32.mrb[58].mxu0  ;;  %v2788_v22 = vadd.f32 %v2787_v12, %v6387_v32  ;;  %v6592_v32 = vld [vmem:[#allocation5 + $0x2b4] ss:$8 sps:$4 sm:$0xff]  }
0x1b9a   :  { %v2792_v58 = vadd.f32 %v2786_v59, %v6498_v49  ;;  %v2790_v31 = vpop.f32.mrb[59].mxu0  ;;  %3114 = vmatprep.subr.bf16.mxu0 %v6592_v32 }
0x1b9b   :  { %3115 = vmatpush1.bf16.msra.mxu0 %v6597_v8  ;;  %v4871_v31 = vld [vmem:[%s7120_s2 + $0x16] ss:$8 sm:$0x3] }
0x1b9c   :  { %v2793_v5 = vmul.f32 0.5, %v2792_v58  ;;  %3116 = vmatprep.subr.bf16.mxu0 %v6602_v36 }
0x1b9e   :  { %5535 = vtanh.f32 %v2793_v5  ;;  %v6663_v5 = vrot.slane %v4871_v31, %v6358_v42 }
0x1b9f   :  { %3117 = vmatpush1.bf16.msra.mxu0 %v6605_v52 }
0x1ba0   :  { %3118 = vmatprep.subr.bf16.mxu0 %v6608_v10 }
0x1ba3   :  { %3119 = vmatpush1.bf16.msra.mxu0 %v6611_v7 }
0x1ba4   :  { %3120 = vmatprep.subr.bf16.mxu0 %v6615_v27 }
0x1ba7   :  { %3121 = vmatpush1.bf16.msra.mxu0 %v6619_v61 }
0x1ba8   :  { %v5536_v26 = vpop.eup %5535  ;;  %3191 = vmatprep.subr.bf16.mxu0 %v6592_v32 }
0x1ba9   :  { %v2795_v60 = vmul.f32 0.5, %v5536_v26  ;;  %v6666_v26 = vrot.slane %v4871_v31, %v6363_v13 }
0x1baa   :  { %3147 = vmatmul.mubr.bf16.vlgmr.msra.gmra.mrb[60].mxu0 %v5694_v0 }
0x1bab   :  { %v2796_v39 = vadd.f32 0.5, %v2795_v60  ;;  %3192 = vmatpush1.bf16.msra.mxu0 %v6597_v8  ;;  %3223 = vmatprep.mubr.bf16.mxu0 %v5694_v0 }
0x1bac   :  { %3193 = vmatprep.subr.bf16.mxu0 %v6602_v36 }
0x1bad   :  { %v2797_v41 = vmul.f32 %v2796_v39, %v2788_v22  ;;  %v2800_v54 = vsub.f32 1.0, %v2796_v39  ;;  %v2806_v51 = vmul.f32 %v2796_v39, %v2735_v63 }
0x1baf   :  { %v2798_v50 = vadd.f32 %v2797_v41, %v2743_v35  ;;  %3194 = vmatpush1.bf16.msra.mxu0 %v6605_v52 }
0x1bb0   :  { %3195 = vmatprep.subr.bf16.mxu0 %v6608_v10 }
0x1bb1   :  { %5537 = vtanh.f32 %v2798_v50 }
0x1bb3   :  { %3196 = vmatpush1.bf16.msra.mxu0 %v6611_v7 }
0x1bb4   :  { %3197 = vmatprep.subr.bf16.mxu0 %v6615_v27 }
0x1bb7   :  { %3198 = vmatpush1.bf16.msra.mxu0 %v6619_v61 }
0x1bb8   :  { %3268 = vmatprep.subr.bf16.mxu0 %v6592_v32 }
0x1bbb   :  { %v5538_v45 = vpop.eup %5537 }
0x1bbc   :  { %2802 = vrot.lane.b32.xlu0 %v5538_v45, %s5699_s24 }
0x1bc0   :  { %2377 = vrot.lane.b32.xlu0 %v6456_v25, %s5699_s24  ;;  %v5370_v25 = vld [vmem:[#allocation5 + $0x240] ss:$8 sps:$4 sm:$0xff]  }
0x1bc1   :  { %2978 = vmatpush1.bf16.msra.mxu1 %v5370_v25 }
0x1bc2   :  { %2979 = vmatprep.subr.bf16.mxu1 %v5375_v29 }
0x1bc5   :  { %2980 = vmatpush1.bf16.msra.mxu1 %v5373_v1 }
0x1bc6   :  { %2981 = vmatprep.subr.bf16.mxu1 %v5378_v21 }
0x1bc9   :  { %2982 = vmatpush1.bf16.msra.mxu1 %v5376_v3 }
0x1bca   :  { %2983 = vmatprep.subr.bf16.mxu1 %v5383_v57 }
0x1bcd   :  { %2984 = vmatpush1.bf16.msra.mxu1 %v5381_v34 }
0x1bce   :  { %2985 = vmatprep.subr.bf16.mxu1 %v5389_v2 }
0x1bd1   :  { %2986 = vmatpush1.bf16.msra.mxu1 %v5387_v23 }
0x1bd2   :  { %2987 = vmatprep.subr.bf16.mxu1 %v5395_v11 }
0x1bd5   :  { %2988 = vmatpush1.bf16.msra.mxu1 %v5393_v48 }
0x1bd6   :  { %2989 = vmatprep.subr.bf16.mxu1 %v5401_v19 }
0x1bd9   :  { %2990 = vmatpush1.bf16.msra.mxu1 %v5399_v14 }
0x1bda   :  { %3345 = vmatprep.subr.bf16.mxu1 %v6592_v32 }
0x1c2e   :  { %v2803_v49 = vpop.permute.xlu0 %2802 }
0x1c2f   :  { %v2805_v53 = vmul.f32 %v2803_v49, %v2800_v54 }
0x1c31   :  { %v2807_v56 = vadd.f32 %v2806_v51, %v2805_v53 }
0x1c32   :  { %v2378_v40 = vpop.permute.xlu0 %2377 }
0x1c33   :  { %2380 = vst.msk [vmem:[#allocation2 + $0x8] sm:$0xff] %vm99_vm4, %v2378_v40  ;;  %2809 = vrot.lane.b32.xlu0 %v2807_v56, %s5699_s24 }
0x1c34   :  { %2381 = vst.msk [vmem:[#allocation2 + $0x30] sm:$0xff] %vm2308_vm15, %v2378_v40  ;;  %2741 = vst.msk [vmem:[#allocation2 + $0x8] sm:$0xff] %vm2308_vm15, %v2738_v20 }
0x1c35   :  { %2740 = vst.msk [vmem:[#allocation2 + $0x30] sm:$0xff] %vm99_vm4, %v2738_v20 }
0x1c3b   :  { %v6644_v43 = vld [vmem:[#allocation2 + $0x8] sm:$0xff] }
0x1c3c   :  { %v6628_v37 = vld [vmem:[#allocation2 + $0x30] sm:$0xff] }
0x1c7d   :  { %v3148_v59 = vpop.f32.mrb[60].mxu0 }
0x1c7e   :  { %v3150_v12 = vpop.f32.mrb[61].mxu0 }
0x1c7f   :  { %v3152_v30 = vpop.f32.mrb[62].mxu0 }
0x1c80   :  { %v3153_v58 = vpop.f32.mrb[63].mxu0 }
0x1ca5   :  { %v2810_v55 = vpop.permute.xlu0 %2809 }
0x1ca6   :  { %2812 = vst.msk [vmem:[#allocation2 + $0x38] sm:$0xff] %vm99_vm4, %v2810_v55 }
0x1ca7   :  { %2813 = vst.msk [vmem:[#allocation2] sm:$0xff] %vm2308_vm15, %v2810_v55 }
0x1cad   :  { %v6630_v38 = vld [vmem:[#allocation2 + $0x38] sm:$0xff] }
0x1cae   :  { %v5280_v4 = vpack.i.bf16 %v6628_v37, %v6630_v38  ;;  %v6642_v63 = vld [vmem:[#allocation2] sm:$0xff] }
0x1cb0   :  { %5281 = vrot.lane.b32.xlu1 %v5280_v4, %s5699_s24 }
0x1d22   :  { %v5282_v18 = vpop.permute.xlu1 %5281 }
0x1d23   :  { %v5284_v62 = vunpack.i.h.bf16 %v5282_v18  ;;  %v5283_v44 = vunpack.i.l.bf16 %v5282_v18 }
0x1d25   :  { %v2855_v9 = vsel %vm532_vm11, %v6644_v43, %v5284_v62  ;;  %v2854_v15 = vsel %vm532_vm11, %v6642_v63, %v5283_v44 }
0x1d26   :  { %v2862_v6 = vpack.c.bf16 %v2855_v9, %v2854_v15 }
0x1d28   :  { %3008 = vmatmul.mubr.bf16.vlgmr.msra.gmra.mrb[76].mxu1 %v2862_v6 }
0x1d29   :  { %3017 = vmatprep.mubr.bf16.mxu1 %v5694_v0  ;;  %3346 = vmatpush1.bf16.msra.mxu1 %v6597_v8 }
0x1d2a   :  { %3347 = vmatprep.subr.bf16.mxu1 %v6602_v36 }
0x1d2d   :  { %3348 = vmatpush1.bf16.msra.mxu1 %v6605_v52 }
0x1d2e   :  { %3349 = vmatprep.subr.bf16.mxu1 %v6608_v10 }
0x1d31   :  { %3350 = vmatpush1.bf16.msra.mxu1 %v6611_v7 }
0x1d32   :  { %3351 = vmatprep.subr.bf16.mxu1 %v6615_v27 }
0x1d35   :  { %3352 = vmatpush1.bf16.msra.mxu1 %v6619_v61 }
0x1d36   :  { %3499 = vmatprep.subr.bf16.mxu1 %v6592_v32 }
0x1dfb   :  { %v3009_v60 = vpop.f32.mrb[76].mxu1 }
0x1dfc   :  { %v3010_v39 = vadd.f32 %v3009_v60, %v6663_v5  ;;  %v3011_v22 = vpop.f32.mrb[77].mxu1 }
0x1dfd   :  { %v3012_v41 = vadd.f32 %v3011_v22, %v6666_v26  ;;  %v3013_v35 = vpop.f32.mrb[78].mxu1 }
0x1dfe   :  { %v3155_v50 = vadd.f32 %v3148_v59, %v3010_v39  ;;  %v3015_v45 = vpop.f32.mrb[79].mxu1 }
0x1dff   :  { %v3156_v54 = vadd.f32 %v3150_v12, %v3012_v41  ;;  %v3016_v48 = vadd.f32 %v3015_v45, %v6666_v26 }
0x1e00   :  { %v3157_v51 = vmul.f32 0.5, %v3155_v50 }
0x1e01   :  { %5539 = vtanh.f32 %v3156_v54  ;;  %v3158_v1 = vmul.f32 0.5, %v3156_v54 }
0x1e02   :  { %5541 = vtanh.f32 %v3157_v51 }
0x1e0b   :  { %v5540_v49 = vpop.eup %5539 }
0x1e0c   :  { %3168 = vrot.lane.b32.xlu0 %v5540_v49, %s5699_s24  ;;  %v5542_v53 = vpop.eup %5541 }
0x1e0d   :  { %v3161_v47 = vmul.f32 0.5, %v5542_v53 }
0x1e0f   :  { %v3163_v24 = vadd.f32 0.5, %v3161_v47 }
0x1e11   :  { %v3165_v40 = vmul.f32 0.0, %v3163_v24 }
0x1e7e   :  { %v3169_v56 = vpop.permute.xlu0 %3168 }
0x1e7f   :  { %v3171_v33 = vmul.f32 %v3169_v56, %v3163_v24 }
0x1e81   :  { %3173 = vrot.lane.b32.xlu1 %v3171_v33, %s5699_s24 }
0x1ef3   :  { %v3174_v20 = vpop.permute.xlu1 %3173 }
0x1ef4   :  { %v3176_v25 = vadd.f32 %v3174_v20, %v3165_v40 }
0x1ef6   :  { %5543 = vtanh.f32 %v3176_v25 }
0x1ef7   :  { %5545 = vtanh.f32 %v3158_v1 }
0x1f00   :  { %v5544_v29 = vpop.eup %5543 }
0x1f01   :  { %3179 = vrot.lane.b32.xlu0 %v5544_v29, %s5699_s24  ;;  %v5546_v21 = vpop.eup %5545 }
0x1f02   :  { %v3162_v3 = vmul.f32 0.5, %v5546_v21 }
0x1f04   :  { %v3164_v57 = vadd.f32 0.5, %v3162_v3 }
0x1f05   :  { %2521 = vrot.lane.b32.xlu0 %v6528_v46, %s5699_s24  ;;  %v3014_v46 = vadd.f32 %v3013_v35, %v6663_v5 }
0x1f73   :  { %v3180_v34 = vpop.permute.xlu0 %3179 }
0x1f74   :  { %v3182_v2 = vmul.f32 %v3180_v34, %v3164_v57 }
0x1f76   :  { %v3187_v23 = vpack.c.bf16 %v3182_v2, %v3182_v2  ;;  %3183 = vst.msk [vmem:[#allocation2] sm:$0xff] %vm99_vm4, %v3182_v2 }
0x1f77   :  { %3184 = vst.msk [vmem:[#allocation2 + $0x38] sm:$0xff] %vm2308_vm15, %v3182_v2  ;;  %v2522_v11 = vpop.permute.xlu0 %2521 }
0x1f78   :  { %2524 = vst.msk [vmem:[#allocation2 + $0x18] sm:$0xff] %vm99_vm4, %v2522_v11  ;;  %4896 = vmatmul.mubr.msk.bf16.vlgmr.msra.gmra.mrb[64].mxu0 %vm532_vm11, %v3187_v23 }
0x1f79   :  { %2525 = vst.msk [vmem:[#allocation2 + $0x20] sm:$0xff] %vm2308_vm15, %v2522_v11  ;;  %3269 = vmatpush1.bf16.msra.mxu0 %v6597_v8  ;;  %3300 = vmatprep.mubr.bf16.mxu0 %v5694_v0 }
0x1f7a   :  { %3270 = vmatprep.subr.bf16.mxu0 %v6602_v36 }
0x1f7d   :  { %3271 = vmatpush1.bf16.msra.mxu0 %v6605_v52 }
0x1f7e   :  { %3272 = vmatprep.subr.bf16.mxu0 %v6608_v10 }
0x1f81   :  { %3273 = vmatpush1.bf16.msra.mxu0 %v6611_v7 }
0x1f82   :  { %3274 = vmatprep.subr.bf16.mxu0 %v6615_v27 }
0x1f85   :  { %3275 = vmatpush1.bf16.msra.mxu0 %v6619_v61 }
0x1f86   :  { %3422 = vmatprep.subr.bf16.mxu0 %v6592_v32 }
0x204b   :  { %v3225_v55 = vpop.f32.mrb[64].mxu0 }
0x204c   :  { %v3232_v14 = vadd.f32 %v3225_v55, %v3014_v46  ;;  %v3227_v19 = vpop.f32.mrb[65].mxu0 }
0x204d   :  { %v3233_v4 = vadd.f32 %v3227_v19, %v3016_v48  ;;  %v3229_v18 = vpop.f32.mrb[66].mxu0 }
0x204e   :  { %v3230_v62 = vpop.f32.mrb[67].mxu0  ;;  %v3234_v9 = vmul.f32 0.5, %v3232_v14 }
0x204f   :  { %5547 = vtanh.f32 %v3233_v4  ;;  %v3235_v50 = vmul.f32 0.5, %v3233_v4 }
0x2050   :  { %5549 = vtanh.f32 %v3234_v9 }
0x2059   :  { %v5548_v44 = vpop.eup %5547 }
0x205a   :  { %3245 = vrot.lane.b32.xlu1 %v5548_v44, %s5699_s24  ;;  %v5550_v15 = vpop.eup %5549 }
0x205b   :  { %v3238_v6 = vmul.f32 0.5, %v5550_v15 }
0x205d   :  { %v3240_v59 = vadd.f32 0.5, %v3238_v6 }
0x205e   :  { %2449 = vrot.lane.b32.xlu1 %v6508_v28, %s5699_s24 }
0x2062   :  { %2593 = vrot.lane.b32.xlu1 %v6547_v16, %s5699_s24  ;;  %v3242_v16 = vmul.f32 %v3240_v59, %v3176_v25 }
0x20cc   :  { %v3246_v12 = vpop.permute.xlu1 %3245 }
0x20cd   :  { %v3248_v30 = vmul.f32 %v3246_v12, %v3240_v59 }
0x20cf   :  { %3250 = vrot.lane.b32.xlu0 %v3248_v30, %s5699_s24 }
0x20d0   :  { %v2450_v58 = vpop.permute.xlu1 %2449 }
0x20d1   :  { %2452 = vst.msk [vmem:[#allocation2 + $0x10] sm:$0xff] %vm99_vm4, %v2450_v58 }
0x20d2   :  { %2453 = vst.msk [vmem:[#allocation2 + $0x28] sm:$0xff] %vm2308_vm15, %v2450_v58 }
0x20d3   :  { %2665 = vrot.lane.b32.xlu0 %v6566_v17, %s5699_s24 }
0x20d4   :  { %v2594_v28 = vpop.permute.xlu1 %2593 }
0x20d5   :  { %2596 = vst.msk [vmem:[#allocation2 + $0x20] sm:$0xff] %vm99_vm4, %v2594_v28 }
0x20d6   :  { %2597 = vst.msk [vmem:[#allocation2 + $0x18] sm:$0xff] %vm2308_vm15, %v2594_v28  ;;  %v5295_v28 = vpack.i.bf16 %v6642_v63, %v6644_v43 }
0x20dc   :  { %v6708_v22 = vld [vmem:[#allocation2 + $0x20] sm:$0xff] }
0x20dd   :  { %v2817_v20 = vld [vmem:[#allocation2 + $0x18] sm:$0xff] }
0x2141   :  { %v3251_v31 = vpop.permute.xlu0 %3250 }
0x2142   :  { %v6703_v60 = vadd.f32 %v3251_v31, %v3242_v16 }
0x2144   :  { %5551 = vtanh.f32 %v6703_v60 }
0x2145   :  { %v2666_v39 = vpop.permute.xlu0 %2665  ;;  %5553 = vtanh.f32 %v3235_v50 }
0x2146   :  { %2668 = vst.msk [vmem:[#allocation2 + $0x28] sm:$0xff] %vm99_vm4, %v2666_v39 }
0x2147   :  { %2669 = vst.msk [vmem:[#allocation2 + $0x10] sm:$0xff] %vm2308_vm15, %v2666_v39 }
0x214d   :  { %v6710_v41 = vld [vmem:[#allocation2 + $0x28] sm:$0xff] }
0x214e   :  { %v5552_v17 = vpop.eup %5551  ;;  %v5285_v35 = vpack.i.bf16 %v6708_v22, %v6710_v41  ;;  %v2816_v40 = vld [vmem:[#allocation2 + $0x10] sm:$0xff] }
0x214f   :  { %3256 = vrot.lane.b32.xlu0 %v5552_v17, %s5699_s24  ;;  %v5554_v45 = vpop.eup %5553  ;;  %v5290_v18 = vpack.i.bf16 %v2816_v40, %v2817_v20 }
0x2150   :  { %5286 = vrot.lane.b32.xlu1 %v5285_v35, %s5699_s24  ;;  %v3239_v54 = vmul.f32 0.5, %v5554_v45 }
0x2152   :  { %v3241_v49 = vadd.f32 0.5, %v3239_v54 }
0x21c1   :  { %v3257_v51 = vpop.permute.xlu0 %3256 }
0x21c2   :  { %v3259_v53 = vmul.f32 %v3257_v51, %v3241_v49  ;;  %v5287_v47 = vpop.permute.xlu1 %5286 }
0x21c3   :  { %v5289_v24 = vunpack.i.h.bf16 %v5287_v47  ;;  %v5288_v56 = vunpack.i.l.bf16 %v5287_v47 }
0x21c4   :  { %v3264_v33 = vpack.c.bf16 %v3259_v53, %v3259_v53  ;;  %3260 = vst.msk [vmem:[#allocation2 + $0x8] sm:$0xff] %vm99_vm4, %v3259_v53 }
0x21c5   :  { %3261 = vst.msk [vmem:[#allocation2 + $0x30] sm:$0xff] %vm2308_vm15, %v3259_v53  ;;  %v2856_v25 = vsel %vm532_vm11, %v2816_v40, %v5288_v56  ;;  %v2857_v29 = vsel %vm532_vm11, %v2817_v20, %v5289_v24 }
0x21c6   :  { %4897 = vmatmul.mubr.msk.bf16.vlgmr.msra.gmra.mrb[68].mxu0 %vm532_vm11, %v3264_v33  ;;  %v2863_v1 = vpack.c.bf16 %v2857_v29, %v2856_v25 }
0x21c7   :  { %3423 = vmatpush1.bf16.msra.mxu0 %v6597_v8  ;;  %3454 = vmatprep.mubr.bf16.mxu0 %v5694_v0 }
0x21c8   :  { %3018 = vmatmul.mubr.bf16.gmra.mrb[80].mxu1 %v2863_v1  ;;  %3424 = vmatprep.subr.bf16.mxu0 %v6602_v36 }
0x21c9   :  { %3027 = vmatprep.mubr.bf16.mxu1 %v5694_v0 }
0x21cb   :  { %3425 = vmatpush1.bf16.msra.mxu0 %v6605_v52 }
0x21cc   :  { %3426 = vmatprep.subr.bf16.mxu0 %v6608_v10 }
0x21cf   :  { %3427 = vmatpush1.bf16.msra.mxu0 %v6611_v7 }
0x21d0   :  { %3428 = vmatprep.subr.bf16.mxu0 %v6615_v27 }
0x21d3   :  { %3429 = vmatpush1.bf16.msra.mxu0 %v6619_v61 }
0x21d4   :  { %3576 = vmatprep.subr.bf16.mxu0 %v6592_v32 }
0x2299   :  { %v3302_v21 = vpop.f32.mrb[68].mxu0 }
0x229a   :  { %v3304_v3 = vpop.f32.mrb[69].mxu0 }
0x229b   :  { %v3019_v57 = vpop.f32.mrb[80].mxu1  ;;  %v3306_v34 = vpop.f32.mrb[70].mxu0 }
0x229c   :  { %v3020_v2 = vadd.f32 %v3019_v57, %v6663_v5  ;;  %v3021_v23 = vpop.f32.mrb[81].mxu1  ;;  %v3307_v11 = vpop.f32.mrb[71].mxu0 }
0x229d   :  { %v3022_v46 = vadd.f32 %v3021_v23, %v6666_v26  ;;  %v6733_v48 = vpop.f32.mrb[82].mxu1 }
0x229e   :  { %v3309_v55 = vadd.f32 %v3302_v21, %v3020_v2  ;;  %v6735_v14 = vpop.f32.mrb[83].mxu1 }
0x229f   :  { %v3310_v19 = vadd.f32 %v3304_v3, %v3022_v46  ;;  %v3024_v3 = vadd.f32 %v6733_v48, %v6663_v5  ;;  %v3026_v57 = vadd.f32 %v6735_v14, %v6666_v26 }
0x22a0   :  { %v3311_v62 = vmul.f32 0.5, %v3309_v55 }
0x22a1   :  { %5555 = vtanh.f32 %v3310_v19  ;;  %v3312_v53 = vmul.f32 0.5, %v3310_v19 }
0x22a2   :  { %5557 = vtanh.f32 %v3311_v62 }
0x22ab   :  { %v5556_v4 = vpop.eup %5555 }
0x22ac   :  { %3322 = vrot.lane.b32.xlu1 %v5556_v4, %s5699_s24  ;;  %v5558_v44 = vpop.eup %5557 }
0x22ad   :  { %v3315_v9 = vmul.f32 0.5, %v5558_v44 }
0x22af   :  { %v3317_v15 = vadd.f32 0.5, %v3315_v9 }
0x22b0   :  { %5291 = vrot.lane.b32.xlu1 %v5290_v18, %s5699_s24 }
0x22b1   :  { %v3319_v17 = vmul.f32 %v3317_v15, %v6703_v60 }
0x231e   :  { %v3323_v6 = vpop.permute.xlu1 %3322 }
0x231f   :  { %v3325_v59 = vmul.f32 %v3323_v6, %v3317_v15 }
0x2321   :  { %3327 = vrot.lane.b32.xlu0 %v3325_v59, %s5699_s24 }
0x2322   :  { %v5292_v12 = vpop.permute.xlu1 %5291 }
0x2323   :  { %v5294_v30 = vunpack.i.h.bf16 %v5292_v12  ;;  %v5293_v58 = vunpack.i.l.bf16 %v5292_v12 }
0x2325   :  { %5296 = vrot.lane.b32.xlu0 %v5295_v28, %s5699_s24  ;;  %v2858_v16 = vsel %vm532_vm11, %v6708_v22, %v5293_v58  ;;  %v2859_v31 = vsel %vm532_vm11, %v6710_v41, %v5294_v30 }
0x2326   :  { %v2864_v39 = vpack.c.bf16 %v2859_v31, %v2858_v16 }
0x2328   :  { %3028 = vmatmul.mubr.bf16.gmra.mrb[84].mxu1 %v2864_v39 }
0x2329   :  { %3037 = vmatprep.mubr.bf16.mxu1 %v5694_v0 }
0x2393   :  { %v3328_v35 = vpop.permute.xlu0 %3327 }
0x2394   :  { %v3330_v50 = vadd.f32 %v3328_v35, %v3319_v17 }
0x2396   :  { %5559 = vtanh.f32 %v3330_v50 }
0x2397   :  { %v5297_v45 = vpop.permute.xlu0 %5296  ;;  %5561 = vtanh.f32 %v3312_v53 }
0x2398   :  { %v5299_v54 = vunpack.i.h.bf16 %v5297_v45  ;;  %v5298_v63 = vunpack.i.l.bf16 %v5297_v45 }
0x239a   :  { %v2860_v43 = vsel %vm532_vm11, %v6628_v37, %v5298_v63  ;;  %v2861_v22 = vsel %vm532_vm11, %v6630_v38, %v5299_v54 }
0x239b   :  { %v2865_v49 = vpack.c.bf16 %v2861_v22, %v2860_v43 }
0x239d   :  { %3038 = vmatmul.mubr.bf16.gmra.mrb[88].mxu1 %v2865_v49 }
0x239e   :  { %3377 = vmatprep.mubr.bf16.mxu1 %v5694_v0 }
0x23a0   :  { %v5560_v41 = vpop.eup %5559 }
0x23a1   :  { %3333 = vrot.lane.b32.xlu1 %v5560_v41, %s5699_s24  ;;  %v5562_v37 = vpop.eup %5561 }
0x23a2   :  { %v3316_v56 = vmul.f32 0.5, %v5562_v37 }
0x23a4   :  { %v3318_v38 = vadd.f32 0.5, %v3316_v56 }
0x23fb   :  { %v6755_v60 = vpop.f32.mrb[84].mxu1 }
0x23fc   :  { %v6757_v51 = vpop.f32.mrb[85].mxu1  ;;  %v3030_v39 = vadd.f32 %v6755_v60, %v6663_v5 }
0x23fd   :  { %v6759_v47 = vpop.f32.mrb[86].mxu1  ;;  %v3032_v17 = vadd.f32 %v6757_v51, %v6666_v26 }
0x23fe   :  { %v6761_v24 = vpop.f32.mrb[87].mxu1 }
0x2413   :  { %v3334_v33 = vpop.permute.xlu1 %3333 }
0x2414   :  { %v3336_v40 = vmul.f32 %v3334_v33, %v3318_v38 }
0x2416   :  { %v3341_v20 = vpack.c.bf16 %v3336_v40, %v3336_v40  ;;  %3337 = vst.msk [vmem:[#allocation2 + $0x10] sm:$0xff] %vm99_vm4, %v3336_v40 }
0x2417   :  { %3338 = vst.msk [vmem:[#allocation2 + $0x28] sm:$0xff] %vm2308_vm15, %v3336_v40 }
0x2418   :  { %4898 = vmatmul.mubr.msk.bf16.vlgmr.msra.gmra.mrb[92].mxu1 %vm532_vm11, %v3341_v20 }
0x2419   :  { %3500 = vmatpush1.bf16.msra.mxu1 %v6597_v8  ;;  %3531 = vmatprep.mubr.bf16.mxu1 %v5694_v0 }
0x241a   :  { %3501 = vmatprep.subr.bf16.mxu1 %v6602_v36 }
0x241d   :  { %3502 = vmatpush1.bf16.msra.mxu1 %v6605_v52 }
0x241e   :  { %3503 = vmatprep.subr.bf16.mxu1 %v6608_v10 }
0x2421   :  { %3504 = vmatpush1.bf16.msra.mxu1 %v6611_v7 }
0x2422   :  { %3505 = vmatprep.subr.bf16.mxu1 %v6615_v27 }
0x2425   :  { %3506 = vmatpush1.bf16.msra.mxu1 %v6619_v61 }
0x2426   :  { %3653 = vmatprep.subr.bf16.mxu1 %v6592_v32 }
0x2470   :  { %v6775_v25 = vpop.f32.mrb[88].mxu1 }
0x2471   :  { %v6777_v29 = vpop.f32.mrb[89].mxu1 }
0x2472   :  { %v6779_v1 = vpop.f32.mrb[90].mxu1 }
0x2473   :  { %v6781_v21 = vpop.f32.mrb[91].mxu1 }
0x24eb   :  { %v3379_v34 = vpop.f32.mrb[92].mxu1 }
0x24ec   :  { %v3386_v2 = vadd.f32 %v3379_v34, %v3024_v3  ;;  %v3381_v23 = vpop.f32.mrb[93].mxu1 }
0x24ed   :  { %v3387_v11 = vadd.f32 %v3381_v23, %v3026_v57  ;;  %v3383_v46 = vpop.f32.mrb[94].mxu1 }
0x24ee   :  { %v3384_v32 = vpop.f32.mrb[95].mxu1  ;;  %v3388_v19 = vmul.f32 0.5, %v3386_v2  ;;  %v3034_v46 = vadd.f32 %v6759_v47, %v6663_v5 }
0x24ef   :  { %5563 = vtanh.f32 %v3387_v11  ;;  %v3389_v59 = vmul.f32 0.5, %v3387_v11 }
0x24f0   :  { %5565 = vtanh.f32 %v3388_v19 }
0x24f9   :  { %v5564_v55 = vpop.eup %5563 }
0x24fa   :  { %3399 = vrot.lane.b32.xlu0 %v5564_v55, %s5699_s24  ;;  %v5566_v4 = vpop.eup %5565 }
0x24fb   :  { %v3392_v18 = vmul.f32 0.5, %v5566_v4 }
0x24fd   :  { %v3394_v62 = vadd.f32 0.5, %v3392_v18 }
0x24ff   :  { %v3396_v14 = vmul.f32 %v3394_v62, %v3330_v50 }
0x256c   :  { %v3400_v44 = vpop.permute.xlu0 %3399 }
0x256d   :  { %v3402_v48 = vmul.f32 %v3400_v44, %v3394_v62 }
0x256f   :  { %3404 = vrot.lane.b32.xlu1 %v3402_v48, %s5699_s24 }
0x25e1   :  { %v3405_v9 = vpop.permute.xlu1 %3404 }
0x25e2   :  { %v3407_v15 = vadd.f32 %v3405_v9, %v3396_v14 }
0x25e4   :  { %5567 = vtanh.f32 %v3407_v15 }
0x25e5   :  { %5569 = vtanh.f32 %v3389_v59 }
0x25ee   :  { %v5568_v6 = vpop.eup %5567 }
0x25ef   :  { %3410 = vrot.lane.b32.xlu0 %v5568_v6, %s5699_s24  ;;  %v5570_v12 = vpop.eup %5569 }
0x25f0   :  { %v3393_v30 = vmul.f32 0.5, %v5570_v12 }
0x25f2   :  { %v3395_v58 = vadd.f32 0.5, %v3393_v30 }
0x2661   :  { %v3411_v28 = vpop.permute.xlu0 %3410 }
0x2662   :  { %v3413_v16 = vmul.f32 %v3411_v28, %v3395_v58  ;;  %v3040_v28 = vadd.f32 %v6775_v25, %v6663_v5 }
0x2664   :  { %v3418_v31 = vpack.c.bf16 %v3413_v16, %v3413_v16  ;;  %3414 = vst.msk [vmem:[#allocation2 + $0x18] sm:$0xff] %vm99_vm4, %v3413_v16 }
0x2665   :  { %3415 = vst.msk [vmem:[#allocation2 + $0x20] sm:$0xff] %vm2308_vm15, %v3413_v16  ;;  %v3042_v16 = vadd.f32 %v6777_v29, %v6666_v26 }
0x2666   :  { %4899 = vmatmul.mubr.msk.bf16.vlgmr.msra.gmra.mrb[72].mxu0 %vm532_vm11, %v3418_v31 }
0x2667   :  { %3577 = vmatpush1.bf16.msra.mxu0 %v6597_v8  ;;  %3608 = vmatprep.mubr.bf16.mxu0 %v5694_v0 }
0x2668   :  { %3578 = vmatprep.subr.bf16.mxu0 %v6602_v36 }
0x266b   :  { %3579 = vmatpush1.bf16.msra.mxu0 %v6605_v52 }
0x266c   :  { %3580 = vmatprep.subr.bf16.mxu0 %v6608_v10 }
0x266f   :  { %3581 = vmatpush1.bf16.msra.mxu0 %v6611_v7 }
0x2670   :  { %3582 = vmatprep.subr.bf16.mxu0 %v6615_v27 }
0x2673   :  { %3583 = vmatpush1.bf16.msra.mxu0 %v6619_v61 }
0x2739   :  { %v3456_v35 = vpop.f32.mrb[72].mxu0 }
0x273a   :  { %v3463_v50 = vadd.f32 %v3456_v35, %v3030_v39  ;;  %v3458_v45 = vpop.f32.mrb[73].mxu0 }
0x273b   :  { %v3464_v54 = vadd.f32 %v3458_v45, %v3032_v17  ;;  %v3460_v63 = vpop.f32.mrb[74].mxu0 }
0x273c   :  { %v3461_v43 = vpop.f32.mrb[75].mxu0  ;;  %v3465_v49 = vmul.f32 0.5, %v3463_v50 }
0x273d   :  { %5571 = vtanh.f32 %v3464_v54  ;;  %v3466_v20 = vmul.f32 0.5, %v3464_v54 }
0x273e   :  { %5573 = vtanh.f32 %v3465_v49 }
0x2747   :  { %v5572_v22 = vpop.eup %5571 }
0x2748   :  { %3476 = vrot.lane.b32.xlu1 %v5572_v22, %s5699_s24  ;;  %v5574_v41 = vpop.eup %5573 }
0x2749   :  { %v3469_v53 = vmul.f32 0.5, %v5574_v41 }
0x274b   :  { %v3471_v37 = vadd.f32 0.5, %v3469_v53 }
0x274d   :  { %v3473_v51 = vmul.f32 %v3471_v37, %v3407_v15 }
0x27ba   :  { %v3477_v56 = vpop.permute.xlu1 %3476 }
0x27bb   :  { %v3479_v60 = vmul.f32 %v3477_v56, %v3471_v37 }
0x27bd   :  { %3481 = vrot.lane.b32.xlu0 %v3479_v60, %s5699_s24 }
0x282f   :  { %v3482_v38 = vpop.permute.xlu0 %3481 }
0x2830   :  { %v3484_v33 = vadd.f32 %v3482_v38, %v3473_v51 }
0x2832   :  { %5575 = vtanh.f32 %v3484_v33 }
0x2833   :  { %5577 = vtanh.f32 %v3466_v20 }
0x283c   :  { %v5576_v40 = vpop.eup %5575 }
0x283d   :  { %3487 = vrot.lane.b32.xlu1 %v5576_v40, %s5699_s24  ;;  %v5578_v3 = vpop.eup %5577 }
0x283e   :  { %v3470_v57 = vmul.f32 0.5, %v5578_v3 }
0x2840   :  { %v3472_v34 = vadd.f32 0.5, %v3470_v57  ;;  %v3044_v57 = vadd.f32 %v6779_v1, %v6663_v5 }
0x28af   :  { %v3488_v2 = vpop.permute.xlu1 %3487 }
0x28b0   :  { %v3490_v23 = vmul.f32 %v3488_v2, %v3472_v34  ;;  %v3046_v34 = vadd.f32 %v6781_v21, %v6666_v26  ;;  %v6852_v21 = vld [vmem:[#allocation5 + $0x370] ss:$8 sps:$4 sm:$0xff]  }
0x28b2   :  { %3491 = vst.msk [vmem:[#allocation2 + $0x20] sm:$0xff] %vm99_vm4, %v3490_v23  ;;  %v3495_v11 = vpack.c.bf16 %v3490_v23, %v3490_v23 }
0x28b3   :  { %3492 = vst.msk [vmem:[#allocation2 + $0x18] sm:$0xff] %vm2308_vm15, %v3490_v23 }
0x28b4   :  { %4900 = vmatmul.mubr.msk.bf16.vlgmr.msra.gmra.mrb[96].mxu1 %vm532_vm11, %v3495_v11 }
0x28b5   :  { %3654 = vmatpush1.bf16.msra.mxu1 %v6597_v8  ;;  %3685 = vmatprep.mubr.bf16.mxu1 %v5694_v0  ;;  %v3036_v8 = vadd.f32 %v6761_v24, %v6666_v26  ;;  %v6850_v26 = vld [vmem:[#allocation5 + $0x374] ss:$8 sps:$4 sm:$0xff]  }
0x28b6   :  { %3655 = vmatprep.subr.bf16.mxu1 %v6602_v36 }
0x28b9   :  { %3656 = vmatpush1.bf16.msra.mxu1 %v6605_v52 }
0x28ba   :  { %3657 = vmatprep.subr.bf16.mxu1 %v6608_v10 }
0x28bd   :  { %3658 = vmatpush1.bf16.msra.mxu1 %v6611_v7 }
0x28be   :  { %3659 = vmatprep.subr.bf16.mxu1 %v6615_v27 }
0x28c1   :  { %3660 = vmatpush1.bf16.msra.mxu1 %v6619_v61 }
0x28c2   :  { %4028 = vmatprep.subr.bf16.mxu1 %v6850_v26 }
0x2987   :  { %v3533_v32 = vpop.f32.mrb[96].mxu1 }
0x2988   :  { %v3540_v55 = vadd.f32 %v3533_v32, %v3034_v46  ;;  %v3535_v19 = vpop.f32.mrb[97].mxu1 }
0x2989   :  { %v3541_v36 = vadd.f32 %v3535_v19, %v3036_v8  ;;  %v3537_v4 = vpop.f32.mrb[98].mxu1 }
0x298a   :  { %v3538_v52 = vpop.f32.mrb[99].mxu1  ;;  %v3542_v7 = vmul.f32 0.5, %v3540_v55 }
0x298b   :  { %5579 = vtanh.f32 %v3541_v36  ;;  %v3543_v9 = vmul.f32 0.5, %v3541_v36 }
0x298c   :  { %5581 = vtanh.f32 %v3542_v7  ;;  %v6858_v7 = vld [vmem:[#allocation5 + $0x380] ss:$8 sps:$4 sm:$0xff]  }
0x2995   :  { %v5580_v10 = vpop.eup %5579 }
0x2996   :  { %3553 = vrot.lane.b32.xlu0 %v5580_v10, %s5699_s24  ;;  %v5582_v27 = vpop.eup %5581  ;;  %v6854_v10 = vld [vmem:[#allocation5 + $0x384] ss:$8 sps:$4 sm:$0xff]  }
0x2997   :  { %v3546_v61 = vmul.f32 0.5, %v5582_v27  ;;  %v6861_v27 = vld [vmem:[#allocation5 + $0x394] ss:$8 sps:$4 sm:$0xff]  }
0x2999   :  { %v3548_v18 = vadd.f32 0.5, %v3546_v61  ;;  %v6864_v61 = vld [vmem:[#allocation5 + $0x390] ss:$8 sps:$4 sm:$0xff]  }
0x299b   :  { %v3550_v24 = vmul.f32 %v3548_v18, %v3484_v33 }
0x2a08   :  { %v3554_v62 = vpop.permute.xlu0 %3553 }
0x2a09   :  { %v3556_v47 = vmul.f32 %v3554_v62, %v3548_v18 }
0x2a0b   :  { %3558 = vrot.lane.b32.xlu1 %v3556_v47, %s5699_s24 }
0x2a7d   :  { %v3559_v44 = vpop.permute.xlu1 %3558 }
0x2a7e   :  { %v3561_v48 = vadd.f32 %v3559_v44, %v3550_v24  ;;  %v6871_v24 = vld [vmem:[#allocation5 + $0x3a4] ss:$8 sps:$4 sm:$0xff]   ;;  %v6873_v44 = vld [vmem:[#allocation5 + $0x3a0] ss:$8 sps:$4 sm:$0xff]  }
0x2a80   :  { %5583 = vtanh.f32 %v3561_v48 }
0x2a81   :  { %5585 = vtanh.f32 %v3543_v9  ;;  %v5417_v9 = vld [vmem:[#allocation5 + $0x2f4] ss:$8 sps:$4 sm:$0xff]  }
0x2a82   :  { %3885 = vmatprep.subr.bf16.mxu0 %v5417_v9 }
0x2a8a   :  { %v5584_v14 = vpop.eup %5583 }
0x2a8b   :  { %3564 = vrot.lane.b32.xlu0 %v5584_v14, %s5699_s24  ;;  %v5586_v15 = vpop.eup %5585  ;;  %v5415_v14 = vld [vmem:[#allocation5 + $0x2f0] ss:$8 sps:$4 sm:$0xff]  }
0x2a8c   :  { %v3547_v6 = vmul.f32 0.5, %v5586_v15  ;;  %v5420_v15 = vld [vmem:[#allocation5 + $0x304] ss:$8 sps:$4 sm:$0xff]  }
0x2a8e   :  { %v3549_v59 = vadd.f32 0.5, %v3547_v6  ;;  %v5418_v6 = vld [vmem:[#allocation5 + $0x300] ss:$8 sps:$4 sm:$0xff]  }
0x2afd   :  { %v3565_v12 = vpop.permute.xlu0 %3564 }
0x2afe   :  { %v3567_v30 = vmul.f32 %v3565_v12, %v3549_v59  ;;  %v5423_v59 = vld [vmem:[#allocation5 + $0x314] ss:$8 sps:$4 sm:$0xff]   ;;  %v5421_v12 = vld [vmem:[#allocation5 + $0x310] ss:$8 sps:$4 sm:$0xff]  }
0x2b00   :  { %3568 = vst.msk [vmem:[#allocation2 + $0x28] sm:$0xff] %vm99_vm4, %v3567_v30  ;;  %v3572_v58 = vpack.c.bf16 %v3567_v30, %v3567_v30 }
0x2b01   :  { %3569 = vst.msk [vmem:[#allocation2 + $0x10] sm:$0xff] %vm2308_vm15, %v3567_v30  ;;  %v5426_v30 = vld [vmem:[#allocation5 + $0x324] ss:$8 sps:$4 sm:$0xff]  }
0x2b02   :  { %4901 = vmatmul.mubr.msk.bf16.vlgmr.msra.gmra.mrb[76].mxu0 %vm532_vm11, %v3572_v58  ;;  %v5424_v58 = vld [vmem:[#allocation5 + $0x320] ss:$8 sps:$4 sm:$0xff]  }
0x2b03   :  { %3917 = vmatprep.mubr.bf16.mxu0 %v5694_v0  ;;  %3886 = vmatpush1.bf16.msra.mxu0 %v5415_v14 }
0x2b04   :  { %3887 = vmatprep.subr.bf16.mxu0 %v5420_v15 }
0x2b07   :  { %3888 = vmatpush1.bf16.msra.mxu0 %v5418_v6 }
0x2b08   :  { %3889 = vmatprep.subr.bf16.mxu0 %v5423_v59 }
0x2b0b   :  { %3890 = vmatpush1.bf16.msra.mxu0 %v5421_v12 }
0x2b0c   :  { %3891 = vmatprep.subr.bf16.mxu0 %v5426_v30 }
0x2b0f   :  { %3892 = vmatpush1.bf16.msra.mxu0 %v5424_v58 }
0x2bd5   :  { %v3610_v31 = vpop.f32.mrb[76].mxu0 }
0x2bd6   :  { %v3617_v39 = vadd.f32 %v3610_v31, %v3040_v28  ;;  %v3612_v17 = vpop.f32.mrb[77].mxu0  ;;  %v5429_v28 = vld [vmem:[#allocation5 + $0x334] ss:$8 sps:$4 sm:$0xff]   ;;  %v5432_v31 = vld [vmem:[#allocation5 + $0x344] ss:$8 sps:$4 sm:$0xff]  }
0x2bd7   :  { %v3618_v35 = vadd.f32 %v3612_v17, %v3042_v16  ;;  %v3614_v50 = vpop.f32.mrb[78].mxu0  ;;  %v5427_v16 = vld [vmem:[#allocation5 + $0x330] ss:$8 sps:$4 sm:$0xff]   ;;  %3893 = vmatprep.subr.bf16.mxu0 %v5429_v28  ;;  %v5435_v17 = vld [vmem:[#allocation5 + $0x354] ss:$8 sps:$4 sm:$0xff]  }
0x2bd8   :  { %v3615_v45 = vpop.f32.mrb[79].mxu0  ;;  %v3619_v63 = vmul.f32 0.5, %v3617_v39  ;;  %3894 = vmatpush1.bf16.msra.mxu0 %v5427_v16  ;;  %v5430_v39 = vld [vmem:[#allocation5 + $0x340] ss:$8 sps:$4 sm:$0xff]  }
0x2bd9   :  { %5587 = vtanh.f32 %v3618_v35  ;;  %v3620_v60 = vmul.f32 0.5, %v3618_v35  ;;  %3895 = vmatprep.subr.bf16.mxu0 %v5432_v31  ;;  %v5433_v35 = vld [vmem:[#allocation5 + $0x350] ss:$8 sps:$4 sm:$0xff]  }
0x2bda   :  { %5589 = vtanh.f32 %v3619_v63 }
0x2bdc   :  { %3896 = vmatpush1.bf16.msra.mxu0 %v5430_v39 }
0x2bdd   :  { %3897 = vmatprep.subr.bf16.mxu0 %v5435_v17 }
0x2be0   :  { %3898 = vmatpush1.bf16.msra.mxu0 %v5433_v35 }
0x2be3   :  { %v5588_v54 = vpop.eup %5587 }
0x2be4   :  { %3630 = vrot.lane.b32.xlu1 %v5588_v54, %s5699_s24  ;;  %v5590_v43 = vpop.eup %5589 }
0x2be5   :  { %v3623_v22 = vmul.f32 0.5, %v5590_v43 }
0x2be7   :  { %v3625_v49 = vadd.f32 0.5, %v3623_v22 }
0x2be9   :  { %v3627_v29 = vmul.f32 %v3625_v49, %v3561_v48 }
0x2c56   :  { %v3631_v41 = vpop.permute.xlu1 %3630 }
0x2c57   :  { %v3633_v25 = vmul.f32 %v3631_v41, %v3625_v49  ;;  %v5436_v41 = vld [vmem:[#allocation5 + $0x360] ss:$8 sps:$4 sm:$0xff]  }
0x2c59   :  { %3635 = vrot.lane.b32.xlu0 %v3633_v25, %s5699_s24  ;;  %v5438_v25 = vld [vmem:[#allocation5 + $0x364] ss:$8 sps:$4 sm:$0xff]  }
0x2c5a   :  { %3899 = vmatprep.subr.bf16.mxu0 %v5438_v25  ;;  %v6949_v25 = vld [vmem:[#allocation2 + $0x20] sm:$0xff] }
0x2c5b   :  { %3900 = vmatpush1.bf16.msra.mxu0 %v5436_v41  ;;  %v6946_v41 = vld [vmem:[#allocation2 + $0x28] sm:$0xff] }
0x2c5c   :  { %4259 = vmatprep.subr.bf16.mxu0 %v6850_v26 }
0x2ccb   :  { %v3636_v53 = vpop.permute.xlu0 %3635 }
0x2ccc   :  { %v3638_v37 = vadd.f32 %v3636_v53, %v3627_v29 }
0x2cce   :  { %5591 = vtanh.f32 %v3638_v37 }
0x2ccf   :  { %5593 = vtanh.f32 %v3620_v60 }
0x2cd8   :  { %v5592_v56 = vpop.eup %5591 }
0x2cd9   :  { %3641 = vrot.lane.b32.xlu1 %v5592_v56, %s5699_s24  ;;  %v5594_v51 = vpop.eup %5593 }
0x2cda   :  { %v3624_v38 = vmul.f32 0.5, %v5594_v51 }
0x2cdc   :  { %v3626_v33 = vadd.f32 0.5, %v3624_v38 }
0x2d4b   :  { %v3642_v40 = vpop.permute.xlu1 %3641 }
0x2d4c   :  { %v3644_v20 = vmul.f32 %v3642_v40, %v3626_v33 }
0x2d4e   :  { %3645 = vst.msk [vmem:[#allocation2 + $0x30] sm:$0xff] %vm99_vm4, %v3644_v20  ;;  %v3649_v3 = vpack.c.bf16 %v3644_v20, %v3644_v20 }
0x2d4f   :  { %3646 = vst.msk [vmem:[#allocation2 + $0x8] sm:$0xff] %vm2308_vm15, %v3644_v20 }
0x2d50   :  { %4902 = vmatmul.mubr.msk.bf16.vlgmr.msra.gmra.mrb[100].mxu1 %vm532_vm11, %v3649_v3 }
0x2d51   :  { %4060 = vmatprep.mubr.bf16.mxu1 %v5694_v0  ;;  %4029 = vmatpush1.bf16.msra.mxu1 %v6852_v21 }
0x2d52   :  { %4030 = vmatprep.subr.bf16.mxu1 %v6854_v10 }
0x2d55   :  { %4031 = vmatpush1.bf16.msra.mxu1 %v6858_v7  ;;  %v6887_v29 = vld [vmem:[#allocation2 + $0x30] sm:$0xff] }
0x2d56   :  { %4032 = vmatprep.subr.bf16.mxu1 %v6861_v27  ;;  %v6902_v33 = vld [vmem:[#allocation2 + $0x8] sm:$0xff] }
0x2d59   :  { %4033 = vmatpush1.bf16.msra.mxu1 %v6864_v61 }
0x2d5a   :  { %4034 = vmatprep.subr.bf16.mxu1 %v6871_v24 }
0x2d5d   :  { %4035 = vmatpush1.bf16.msra.mxu1 %v6873_v44 }
0x2d5e   :  { %4105 = vmatprep.subr.bf16.mxu1 %v6850_v26 }
0x2e23   :  { %v3687_v2 = vpop.f32.mrb[100].mxu1 }
0x2e24   :  { %v3694_v23 = vadd.f32 %v3687_v2, %v3044_v57  ;;  %v3689_v11 = vpop.f32.mrb[101].mxu1 }
0x2e25   :  { %v6845_v46 = vadd.f32 %v3689_v11, %v3046_v34  ;;  %v3691_v8 = vpop.f32.mrb[102].mxu1  ;;  %v4903_v11 = vld [vmem:[%s7120_s2 + $0x17] ss:$8 sm:$0x3] }
0x2e26   :  { %v3692_v32 = vpop.f32.mrb[103].mxu1  ;;  %v3696_v19 = vmul.f32 0.5, %v3694_v23  ;;  %v6924_v8 = vrot.slane %v4903_v11, %v6363_v13 }
0x2e27   :  { %5595 = vtanh.f32 %v6845_v46  ;;  %v3697_v50 = vmul.f32 0.5, %v6845_v46  ;;  %v6921_v46 = vrot.slane %v4903_v11, %v6358_v42  ;;  %v3727_v11 = vld [vmem:[#allocation2 + $0x18] sm:$0xff] }
0x2e28   :  { %5597 = vtanh.f32 %v3696_v19 }
0x2e31   :  { %v5596_v55 = vpop.eup %5595 }
0x2e32   :  { %3707 = vrot.lane.b32.xlu0 %v5596_v55, %s5699_s24  ;;  %v5598_v36 = vpop.eup %5597 }
0x2e33   :  { %v3700_v4 = vmul.f32 0.5, %v5598_v36 }
0x2e35   :  { %v3702_v5 = vadd.f32 0.5, %v3700_v4 }
0x2e37   :  { %v3704_v18 = vmul.f32 %v3702_v5, %v3638_v37 }
0x2ea4   :  { %v3708_v1 = vpop.permute.xlu0 %3707 }
0x2ea5   :  { %v3710_v52 = vmul.f32 %v3708_v1, %v3702_v5 }
0x2ea7   :  { %3712 = vrot.lane.b32.xlu1 %v3710_v52, %s5699_s24 }
0x2f19   :  { %v3713_v62 = vpop.permute.xlu1 %3712 }
0x2f1a   :  { %v6868_v47 = vadd.f32 %v3713_v62, %v3704_v18 }
0x2f1c   :  { %5599 = vtanh.f32 %v6868_v47 }
0x2f1d   :  { %5601 = vtanh.f32 %v3697_v50 }
0x2f26   :  { %v5600_v48 = vpop.eup %5599 }
0x2f27   :  { %3718 = vrot.lane.b32.xlu0 %v5600_v48, %s5699_s24  ;;  %v5602_v45 = vpop.eup %5601 }
0x2f28   :  { %v3701_v54 = vmul.f32 0.5, %v5602_v45 }
0x2f2a   :  { %v3703_v63 = vadd.f32 0.5, %v3701_v54 }
0x2f99   :  { %v3719_v43 = vpop.permute.xlu0 %3718 }
0x2f9a   :  { %v3721_v22 = vmul.f32 %v3719_v43, %v3703_v63 }
0x2f9c   :  { %3722 = vst.msk [vmem:[#allocation2 + $0x38] sm:$0xff] %vm99_vm4, %v3721_v22  ;;  %v3984_v49 = vpack.c.bf16 %v3721_v22, %v3721_v22 }
0x2f9d   :  { %3723 = vst.msk [vmem:[#allocation2] sm:$0xff] %vm2308_vm15, %v3721_v22 }
0x2f9e   :  { %4928 = vmatmul.mubr.msk.bf16.vlgmr.msra.gmra.mrb[104].mxu1 %vm532_vm11, %v3984_v49 }
0x2f9f   :  { %4106 = vmatpush1.bf16.msra.mxu1 %v6852_v21  ;;  %4137 = vmatprep.mubr.bf16.mxu1 %v5694_v0 }
0x2fa0   :  { %4107 = vmatprep.subr.bf16.mxu1 %v6854_v10 }
0x2fa3   :  { %v6889_v53 = vld [vmem:[#allocation2 + $0x38] sm:$0xff]  ;;  %4108 = vmatpush1.bf16.msra.mxu1 %v6858_v7 }
0x2fa4   :  { %v5300_v37 = vpack.i.bf16 %v6887_v29, %v6889_v53  ;;  %4109 = vmatprep.subr.bf16.mxu1 %v6861_v27  ;;  %v6900_v38 = vld [vmem:[#allocation2] sm:$0xff] }
0x2fa6   :  { %5301 = vrot.lane.b32.xlu1 %v5300_v37, %s5699_s24  ;;  %v5305_v37 = vpack.i.bf16 %v6949_v25, %v6946_v41 }
0x2fa7   :  { %4110 = vmatpush1.bf16.msra.mxu1 %v6864_v61 }
0x2fa8   :  { %4111 = vmatprep.subr.bf16.mxu1 %v6871_v24 }
0x2fab   :  { %4112 = vmatpush1.bf16.msra.mxu1 %v6873_v44 }
0x2fac   :  { %4182 = vmatprep.subr.bf16.mxu1 %v6850_v26 }
0x3018   :  { %v5302_v56 = vpop.permute.xlu1 %5301 }
0x3019   :  { %v5304_v60 = vunpack.i.h.bf16 %v5302_v56  ;;  %v5303_v51 = vunpack.i.l.bf16 %v5302_v56 }
0x301b   :  { %v3764_v40 = vsel %vm532_vm11, %v6900_v38, %v5303_v51  ;;  %v3765_v20 = vsel %vm532_vm11, %v6902_v33, %v5304_v60 }
0x301c   :  { %v3772_v3 = vpack.c.bf16 %v3765_v20, %v3764_v40 }
0x301e   :  { %3918 = vmatmul.mubr.bf16.vlgmr.msra.gmra.mrb[80].mxu0 %v3772_v3 }
0x301f   :  { %3927 = vmatprep.mubr.bf16.mxu0 %v5694_v0  ;;  %4260 = vmatpush1.bf16.msra.mxu0 %v6852_v21 }
0x3020   :  { %4261 = vmatprep.subr.bf16.mxu0 %v6854_v10 }
0x3023   :  { %4262 = vmatpush1.bf16.msra.mxu0 %v6858_v7 }
0x3024   :  { %4263 = vmatprep.subr.bf16.mxu0 %v6861_v27 }
0x3027   :  { %4264 = vmatpush1.bf16.msra.mxu0 %v6864_v61 }
0x3028   :  { %4265 = vmatprep.subr.bf16.mxu0 %v6871_v24 }
0x302b   :  { %4266 = vmatpush1.bf16.msra.mxu0 %v6873_v44 }
0x302c   :  { %4413 = vmatprep.subr.bf16.mxu0 %v6850_v26 }
0x3071   :  { %v4062_v57 = vpop.f32.mrb[104].mxu1 }
0x3072   :  { %v4064_v34 = vpop.f32.mrb[105].mxu1 }
0x3073   :  { %v4066_v2 = vpop.f32.mrb[106].mxu1 }
0x3074   :  { %v4067_v23 = vpop.f32.mrb[107].mxu1 }
0x3075   :  { %v3726_v23 = vld [vmem:[#allocation2 + $0x10] sm:$0xff] }
0x30f1   :  { %v3919_v32 = vpop.f32.mrb[80].mxu0 }
0x30f2   :  { %v3920_v55 = vadd.f32 %v3919_v32, %v6921_v46  ;;  %v3921_v19 = vpop.f32.mrb[81].mxu0 }
0x30f3   :  { %v3922_v36 = vadd.f32 %v3921_v19, %v6924_v8  ;;  %v3923_v4 = vpop.f32.mrb[82].mxu0 }
0x30f4   :  { %v4069_v5 = vadd.f32 %v4062_v57, %v3920_v55  ;;  %v3925_v1 = vpop.f32.mrb[83].mxu0 }
0x30f5   :  { %v4070_v52 = vadd.f32 %v4064_v34, %v3922_v36  ;;  %v3926_v35 = vadd.f32 %v3925_v1, %v6924_v8 }
0x30f6   :  { %v4071_v62 = vmul.f32 0.5, %v4069_v5 }
0x30f7   :  { %5603 = vtanh.f32 %v4070_v52  ;;  %v4072_v30 = vmul.f32 0.5, %v4070_v52 }
0x30f8   :  { %5605 = vtanh.f32 %v4071_v62 }
0x3101   :  { %v5604_v18 = vpop.eup %5603 }
0x3102   :  { %4082 = vrot.lane.b32.xlu0 %v5604_v18, %s5699_s24  ;;  %v5606_v42 = vpop.eup %5605 }
0x3103   :  { %v4075_v48 = vmul.f32 0.5, %v5606_v42 }
0x3105   :  { %v4077_v13 = vadd.f32 0.5, %v4075_v48 }
0x3107   :  { %v4079_v15 = vmul.f32 %v4077_v13, %v6868_v47  ;;  %v3924_v47 = vadd.f32 %v3923_v4, %v6921_v46 }
0x3174   :  { %v4083_v14 = vpop.permute.xlu0 %4082 }
0x3175   :  { %v4085_v9 = vmul.f32 %v4083_v14, %v4077_v13 }
0x3177   :  { %4087 = vrot.lane.b32.xlu1 %v4085_v9, %s5699_s24 }
0x31e9   :  { %v4088_v6 = vpop.permute.xlu1 %4087 }
0x31ea   :  { %v4090_v59 = vadd.f32 %v4088_v6, %v4079_v15 }
0x31ec   :  { %5607 = vtanh.f32 %v4090_v59 }
0x31ed   :  { %5609 = vtanh.f32 %v4072_v30 }
0x31f6   :  { %v5608_v12 = vpop.eup %5607 }
0x31f7   :  { %4093 = vrot.lane.b32.xlu0 %v5608_v12, %s5699_s24  ;;  %v5610_v58 = vpop.eup %5609 }
0x31f8   :  { %v4076_v28 = vmul.f32 0.5, %v5610_v58 }
0x31fa   :  { %v4078_v16 = vadd.f32 0.5, %v4076_v28 }
0x3269   :  { %v4094_v31 = vpop.permute.xlu0 %4093 }
0x326a   :  { %v4096_v39 = vmul.f32 %v4094_v31, %v4078_v16 }
0x326c   :  { %v4101_v17 = vpack.c.bf16 %v4096_v39, %v4096_v39  ;;  %4097 = vst.msk [vmem:[#allocation2] sm:$0xff] %vm99_vm4, %v4096_v39 }
0x326d   :  { %4098 = vst.msk [vmem:[#allocation2 + $0x38] sm:$0xff] %vm2308_vm15, %v4096_v39 }
0x326e   :  { %4929 = vmatmul.mubr.msk.bf16.vlgmr.msra.gmra.mrb[108].mxu1 %vm532_vm11, %v4101_v17 }
0x326f   :  { %4183 = vmatpush1.bf16.msra.mxu1 %v6852_v21  ;;  %4214 = vmatprep.mubr.bf16.mxu1 %v5694_v0 }
0x3270   :  { %4184 = vmatprep.subr.bf16.mxu1 %v6854_v10 }
0x3273   :  { %4185 = vmatpush1.bf16.msra.mxu1 %v6858_v7 }
0x3274   :  { %4186 = vmatprep.subr.bf16.mxu1 %v6861_v27 }
0x3277   :  { %4187 = vmatpush1.bf16.msra.mxu1 %v6864_v61 }
0x3278   :  { %4188 = vmatprep.subr.bf16.mxu1 %v6871_v24 }
0x327b   :  { %4189 = vmatpush1.bf16.msra.mxu1 %v6873_v44 }
0x327c   :  { %4336 = vmatprep.subr.bf16.mxu1 %v6850_v26 }
0x3341   :  { %v4139_v50 = vpop.f32.mrb[108].mxu1 }
0x3342   :  { %v4146_v45 = vadd.f32 %v4139_v50, %v3924_v47  ;;  %v4141_v54 = vpop.f32.mrb[109].mxu1 }
0x3343   :  { %v4147_v63 = vadd.f32 %v4141_v54, %v3926_v35  ;;  %v4143_v43 = vpop.f32.mrb[110].mxu1  ;;  %v5310_v35 = vpack.i.bf16 %v3726_v23, %v3727_v11 }
0x3344   :  { %v4144_v22 = vpop.f32.mrb[111].mxu1  ;;  %v4148_v56 = vmul.f32 0.5, %v4146_v45 }
0x3345   :  { %5611 = vtanh.f32 %v4147_v63  ;;  %v4149_v62 = vmul.f32 0.5, %v4147_v63 }
0x3346   :  { %5613 = vtanh.f32 %v4148_v56 }
0x334f   :  { %v5612_v49 = vpop.eup %5611 }
0x3350   :  { %4159 = vrot.lane.b32.xlu1 %v5612_v49, %s5699_s24  ;;  %v5614_v60 = vpop.eup %5613 }
0x3351   :  { %v4152_v51 = vmul.f32 0.5, %v5614_v60  ;;  %v5315_v60 = vpack.i.bf16 %v6900_v38, %v6902_v33 }
0x3353   :  { %v4154_v40 = vadd.f32 0.5, %v4152_v51 }
0x3354   :  { %5306 = vrot.lane.b32.xlu1 %v5305_v37, %s5699_s24 }
0x3355   :  { %v4156_v36 = vmul.f32 %v4154_v40, %v4090_v59 }
0x33c2   :  { %v4160_v20 = vpop.permute.xlu1 %4159 }
0x33c3   :  { %v4162_v3 = vmul.f32 %v4160_v20, %v4154_v40 }
0x33c5   :  { %4164 = vrot.lane.b32.xlu0 %v4162_v3, %s5699_s24 }
0x33c6   :  { %v5307_v57 = vpop.permute.xlu1 %5306 }
0x33c7   :  { %v5309_v34 = vunpack.i.h.bf16 %v5307_v57  ;;  %v5308_v2 = vunpack.i.l.bf16 %v5307_v57 }
0x33c9   :  { %v3766_v32 = vsel %vm532_vm11, %v3726_v23, %v5308_v2  ;;  %v3767_v55 = vsel %vm532_vm11, %v3727_v11, %v5309_v34 }
0x33ca   :  { %v3773_v19 = vpack.c.bf16 %v3767_v55, %v3766_v32 }
0x33cc   :  { %3928 = vmatmul.mubr.bf16.gmra.mrb[84].mxu0 %v3773_v19 }
0x33cd   :  { %3937 = vmatprep.mubr.bf16.mxu0 %v5694_v0 }
0x3437   :  { %v4165_v4 = vpop.permute.xlu0 %4164 }
0x3438   :  { %v4167_v5 = vadd.f32 %v4165_v4, %v4156_v36 }
0x343a   :  { %5615 = vtanh.f32 %v4167_v5 }
0x343b   :  { %5617 = vtanh.f32 %v4149_v62 }
0x3444   :  { %v5616_v1 = vpop.eup %5615 }
0x3445   :  { %4170 = vrot.lane.b32.xlu0 %v5616_v1, %s5699_s24  ;;  %v5618_v13 = vpop.eup %5617 }
0x3446   :  { %v4153_v14 = vmul.f32 0.5, %v5618_v13 }
0x3448   :  { %v4155_v9 = vadd.f32 0.5, %v4153_v14 }
0x349f   :  { %v3929_v52 = vpop.f32.mrb[84].mxu0 }
0x34a0   :  { %v3931_v18 = vpop.f32.mrb[85].mxu0  ;;  %v3930_v12 = vadd.f32 %v3929_v52, %v6921_v46 }
0x34a1   :  { %v6959_v42 = vpop.f32.mrb[86].mxu0  ;;  %v3932_v30 = vadd.f32 %v3931_v18, %v6924_v8 }
0x34a2   :  { %v6961_v48 = vpop.f32.mrb[87].mxu0 }
0x34b7   :  { %v4171_v15 = vpop.permute.xlu0 %4170 }
0x34b8   :  { %v4173_v6 = vmul.f32 %v4171_v15, %v4155_v9  ;;  %v3934_v15 = vadd.f32 %v6959_v42, %v6921_v46 }
0x34ba   :  { %v4178_v59 = vpack.c.bf16 %v4173_v6, %v4173_v6  ;;  %4174 = vst.msk [vmem:[#allocation2 + $0x8] sm:$0xff] %vm99_vm4, %v4173_v6 }
0x34bb   :  { %4175 = vst.msk [vmem:[#allocation2 + $0x30] sm:$0xff] %vm2308_vm15, %v4173_v6  ;;  %v3936_v6 = vadd.f32 %v6961_v48, %v6924_v8 }
0x34bc   :  { %4930 = vmatmul.mubr.msk.bf16.vlgmr.msra.gmra.mrb[112].mxu1 %vm532_vm11, %v4178_v59 }
0x34bd   :  { %4337 = vmatpush1.bf16.msra.mxu1 %v6852_v21  ;;  %4368 = vmatprep.mubr.bf16.mxu1 %v5694_v0 }
0x34be   :  { %4338 = vmatprep.subr.bf16.mxu1 %v6854_v10 }
0x34c1   :  { %4339 = vmatpush1.bf16.msra.mxu1 %v6858_v7 }
0x34c2   :  { %4340 = vmatprep.subr.bf16.mxu1 %v6861_v27 }
0x34c5   :  { %4341 = vmatpush1.bf16.msra.mxu1 %v6864_v61 }
0x34c6   :  { %4342 = vmatprep.subr.bf16.mxu1 %v6871_v24 }
0x34c9   :  { %4343 = vmatpush1.bf16.msra.mxu1 %v6873_v44 }
0x34ca   :  { %4490 = vmatprep.subr.bf16.mxu1 %v6850_v26 }
0x358f   :  { %v4216_v58 = vpop.f32.mrb[112].mxu1 }
0x3590   :  { %v4223_v28 = vadd.f32 %v4216_v58, %v3930_v12  ;;  %v4218_v16 = vpop.f32.mrb[113].mxu1 }
0x3591   :  { %v4224_v31 = vadd.f32 %v4218_v16, %v3932_v30  ;;  %v4220_v39 = vpop.f32.mrb[114].mxu1 }
0x3592   :  { %v4221_v17 = vpop.f32.mrb[115].mxu1  ;;  %v4225_v50 = vmul.f32 0.5, %v4223_v28 }
0x3593   :  { %5619 = vtanh.f32 %v4224_v31  ;;  %v4226_v19 = vmul.f32 0.5, %v4224_v31 }
0x3594   :  { %5621 = vtanh.f32 %v4225_v50 }
0x359d   :  { %v5620_v47 = vpop.eup %5619 }
0x359e   :  { %4236 = vrot.lane.b32.xlu1 %v5620_v47, %s5699_s24  ;;  %v5622_v45 = vpop.eup %5621 }
0x359f   :  { %v4229_v54 = vmul.f32 0.5, %v5622_v45 }
0x35a1   :  { %v4231_v63 = vadd.f32 0.5, %v4229_v54 }
0x35a2   :  { %5311 = vrot.lane.b32.xlu1 %v5310_v35, %s5699_s24 }
0x35a3   :  { %v4233_v3 = vmul.f32 %v4231_v63, %v4167_v5 }
0x3610   :  { %v4237_v43 = vpop.permute.xlu1 %4236 }
0x3611   :  { %v4239_v22 = vmul.f32 %v4237_v43, %v4231_v63 }
0x3613   :  { %4241 = vrot.lane.b32.xlu0 %v4239_v22, %s5699_s24 }
0x3614   :  { %v5312_v49 = vpop.permute.xlu1 %5311 }
0x3615   :  { %v5314_v37 = vunpack.i.h.bf16 %v5312_v49  ;;  %v5313_v56 = vunpack.i.l.bf16 %v5312_v49 }
0x3617   :  { %5316 = vrot.lane.b32.xlu0 %v5315_v60, %s5699_s24  ;;  %v3768_v51 = vsel %vm532_vm11, %v6949_v25, %v5313_v56  ;;  %v3769_v40 = vsel %vm532_vm11, %v6946_v41, %v5314_v37 }
0x3618   :  { %v3774_v20 = vpack.c.bf16 %v3769_v40, %v3768_v51 }
0x361a   :  { %3938 = vmatmul.mubr.bf16.gmra.mrb[88].mxu0 %v3774_v20 }
0x361b   :  { %3947 = vmatprep.mubr.bf16.mxu0 %v5694_v0 }
0x3685   :  { %v4242_v57 = vpop.permute.xlu0 %4241 }
0x3686   :  { %v4244_v34 = vadd.f32 %v4242_v57, %v4233_v3 }
0x3688   :  { %5623 = vtanh.f32 %v4244_v34 }
0x3689   :  { %v5317_v2 = vpop.permute.xlu0 %5316  ;;  %5625 = vtanh.f32 %v4226_v19 }
0x368a   :  { %v5319_v23 = vunpack.i.h.bf16 %v5317_v2  ;;  %v5318_v11 = vunpack.i.l.bf16 %v5317_v2 }
0x368c   :  { %v3770_v38 = vsel %vm532_vm11, %v6887_v29, %v5318_v11  ;;  %v3771_v33 = vsel %vm532_vm11, %v6889_v53, %v5319_v23 }
0x368d   :  { %v3775_v25 = vpack.c.bf16 %v3771_v33, %v3770_v38 }
0x368f   :  { %3948 = vmatmul.mubr.bf16.gmra.mrb[92].mxu0 %v3775_v25 }
0x3690   :  { %4291 = vmatprep.mubr.bf16.mxu0 %v5694_v0 }
0x3692   :  { %v5624_v41 = vpop.eup %5623 }
0x3693   :  { %4247 = vrot.lane.b32.xlu1 %v5624_v41, %s5699_s24  ;;  %v5626_v29 = vpop.eup %5625 }
0x3694   :  { %v4230_v5 = vmul.f32 0.5, %v5626_v29 }
0x3696   :  { %v4232_v53 = vadd.f32 0.5, %v4230_v5 }
0x36ed   :  { %v6994_v32 = vpop.f32.mrb[88].mxu0 }
0x36ee   :  { %v6996_v55 = vpop.f32.mrb[89].mxu0  ;;  %v3940_v51 = vadd.f32 %v6994_v32, %v6921_v46 }
0x36ef   :  { %v6998_v36 = vpop.f32.mrb[90].mxu0  ;;  %v3942_v40 = vadd.f32 %v6996_v55, %v6924_v8 }
0x36f0   :  { %v7000_v4 = vpop.f32.mrb[91].mxu0 }
0x3705   :  { %v4248_v1 = vpop.permute.xlu1 %4247 }
0x3706   :  { %v4250_v52 = vmul.f32 %v4248_v1, %v4232_v53 }
0x3708   :  { %v4255_v18 = vpack.c.bf16 %v4250_v52, %v4250_v52  ;;  %4251 = vst.msk [vmem:[#allocation2 + $0x10] sm:$0xff] %vm99_vm4, %v4250_v52 }
0x3709   :  { %4252 = vst.msk [vmem:[#allocation2 + $0x28] sm:$0xff] %vm2308_vm15, %v4250_v52 }
0x370a   :  { %4931 = vmatmul.mubr.msk.bf16.vlgmr.msra.gmra.mrb[96].mxu0 %vm532_vm11, %v4255_v18 }
0x370b   :  { %4414 = vmatpush1.bf16.msra.mxu0 %v6852_v21  ;;  %4445 = vmatprep.mubr.bf16.mxu0 %v5694_v0 }
0x370c   :  { %4415 = vmatprep.subr.bf16.mxu0 %v6854_v10 }
0x370f   :  { %4416 = vmatpush1.bf16.msra.mxu0 %v6858_v7 }
0x3710   :  { %4417 = vmatprep.subr.bf16.mxu0 %v6861_v27 }
0x3713   :  { %4418 = vmatpush1.bf16.msra.mxu0 %v6864_v61 }
0x3714   :  { %4419 = vmatprep.subr.bf16.mxu0 %v6871_v24 }
0x3717   :  { %4420 = vmatpush1.bf16.msra.mxu0 %v6873_v44 }
0x3718   :  { %4567 = vmatprep.subr.bf16.mxu0 %v6850_v26 }
0x3762   :  { %v7014_v62 = vpop.f32.mrb[92].mxu0 }
0x3763   :  { %v7016_v13 = vpop.f32.mrb[93].mxu0 }
0x3764   :  { %v7018_v14 = vpop.f32.mrb[94].mxu0 }
0x3765   :  { %v7020_v9 = vpop.f32.mrb[95].mxu0 }
0x37dd   :  { %v4293_v59 = vpop.f32.mrb[96].mxu0 }
0x37de   :  { %v4300_v12 = vadd.f32 %v4293_v59, %v3934_v15  ;;  %v4295_v30 = vpop.f32.mrb[97].mxu0 }
0x37df   :  { %v4301_v58 = vadd.f32 %v4295_v30, %v3936_v6  ;;  %v4297_v28 = vpop.f32.mrb[98].mxu0  ;;  %v3944_v30 = vadd.f32 %v6998_v36, %v6921_v46 }
0x37e0   :  { %v4298_v26 = vpop.f32.mrb[99].mxu0  ;;  %v4302_v31 = vmul.f32 0.5, %v4300_v12 }
0x37e1   :  { %5627 = vtanh.f32 %v4301_v58  ;;  %v4303_v63 = vmul.f32 0.5, %v4301_v58 }
0x37e2   :  { %5629 = vtanh.f32 %v4302_v31 }
0x37eb   :  { %v5628_v16 = vpop.eup %5627 }
0x37ec   :  { %4313 = vrot.lane.b32.xlu0 %v5628_v16, %s5699_s24  ;;  %v5630_v39 = vpop.eup %5629 }
0x37ed   :  { %v4306_v17 = vmul.f32 0.5, %v5630_v39 }
0x37ef   :  { %v4308_v47 = vadd.f32 0.5, %v4306_v17 }
0x37f1   :  { %v4310_v48 = vmul.f32 %v4308_v47, %v4244_v34 }
0x385e   :  { %v4314_v35 = vpop.permute.xlu0 %4313 }
0x385f   :  { %v4316_v42 = vmul.f32 %v4314_v35, %v4308_v47 }
0x3861   :  { %4318 = vrot.lane.b32.xlu1 %v4316_v42, %s5699_s24 }
0x38d3   :  { %v4319_v50 = vpop.permute.xlu1 %4318 }
0x38d4   :  { %v4321_v45 = vadd.f32 %v4319_v50, %v4310_v48 }
0x38d6   :  { %5631 = vtanh.f32 %v4321_v45 }
0x38d7   :  { %5633 = vtanh.f32 %v4303_v63 }
0x38e0   :  { %v5632_v54 = vpop.eup %5631 }
0x38e1   :  { %4324 = vrot.lane.b32.xlu0 %v5632_v54, %s5699_s24  ;;  %v5634_v43 = vpop.eup %5633 }
0x38e2   :  { %v4307_v22 = vmul.f32 0.5, %v5634_v43  ;;  %v3950_v43 = vadd.f32 %v7014_v62, %v6921_v46 }
0x38e4   :  { %v4309_v49 = vadd.f32 0.5, %v4307_v22  ;;  %v3952_v22 = vadd.f32 %v7016_v13, %v6924_v8 }
0x3953   :  { %v4325_v37 = vpop.permute.xlu0 %4324 }
0x3954   :  { %v4327_v56 = vmul.f32 %v4325_v37, %v4309_v49 }
0x3956   :  { %v4332_v60 = vpack.c.bf16 %v4327_v56, %v4327_v56  ;;  %4328 = vst.msk [vmem:[#allocation2 + $0x18] sm:$0xff] %vm99_vm4, %v4327_v56 }
0x3957   :  { %4329 = vst.msk [vmem:[#allocation2 + $0x20] sm:$0xff] %vm2308_vm15, %v4327_v56 }
0x3958   :  { %4932 = vmatmul.mubr.msk.bf16.vlgmr.msra.gmra.mrb[116].mxu1 %vm532_vm11, %v4332_v60 }
0x3959   :  { %4491 = vmatpush1.bf16.msra.mxu1 %v6852_v21  ;;  %4522 = vmatprep.mubr.bf16.mxu1 %v5694_v0 }
0x395a   :  { %4492 = vmatprep.subr.bf16.mxu1 %v6854_v10 }
0x395d   :  { %4493 = vmatpush1.bf16.msra.mxu1 %v6858_v7 }
0x395e   :  { %4494 = vmatprep.subr.bf16.mxu1 %v6861_v27 }
0x3961   :  { %4495 = vmatpush1.bf16.msra.mxu1 %v6864_v61 }
0x3962   :  { %4496 = vmatprep.subr.bf16.mxu1 %v6871_v24 }
0x3965   :  { %4497 = vmatpush1.bf16.msra.mxu1 %v6873_v44 }
0x3a2b   :  { %v4370_v20 = vpop.f32.mrb[116].mxu1 }
0x3a2c   :  { %v4377_v3 = vadd.f32 %v4370_v20, %v3940_v51  ;;  %v4372_v57 = vpop.f32.mrb[117].mxu1 }
0x3a2d   :  { %v4378_v34 = vadd.f32 %v4372_v57, %v3942_v40  ;;  %v4374_v2 = vpop.f32.mrb[118].mxu1 }
0x3a2e   :  { %v4375_v23 = vpop.f32.mrb[119].mxu1  ;;  %v4379_v38 = vmul.f32 0.5, %v4377_v3 }
0x3a2f   :  { %5635 = vtanh.f32 %v4378_v34  ;;  %v4380_v1 = vmul.f32 0.5, %v4378_v34 }
0x3a30   :  { %5637 = vtanh.f32 %v4379_v38 }
0x3a39   :  { %v5636_v11 = vpop.eup %5635 }
0x3a3a   :  { %4390 = vrot.lane.b32.xlu1 %v5636_v11, %s5699_s24  ;;  %v5638_v33 = vpop.eup %5637 }
0x3a3b   :  { %v4383_v25 = vmul.f32 0.5, %v5638_v33 }
0x3a3d   :  { %v4385_v41 = vadd.f32 0.5, %v4383_v25 }
0x3a3f   :  { %v4387_v55 = vmul.f32 %v4385_v41, %v4321_v45 }
0x3aac   :  { %v4391_v19 = vpop.permute.xlu1 %4390 }
0x3aad   :  { %v4393_v32 = vmul.f32 %v4391_v19, %v4385_v41 }
0x3aaf   :  { %4395 = vrot.lane.b32.xlu0 %v4393_v32, %s5699_s24 }
0x3b21   :  { %v4396_v29 = vpop.permute.xlu0 %4395 }
0x3b22   :  { %v4398_v5 = vadd.f32 %v4396_v29, %v4387_v55 }
0x3b24   :  { %5639 = vtanh.f32 %v4398_v5 }
0x3b25   :  { %5641 = vtanh.f32 %v4380_v1  ;;  %v3956_v1 = vadd.f32 %v7020_v9, %v6924_v8 }
0x3b2e   :  { %v5640_v53 = vpop.eup %5639 }
0x3b2f   :  { %4401 = vrot.lane.b32.xlu1 %v5640_v53, %s5699_s24  ;;  %v5642_v52 = vpop.eup %5641  ;;  %v3954_v53 = vadd.f32 %v7018_v14, %v6921_v46 }
0x3b30   :  { %v4384_v18 = vmul.f32 0.5, %v5642_v52 }
0x3b32   :  { %v4386_v15 = vadd.f32 0.5, %v4384_v18 }
0x3ba1   :  { %v4402_v6 = vpop.permute.xlu1 %4401 }
0x3ba2   :  { %v4404_v59 = vmul.f32 %v4402_v6, %v4386_v15 }
0x3ba4   :  { %4405 = vst.msk [vmem:[#allocation2 + $0x20] sm:$0xff] %vm99_vm4, %v4404_v59  ;;  %v4409_v12 = vpack.c.bf16 %v4404_v59, %v4404_v59 }
0x3ba5   :  { %4406 = vst.msk [vmem:[#allocation2 + $0x18] sm:$0xff] %vm2308_vm15, %v4404_v59 }
0x3ba6   :  { %4933 = vmatmul.mubr.msk.bf16.vlgmr.msra.gmra.mrb[100].mxu0 %vm532_vm11, %v4409_v12 }
0x3ba7   :  { %4568 = vmatpush1.bf16.msra.mxu0 %v6852_v21  ;;  %4599 = vmatprep.mubr.bf16.mxu0 %v5694_v0  ;;  %v3946_v21 = vadd.f32 %v7000_v4, %v6924_v8  ;;  %v5439_v8 = vld [vmem:[#allocation5 + $0x3b0] ss:$8 sps:$4 sm:$0xff]  }
0x3ba8   :  { %4569 = vmatprep.subr.bf16.mxu0 %v6854_v10  ;;  %5111 = vmatprep.subr.bf16.mxu1 %v5439_v8 }
0x3bab   :  { %4570 = vmatpush1.bf16.msra.mxu0 %v6858_v7 }
0x3bac   :  { %4571 = vmatprep.subr.bf16.mxu0 %v6861_v27 }
0x3baf   :  { %4572 = vmatpush1.bf16.msra.mxu0 %v6864_v61 }
0x3bb0   :  { %4573 = vmatprep.subr.bf16.mxu0 %v6871_v24 }
0x3bb3   :  { %4574 = vmatpush1.bf16.msra.mxu0 %v6873_v44 }
0x3c79   :  { %v4447_v58 = vpop.f32.mrb[100].mxu0 }
0x3c7a   :  { %v4454_v0 = vadd.f32 %v4447_v58, %v3944_v30  ;;  %v4449_v28 = vpop.f32.mrb[101].mxu0 }
0x3c7b   :  { %v4455_v10 = vadd.f32 %v4449_v28, %v3946_v21  ;;  %v4451_v26 = vpop.f32.mrb[102].mxu0 }
0x3c7c   :  { %v4452_v7 = vpop.f32.mrb[103].mxu0  ;;  %v4456_v61 = vmul.f32 0.5, %v4454_v0 }
0x3c7d   :  { %5643 = vtanh.f32 %v4455_v10  ;;  %v4457_v35 = vmul.f32 0.5, %v4455_v10  ;;  %v5440_v7 = vld [vmem:[#allocation5 + $0x3c0] ss:$8 sps:$4 sm:$0xff]  }
0x3c7e   :  { %5645 = vtanh.f32 %v4456_v61  ;;  %v5442_v61 = vld [vmem:[#allocation5 + $0x3e0] ss:$8 sps:$4 sm:$0xff]  }
0x3c87   :  { %v5644_v27 = vpop.eup %5643 }
0x3c88   :  { %4467 = vrot.lane.b32.xlu0 %v5644_v27, %s5699_s24  ;;  %v5646_v24 = vpop.eup %5645  ;;  %v5441_v27 = vld [vmem:[#allocation5 + $0x3d0] ss:$8 sps:$4 sm:$0xff]  }
0x3c89   :  { %v4460_v44 = vmul.f32 0.5, %v5646_v24 }
0x3c8b   :  { %v4462_v16 = vadd.f32 0.5, %v4460_v44 }
0x3c8d   :  { %v4464_v4 = vmul.f32 %v4462_v16, %v4398_v5 }
0x3cfa   :  { %v4468_v31 = vpop.permute.xlu0 %4467 }
0x3cfb   :  { %v4470_v36 = vmul.f32 %v4468_v31, %v4462_v16 }
0x3cfd   :  { %4472 = vrot.lane.b32.xlu1 %v4470_v36, %s5699_s24 }
0x3d6f   :  { %v4473_v39 = vpop.permute.xlu1 %4472 }
0x3d70   :  { %v4475_v17 = vadd.f32 %v4473_v39, %v4464_v4 }
0x3d72   :  { %5647 = vtanh.f32 %v4475_v17 }
0x3d73   :  { %5649 = vtanh.f32 %v4457_v35 }
0x3d7c   :  { %v5648_v47 = vpop.eup %5647 }
0x3d7d   :  { %4478 = vrot.lane.b32.xlu0 %v5648_v47, %s5699_s24  ;;  %v5650_v42 = vpop.eup %5649 }
0x3d7e   :  { %v4461_v48 = vmul.f32 0.5, %v5650_v42 }
0x3d80   :  { %v4463_v50 = vadd.f32 0.5, %v4461_v48 }
0x3def   :  { %v4479_v45 = vpop.permute.xlu0 %4478 }
0x3df0   :  { %v4481_v54 = vmul.f32 %v4479_v45, %v4463_v50  ;;  %v4641_v50 = vld [vmem:[#allocation2 + $0x18] sm:$0xff] }
0x3df2   :  { %4482 = vst.msk [vmem:[#allocation2 + $0x28] sm:$0xff] %vm99_vm4, %v4481_v54  ;;  %v4486_v63 = vpack.c.bf16 %v4481_v54, %v4481_v54 }
0x3df3   :  { %4483 = vst.msk [vmem:[#allocation2 + $0x10] sm:$0xff] %vm2308_vm15, %v4481_v54  ;;  %v4642_v54 = vld [vmem:[#allocation2 + $0x20] sm:$0xff] }
0x3df4   :  { %4934 = vmatmul.mubr.msk.bf16.vlgmr.msra.gmra.mrb[120].mxu1 %vm532_vm11, %v4486_v63 }
0x3df5   :  { %5112 = vmatpush3.bf16.msra.mxu1 %v5439_v8 }
0x3df6   :  { %5113 = vmatprep.subr.bf16.mxu1 %v5440_v7 }
0x3df9   :  { %5114 = vmatpush3.bf16.msra.mxu1 %v5440_v7  ;;  %v4643_v42 = vld [vmem:[#allocation2 + $0x28] sm:$0xff] }
0x3dfa   :  { %5115 = vmatprep.subr.bf16.mxu1 %v5441_v27  ;;  %v4648_v63 = vpack.c.bf16 %v4643_v42, %v4642_v54 }
0x3dfd   :  { %5116 = vmatpush3.bf16.msra.mxu1 %v5441_v27 }
0x3dfe   :  { %5117 = vmatprep.subr.bf16.mxu1 %v5442_v61 }
0x3e01   :  { %5118 = vmatpush3.bf16.msra.mxu1 %v5442_v61 }
0x3ec7   :  { %v4524_v49 = vpop.f32.mrb[120].mxu1 }
0x3ec8   :  { %v4531_v37 = vadd.f32 %v4524_v49, %v3950_v43  ;;  %v4526_v56 = vpop.f32.mrb[121].mxu1 }
0x3ec9   :  { %v4532_v60 = vadd.f32 %v4526_v56, %v3952_v22  ;;  %v4528_v51 = vpop.f32.mrb[122].mxu1 }
0x3eca   :  { %v4529_v40 = vpop.f32.mrb[123].mxu1  ;;  %v4533_v3 = vmul.f32 0.5, %v4531_v37  ;;  %v4658_v37 = vld [vmem:[%s7120_s2 + $0x20] ss:$0 sm:$0xff] }
0x3ecb   :  { %5651 = vtanh.f32 %v4532_v60  ;;  %v4534_v25 = vmul.f32 0.5, %v4532_v60 }
0x3ecc   :  { %5653 = vtanh.f32 %v4533_v3 }
0x3ed5   :  { %v5652_v20 = vpop.eup %5651 }
0x3ed6   :  { %4544 = vrot.lane.b32.xlu1 %v5652_v20, %s5699_s24  ;;  %v5654_v57 = vpop.eup %5653 }
0x3ed7   :  { %v4537_v34 = vmul.f32 0.5, %v5654_v57 }
0x3ed9   :  { %v4539_v2 = vadd.f32 0.5, %v4537_v34 }
0x3edb   :  { %v4541_v13 = vmul.f32 %v4539_v2, %v4475_v17  ;;  %v4640_v17 = vld [vmem:[#allocation2 + $0x10] sm:$0xff] }
0x3edc   :  { %v4647_v45 = vpack.c.bf16 %v4641_v50, %v4640_v17 }
0x3f48   :  { %v4545_v23 = vpop.permute.xlu1 %4544 }
0x3f49   :  { %v4547_v62 = vmul.f32 %v4545_v23, %v4539_v2 }
0x3f4b   :  { %4549 = vrot.lane.b32.xlu0 %v4547_v62, %s5699_s24 }
0x3fbd   :  { %v4550_v11 = vpop.permute.xlu0 %4549 }
0x3fbe   :  { %v4552_v38 = vadd.f32 %v4550_v11, %v4541_v13 }
0x3fc0   :  { %5655 = vtanh.f32 %v4552_v38 }
0x3fc1   :  { %5657 = vtanh.f32 %v4534_v25 }
0x3fca   :  { %v5656_v33 = vpop.eup %5655 }
0x3fcb   :  { %4555 = vrot.lane.b32.xlu1 %v5656_v33, %s5699_s24  ;;  %v5658_v41 = vpop.eup %5657 }
0x3fcc   :  { %v4538_v19 = vmul.f32 0.5, %v5658_v41 }
0x3fce   :  { %v4540_v32 = vadd.f32 0.5, %v4538_v19 }
0x403d   :  { %v4556_v55 = vpop.permute.xlu1 %4555 }
0x403e   :  { %v4558_v29 = vmul.f32 %v4556_v55, %v4540_v32 }
0x4040   :  { %4559 = vst.msk [vmem:[#allocation2 + $0x30] sm:$0xff] %vm99_vm4, %v4558_v29  ;;  %v4563_v5 = vpack.c.bf16 %v4558_v29, %v4558_v29 }
0x4041   :  { %4560 = vst.msk [vmem:[#allocation2 + $0x8] sm:$0xff] %vm2308_vm15, %v4558_v29 }
0x4042   :  { %4935 = vmatmul.mubr.msk.bf16.vlgmr.msra.gmra.mrb[104].mxu0 %vm532_vm11, %v4563_v5 }
0x4047   :  { %v4644_v22 = vld [vmem:[#allocation2 + $0x30] sm:$0xff] }
0x4048   :  { %v4639_v35 = vld [vmem:[#allocation2 + $0x8] sm:$0xff] }
0x4115   :  { %v4601_v52 = vpop.f32.mrb[104].mxu0 }
0x4116   :  { %v4608_v18 = vadd.f32 %v4601_v52, %v3954_v53  ;;  %v4603_v15 = vpop.f32.mrb[105].mxu0 }
0x4117   :  { %v4609_v6 = vadd.f32 %v4603_v15, %v3956_v1  ;;  %v4605_v59 = vpop.f32.mrb[106].mxu0 }
0x4118   :  { %v4606_v12 = vpop.f32.mrb[107].mxu0  ;;  %v4610_v21 = vmul.f32 0.5, %v4608_v18 }
0x4119   :  { %5659 = vtanh.f32 %v4609_v6  ;;  %v4611_v44 = vmul.f32 0.5, %v4609_v6 }
0x411a   :  { %5661 = vtanh.f32 %v4610_v21 }
0x4123   :  { %v5660_v30 = vpop.eup %5659 }
0x4124   :  { %4621 = vrot.lane.b32.xlu0 %v5660_v30, %s5699_s24  ;;  %v5662_v58 = vpop.eup %5661 }
0x4125   :  { %v4614_v0 = vmul.f32 0.5, %v5662_v58 }
0x4127   :  { %v4616_v28 = vadd.f32 0.5, %v4614_v0 }
0x4129   :  { %v4618_v14 = vmul.f32 %v4616_v28, %v4552_v38 }
0x4196   :  { %v4622_v10 = vpop.permute.xlu0 %4621 }
0x4197   :  { %v4624_v46 = vmul.f32 %v4622_v10, %v4616_v28 }
0x4199   :  { %4626 = vrot.lane.b32.xlu1 %v4624_v46, %s5699_s24 }
0x420b   :  { %v4627_v9 = vpop.permute.xlu1 %4626 }
0x420c   :  { %v4629_v26 = vadd.f32 %v4627_v9, %v4618_v14 }
0x420e   :  { %5663 = vtanh.f32 %v4629_v26 }
0x420f   :  { %5665 = vtanh.f32 %v4611_v44 }
0x4218   :  { %v5664_v24 = vpop.eup %5663 }
0x4219   :  { %4632 = vrot.lane.b32.xlu0 %v5664_v24, %s5699_s24  ;;  %v5666_v16 = vpop.eup %5665 }
0x421a   :  { %v4615_v31 = vmul.f32 0.5, %v5666_v16 }
0x421c   :  { %v4617_v36 = vadd.f32 0.5, %v4615_v31 }
0x428b   :  { %v4633_v4 = vpop.permute.xlu0 %4632 }
0x428c   :  { %v4635_v39 = vmul.f32 %v4633_v4, %v4617_v36 }
0x428e   :  { %4636 = vst.msk [vmem:[#allocation2 + $0x38] sm:$0xff] %vm99_vm4, %v4635_v39 }
0x428f   :  { %4637 = vst.msk [vmem:[#allocation2] sm:$0xff] %vm2308_vm15, %v4635_v39 }
0x4295   :  { %v4645_v43 = vld [vmem:[#allocation2 + $0x38] sm:$0xff] }
0x4296   :  { %v4638_v47 = vld [vmem:[#allocation2] sm:$0xff]  ;;  %v4649_v49 = vpack.c.bf16 %v4645_v43, %v4644_v22 }
0x4297   :  { %v4646_v48 = vpack.c.bf16 %v4639_v35, %v4638_v47 }
0x4299   :  { %5119 = vmatprep.mubr.msk.bf16.mxu1 %vm532_vm11, %v4646_v48 }
0x429a   :  { %5120 = vmatmul.mubr.msk.bf16.vlgmr.msra.gmra.mrb[124].mxu1 %vm532_vm11, %v4647_v45 }
0x429b   :  { %5123 = vmatprep.mubr.msk.bf16.mxu1 %vm532_vm11, %v4648_v63 }
0x42a2   :  { %5124 = vmatmul.mubr.msk.bf16.gmra.mrb[128].mxu1 %vm532_vm11, %v4649_v49 }
0x436d   :  { %v5121_v56 = vpop.f32.mrb[124].mxu1 }
0x436e   :  { %v4738_v60 = vadd.f32 %v5121_v56, %v4658_v37  ;;  %v4729_v51 = vpop.f32.mrb[125].mxu1 }
0x436f   :  { %v4730_v40 = vadd.f32 %v4729_v51, %v4658_v37  ;;  %v5122_v20 = vpop.f32.mrb[126].mxu1 }
0x4370   :  { %4762 = vst [vmem:[%s7121_s3 + $0x10] sm:$0xff] %v4738_v60  ;;  %v4741_v3 = vadd.f32 %v5122_v20, %v4658_v37  ;;  %v4732_v57 = vpop.f32.mrb[127].mxu1 }
0x4371   :  { %4760 = vst [vmem:[%s7121_s3] sm:$0xff] %v4730_v40  ;;  %v4733_v34 = vadd.f32 %v4732_v57, %v4658_v37 }
0x4372   :  { %4763 = vst [vmem:[%s7121_s3 + $0x18] sm:$0xff] %v4741_v3 }
0x4373   :  { %4761 = vst [vmem:[%s7121_s3 + $0x8] sm:$0xff] %v4733_v34 }
0x4375   :  { %v5125_v2 = vpop.f32.mrb[128].mxu1 }
0x4376   :  { %v4754_v23 = vadd.f32 %v5125_v2, %v4658_v37  ;;  %v4745_v62 = vpop.f32.mrb[129].mxu1 }
0x4377   :  { %v4746_v13 = vadd.f32 %v4745_v62, %v4658_v37  ;;  %v5126_v11 = vpop.f32.mrb[130].mxu1 }
0x4378   :  { %4766 = vst [vmem:[%s7121_s3 + $0x30] sm:$0xff] %v4754_v23  ;;  %v4757_v38 = vadd.f32 %v5126_v11, %v4658_v37  ;;  %v4748_v33 = vpop.f32.mrb[131].mxu1 }
0x4379   :  { %4764 = vst [vmem:[%s7121_s3 + $0x20] sm:$0xff] %v4746_v13  ;;  %v4749_v25 = vadd.f32 %v4748_v33, %v4658_v37 }
0x437a   :  { %4767 = vst [vmem:[%s7121_s3 + $0x38] sm:$0xff] %v4757_v38 }
0x437b   :  { %4765 = vst [vmem:[%s7121_s3 + $0x28] sm:$0xff] %v4749_v25 }
0x437c   :  { %4772 = vsyncpa [#allocation6], 1 }

</bundles_post_ra>
